<compile_context>
chip_gen: v6e
topology: v6e:2x2x1
jax: 0.10.0
libtpu: 0.0.40
codegen_flags: <defaults>
</compile_context>

<pallas_src>
import functools
import math

import jax
import jax.numpy as jnp
from jax.experimental import pallas as pl
from jax.experimental.pallas import tpu as pltpu

# ----------------------------------------------------------------------------
# Model configuration (small shapes implied by the module, scaled down)
# ----------------------------------------------------------------------------
BATCH = 2
IMG = 56                      # 4x4 = 16 patches of size 14 (stand-in for 224)
PATCH = 14
EMBED_DIM = 128
DEPTH = 2
NUM_HEADS = 2
HEAD_DIM = EMBED_DIM // NUM_HEADS
NUM_REG = 4                   # register tokens (dinov2 *_reg models)
MLP_HIDDEN = 4 * EMBED_DIM
OUT_FEATURES = 100
LINEAR_FEATURES = 2 * EMBED_DIM                      # [CLS | mean(patch)] like *_lc head
REDUCER_HIDDEN = (LINEAR_FEATURES + OUT_FEATURES) // 2
LN_EPS = 1e-6


def _round_up(x, m):
    return ((x + m - 1) // m) * m


def _pick_tile(padded, candidates):
    for c in candidates:
        if padded % c == 0:
            return c
    return padded


# ----------------------------------------------------------------------------
# Fused (optional LayerNorm) -> matmul -> per-channel affine -> activation
#        -> (optional residual add) kernel
# ----------------------------------------------------------------------------
def _fused_linear_kernel(*refs, act, n_k, has_ln, has_res, eps):
    x_ref, w_ref, s_ref, b_ref = refs[:4]
    i = 4
    if has_ln:
        g_ref, be_ref = refs[i], refs[i + 1]
        i += 2
    if has_res:
        r_ref = refs[i]
        i += 1
    o_ref = refs[i]

    def epilogue(acc):
        y = acc * s_ref[...] + b_ref[...]                  # f32 epilogue
        if act == "elu":
            y = jnp.where(y > 0, y, jnp.exp(jnp.minimum(y, 0.0)) - 1.0)
        elif act == "gelu":
            c = 0.7978845608028654                         # sqrt(2/pi), tanh approx
            y = 0.5 * y * (1.0 + jnp.tanh(c * (y + 0.044715 * y * y * y)))
        if has_res:
            y = y + r_ref[...].astype(jnp.float32)
        return y.astype(o_ref.dtype)

    x = x_ref[...]
    if has_ln:                                             # pre-LN fused prologue (f32)
        x = x.astype(jnp.float32)
        mu = jnp.mean(x, axis=-1, keepdims=True)
        xc = x - mu
        var = jnp.mean(xc * xc, axis=-1, keepdims=True)
        x = xc * jax.lax.rsqrt(var + eps) * g_ref[...] + be_ref[...]
    xb = x.astype(jnp.bfloat16)                            # bf16 MXU input

    if n_k == 1:
        acc = jnp.dot(xb, w_ref[...], preferred_element_type=jnp.float32)
        o_ref[...] = epilogue(acc)
    else:
        k = pl.program_id(2)

        @pl.when(k == 0)
        def _():
            o_ref[...] = jnp.zeros_like(o_ref)

        o_ref[...] += jnp.dot(xb, w_ref[...], preferred_element_type=jnp.float32)

        @pl.when(k == n_k - 1)
        def _():
            o_ref[...] = epilogue(o_ref[...])


def fused_linear(x, lin, out_cols, act="none", ln=None, residual=None,
                 out_dtype=jnp.float32):
    """y = act(LN?(x) @ w * scale + bias) (+ residual).  Weights pre-padded bf16."""
    M, K = x.shape
    Kp, Np = lin["w"].shape
    assert K <= Kp and out_cols <= Np
    Mp = _round_up(M, 16)
    xp = x if (Mp, Kp) == (M, K) else jnp.pad(x, ((0, Mp - M), (0, Kp - K)))

    tn = Np if Np <= 512 else _pick_tile(Np, (512, 256, 128))
    tk = Kp if Kp <= 1024 else _pick_tile(Kp, (1024, 512, 256, 128))
    n_k = Kp // tk
    has_ln = ln is not None
    has_res = residual is not None
    if has_ln:
        assert Kp == K and n_k == 1      # LN needs the full feature row in one K tile
    if n_k > 1:
        assert out_dtype == jnp.float32  # multi-K accumulates in the f32 output block

    in_arrays = [xp, lin["w"], lin["scale"], lin["bias"]]
    in_specs = [
        pl.BlockSpec((Mp, tk), lambda i, j, k: (i, k)),
        pl.BlockSpec((tk, tn), lambda i, j, k: (k, j)),
        pl.BlockSpec((1, tn), lambda i, j, k: (0, j)),
        pl.BlockSpec((1, tn), lambda i, j, k: (0, j)),
    ]
    if has_ln:
        in_arrays += [ln[0], ln[1]]
        in_specs += [pl.BlockSpec((1, tk), lambda i, j, k: (0, k))] * 2
    if has_res:
        rM, rN = residual.shape
        rp = residual if (Mp, Np) == (rM, rN) else jnp.pad(
            residual, ((0, Mp - rM), (0, Np - rN)))
        in_arrays.append(rp)
        in_specs.append(pl.BlockSpec((Mp, tn), lambda i, j, k: (i, j)))

    out = pl.pallas_call(
        functools.partial(_fused_linear_kernel, act=act, n_k=n_k,
                          has_ln=has_ln, has_res=has_res, eps=LN_EPS),
        out_shape=jax.ShapeDtypeStruct((Mp, Np), out_dtype),
        grid_spec=pltpu.PrefetchScalarGridSpec(
            num_scalar_prefetch=0,
            grid=(1, Np // tn, n_k),
            in_specs=in_specs,
            out_specs=pl.BlockSpec((Mp, tn), lambda i, j, k: (i, j)),
        ),
        compiler_params=pltpu.CompilerParams(
            dimension_semantics=("parallel", "parallel", "arbitrary")),
    )(*in_arrays)
    return out[:M, :out_cols]


# ----------------------------------------------------------------------------
# Standalone LayerNorm kernel (used once for the final norm)
# ----------------------------------------------------------------------------
def _layernorm_kernel(x_ref, g_ref, b_ref, o_ref, *, eps):
    x = x_ref[...].astype(jnp.float32)
    mu = jnp.mean(x, axis=-1, keepdims=True)
    xc = x - mu
    var = jnp.mean(xc * xc, axis=-1, keepdims=True)
    o_ref[...] = (xc * jax.lax.rsqrt(var + eps) * g_ref[...] + b_ref[...]).astype(o_ref.dtype)


def layernorm(x, gamma, beta):
    R, D = x.shape
    Rp = _round_up(R, 16)
    xp = x if Rp == R else jnp.pad(x, ((0, Rp - R), (0, 0)))
    out = pl.pallas_call(
        functools.partial(_layernorm_kernel, eps=LN_EPS),
        out_shape=jax.ShapeDtypeStruct((Rp, D), jnp.float32),
        grid_spec=pltpu.PrefetchScalarGridSpec(
            num_scalar_prefetch=0,
            grid=(1,),
            in_specs=[
                pl.BlockSpec((Rp, D), lambda i: (0, 0)),
                pl.BlockSpec((1, D), lambda i: (0, 0)),
                pl.BlockSpec((1, D), lambda i: (0, 0)),
            ],
            out_specs=pl.BlockSpec((Rp, D), lambda i: (0, 0)),
        ),
    )(xp, gamma, beta)
    return out[:R]


# ----------------------------------------------------------------------------
# Multi-head attention: one batch element per grid step, heads sliced in-kernel
# from the packed QKV block, lane-dense (Sp, 128) output (padded keys masked).
# ----------------------------------------------------------------------------
def _attention_kernel(qkv_ref, o_ref, *, num_heads, head_dim, sm_scale, valid_len):
    D = num_heads * head_dim
    x = qkv_ref[0]                                         # (Sp, 3D) bf16
    outs = []
    for h in range(num_heads):
        q = x[:, h * head_dim:(h + 1) * head_dim]
        k = x[:, D + h * head_dim:D + (h + 1) * head_dim]
        v = x[:, 2 * D + h * head_dim:2 * D + (h + 1) * head_dim]
        s = jax.lax.dot_general(q, k, dimension_numbers=(((1,), (1,)), ((), ())),
                                preferred_element_type=jnp.float32) * sm_scale
        key_idx = jax.lax.broadcasted_iota(jnp.int32, s.shape, 1)
        s = jnp.where(key_idx < valid_len, s, -1e30)       # mask padded keys
        m = jnp.max(s, axis=-1, keepdims=True)
        p = jnp.exp(s - m)
        l = jnp.sum(p, axis=-1, keepdims=True)
        o = jnp.dot(p.astype(v.dtype), v, preferred_element_type=jnp.float32)
        outs.append(o * pl.reciprocal(l, approx=True))
    o_ref[0] = jnp.concatenate(outs, axis=-1).astype(o_ref.dtype)


def attention(qkv, seq_len):
    B, Sp, threeD = qkv.shape
    D = threeD // 3
    return pl.pallas_call(
        functools.partial(_attention_kernel, num_heads=NUM_HEADS, head_dim=HEAD_DIM,
                          sm_scale=1.0 / math.sqrt(HEAD_DIM), valid_len=seq_len),
        out_shape=jax.ShapeDtypeStruct((B, Sp, D), jnp.bfloat16),
        grid_spec=pltpu.PrefetchScalarGridSpec(
            num_scalar_prefetch=0,
            grid=(B,),
            in_specs=[pl.BlockSpec((1, Sp, threeD), lambda b: (b, 0, 0))],
            out_specs=pl.BlockSpec((1, Sp, D), lambda b: (b, 0, 0)),
        ),
        compiler_params=pltpu.CompilerParams(dimension_semantics=("parallel",)),
    )(qkv)


# ----------------------------------------------------------------------------
# Parameter construction: weights pre-padded (lane-aligned) and bf16 ONCE here
# ----------------------------------------------------------------------------
def _init_linear(key, k_in, n_out, layer_scale=None):
    kw, kb = jax.random.split(key)
    w = jax.random.normal(kw, (k_in, n_out), jnp.float32) / math.sqrt(k_in)
    b = jax.random.normal(kb, (n_out,), jnp.float32) * 0.02
    g = (jnp.ones((n_out,), jnp.float32) if layer_scale is None
         else jnp.full((n_out,), layer_scale, jnp.float32))    # LayerScale folded here
    kp = _round_up(k_in, 128)
    np_ = _round_up(n_out, 128)
    return {
        "w": jnp.pad(w, ((0, kp - k_in), (0, np_ - n_out))).astype(jnp.bfloat16),
        "scale": jnp.pad(g, (0, np_ - n_out)).reshape(1, np_).astype(jnp.float32),
        "bias": jnp.pad(b * g, (0, np_ - n_out)).reshape(1, np_).astype(jnp.float32),
    }


def init_params(key):
    num_patches = (IMG // PATCH) ** 2
    keys = jax.random.split(key, 8 + DEPTH)
    params = {
        "patch_embed": _init_linear(keys[0], 3 * PATCH * PATCH, EMBED_DIM),
        "cls_token": jax.random.normal(keys[1], (1, 1, EMBED_DIM), jnp.float32) * 0.02,
        "reg_tokens": jax.random.normal(keys[2], (1, NUM_REG, EMBED_DIM), jnp.float32) * 0.02,
        "pos_embed": jax.random.normal(keys[3], (1, 1 + num_patches, EMBED_DIM), jnp.float32) * 0.02,
        "ln_f_g": jnp.ones((1, EMBED_DIM), jnp.float32),
        "ln_f_b": jnp.zeros((1, EMBED_DIM), jnp.float32),
        "red_fc1": _init_linear(keys[4 + DEPTH], LINEAR_FEATURES, REDUCER_HIDDEN),
        "red_fc2": _init_linear(keys[5 + DEPTH], REDUCER_HIDDEN, OUT_FEATURES),
    }
    blocks = []
    for d in range(DEPTH):
        bk = jax.random.split(keys[4 + d], 4)
        blocks.append({
            "ln1_g": jnp.ones((1, EMBED_DIM), jnp.float32),
            "ln1_b": jnp.zeros((1, EMBED_DIM), jnp.float32),
            "qkv": _init_linear(bk[0], EMBED_DIM, 3 * EMBED_DIM),
            "proj": _init_linear(bk[1], EMBED_DIM, EMBED_DIM, layer_scale=1.0),
            "ln2_g": jnp.ones((1, EMBED_DIM), jnp.float32),
            "ln2_b": jnp.zeros((1, EMBED_DIM), jnp.float32),
            "fc1": _init_linear(bk[2], EMBED_DIM, MLP_HIDDEN),
            "fc2": _init_linear(bk[3], MLP_HIDDEN, EMBED_DIM, layer_scale=1.0),
        })
    params["blocks"] = blocks
    return params


# ----------------------------------------------------------------------------
# Forward pass (token rows stay padded to Sp for the whole backbone)
# ----------------------------------------------------------------------------
def transformer_block(tokens2d, blk, batch, sp, seq_len):
    D = EMBED_DIM
    # --- attention branch (LN fused into QKV linear, residual fused into proj) ---
    qkv = fused_linear(tokens2d, blk["qkv"], 3 * D,
                       ln=(blk["ln1_g"], blk["ln1_b"]), out_dtype=jnp.bfloat16)
    qkv = qkv.reshape(batch, sp, 3 * D)
    attn = attention(qkv, seq_len).reshape(batch * sp, D)
    tokens2d = fused_linear(attn, blk["proj"], D, residual=tokens2d)

    # --- MLP branch (LN fused into fc1, residual fused into fc2) ---
    h = fused_linear(tokens2d, blk["fc1"], MLP_HIDDEN, act="gelu",
                     ln=(blk["ln2_g"], blk["ln2_b"]), out_dtype=jnp.bfloat16)
    tokens2d = fused_linear(h, blk["fc2"], D, residual=tokens2d)
    return tokens2d


def vit_encoder_forward(params, x_nchw):
    B = x_nchw.shape[0]
    nh = IMG // PATCH
    num_patches = nh * nh
    D = EMBED_DIM

    # patch embedding: 14x14 stride-14 conv == per-patch linear
    x = x_nchw.astype(jnp.float32).reshape(B, 3, nh, PATCH, nh, PATCH)
    x = x.transpose(0, 2, 4, 1, 3, 5).reshape(B * num_patches, 3 * PATCH * PATCH)
    patch_tok = fused_linear(x, params["patch_embed"], D).reshape(B, num_patches, D)

    # token sequence: [CLS, register tokens, patches]; pos-embed on CLS + patches
    cls = params["cls_token"] + params["pos_embed"][:, :1]
    patch_tok = patch_tok + params["pos_embed"][:, 1:]
    tokens = jnp.concatenate([
        jnp.broadcast_to(cls, (B, 1, D)),
        jnp.broadcast_to(params["reg_tokens"], (B, NUM_REG, D)),
        patch_tok,
    ], axis=1)
    S = tokens.shape[1]
    Sp = _round_up(S, 16)                       # pad the sequence once, keep it padded
    tokens = jnp.pad(tokens, ((0, 0), (0, Sp - S), (0, 0)))
    tokens2d = tokens.reshape(B * Sp, D)

    for blk in params["blocks"]:
        tokens2d = transformer_block(tokens2d, blk, B, Sp, S)

    # final LN and [CLS | mean(patch tokens)] feature (as in the *_lc head input)
    xn = layernorm(tokens2d, params["ln_f_g"], params["ln_f_b"]).reshape(B, Sp, D)
    feat = jnp.concatenate([xn[:, 0], jnp.mean(xn[:, 1 + NUM_REG:S], axis=1)], axis=-1)

    # reducer: Linear -> ELU -> Linear
    h = fused_linear(feat, params["red_fc1"], REDUCER_HIDDEN, act="elu",
                     out_dtype=jnp.bfloat16)
    out = fused_linear(h, params["red_fc2"], OUT_FEATURES)
    return out


if __name__ == "__main__":
    key = jax.random.PRNGKey(0)
    key, kx = jax.random.split(key)
    x = jax.random.normal(kx, (BATCH, 3, IMG, IMG), jnp.float32)
    params = init_params(key)

    fwd = jax.jit(vit_encoder_forward)
    out = jax.block_until_ready(fwd(params, x))

    assert out.shape == (BATCH, OUT_FEATURES), out.shape
    assert bool(jnp.all(jnp.isfinite(out)))
    print("KERNEL_OK")
</pallas_src>

<mosaic_0001>
module attributes {stable_mosaic.version = 11 : i64} {
  func.func @_fused_linear_kernel(%arg0: i32, %arg1: i32, %arg2: i32, %arg3: memref<32x640xf32, #tpu.memory_space<vmem>>, %arg4: memref<640x128xbf16, #tpu.memory_space<vmem>>, %arg5: memref<1x128xf32, #tpu.memory_space<vmem>>, %arg6: memref<1x128xf32, #tpu.memory_space<vmem>>, %arg7: memref<32x128xf32, #tpu.memory_space<vmem>>) attributes {dimension_semantics = [#tpu.dimension_semantics<parallel>, #tpu.dimension_semantics<parallel>, #tpu.dimension_semantics<arbitrary>], iteration_bounds = array<i64: 1, 1, 1>, scalar_prefetch = 0 : i64, scratch_operands = 0 : i64, tpu.core_type = #tpu.core_type<tc>, window_params = [{transform_indices = @transform_0, window_bounds = array<i64: 32, 640>}, {transform_indices = @transform_1, window_bounds = array<i64: 640, 128>}, {transform_indices = @transform_2, window_bounds = array<i64: 1, 128>}, {transform_indices = @transform_3, window_bounds = array<i64: 1, 128>}, {transform_indices = @transform_4, window_bounds = array<i64: 32, 128>}]} {
    %c0 = arith.constant 0 : index
    %c0_0 = arith.constant 0 : index
    %0 = vector.load %arg3[%c0, %c0_0] : memref<32x640xf32, #tpu.memory_space<vmem>>, vector<32x640xf32>
    %1 = arith.truncf %0 : vector<32x640xf32> to vector<32x640xbf16>
    %c0_1 = arith.constant 0 : index
    %c0_2 = arith.constant 0 : index
    %2 = vector.load %arg4[%c0_1, %c0_2] : memref<640x128xbf16, #tpu.memory_space<vmem>>, vector<640x128xbf16>
    %cst = arith.constant dense<0.000000e+00> : vector<32x128xf32>
    %3 = tpu.matmul %1, %2, %cst {dimension_numbers = #tpu.dot_dimension_numbers<[1], [0], [0], [1], [0, 0, 1, 1], [], []>} : vector<32x640xbf16>, vector<640x128xbf16>, vector<32x128xf32> -> vector<32x128xf32>
    %c0_3 = arith.constant 0 : index
    %c0_4 = arith.constant 0 : index
    %4 = vector.load %arg5[%c0_3, %c0_4] : memref<1x128xf32, #tpu.memory_space<vmem>>, vector<1x128xf32>
    %5 = vector.broadcast %4 : vector<1x128xf32> to vector<32x128xf32>
    %6 = arith.mulf %3, %5 : vector<32x128xf32>
    %c0_5 = arith.constant 0 : index
    %c0_6 = arith.constant 0 : index
    %7 = vector.load %arg6[%c0_5, %c0_6] : memref<1x128xf32, #tpu.memory_space<vmem>>, vector<1x128xf32>
    %8 = vector.broadcast %7 : vector<1x128xf32> to vector<32x128xf32>
    %9 = arith.addf %6, %8 : vector<32x128xf32>
    %c0_7 = arith.constant 0 : index
    %c0_8 = arith.constant 0 : index
    %10 = vector.load %arg7[%c0_7, %c0_8] : memref<32x128xf32, #tpu.memory_space<vmem>>, vector<32x128xf32>
    tpu.vector_store %arg7[%c0_7, %c0_8], %9 {strides = array<i32>} : memref<32x128xf32, #tpu.memory_space<vmem>>, vector<32x128xf32>,
    return
  }
  func.func @transform_0(%arg0: i32, %arg1: i32, %arg2: i32) -> (i32, i32) {
    %c0_i32 = arith.constant 0 : i32
    return %arg0, %arg2 : i32, i32
  }
  func.func @transform_1(%arg0: i32, %arg1: i32, %arg2: i32) -> (i32, i32) {
    %c0_i32 = arith.constant 0 : i32
    return %arg2, %arg1 : i32, i32
  }
  func.func @transform_2(%arg0: i32, %arg1: i32, %arg2: i32) -> (i32, i32) {
    %c0_i32 = arith.constant 0 : i32
    %c0_i32_0 = arith.constant 0 : i32
    return %c0_i32, %arg1 : i32, i32
  }
  func.func @transform_3(%arg0: i32, %arg1: i32, %arg2: i32) -> (i32, i32) {
    %c0_i32 = arith.constant 0 : i32
    %c0_i32_0 = arith.constant 0 : i32
    return %c0_i32, %arg1 : i32, i32
  }
  func.func @transform_4(%arg0: i32, %arg1: i32, %arg2: i32) -> (i32, i32) {
    %c0_i32 = arith.constant 0 : i32
    return %arg0, %arg1 : i32, i32
  }
}

module attributes {stable_mosaic.version = 11 : i64} {
  func.func @_fused_linear_kernel(%arg0: i32, %arg1: i32, %arg2: i32, %arg3: memref<64x128xf32, #tpu.memory_space<vmem>>, %arg4: memref<128x384xbf16, #tpu.memory_space<vmem>>, %arg5: memref<1x384xf32, #tpu.memory_space<vmem>>, %arg6: memref<1x384xf32, #tpu.memory_space<vmem>>, %arg7: memref<1x128xf32, #tpu.memory_space<vmem>>, %arg8: memref<1x128xf32, #tpu.memory_space<vmem>>, %arg9: memref<64x384xbf16, #tpu.memory_space<vmem>>) attributes {dimension_semantics = [#tpu.dimension_semantics<parallel>, #tpu.dimension_semantics<parallel>, #tpu.dimension_semantics<arbitrary>], iteration_bounds = array<i64: 1, 1, 1>, scalar_prefetch = 0 : i64, scratch_operands = 0 : i64, tpu.core_type = #tpu.core_type<tc>, window_params = [{transform_indices = @transform_0, window_bounds = array<i64: 64, 128>}, {transform_indices = @transform_1, window_bounds = array<i64: 128, 384>}, {transform_indices = @transform_2, window_bounds = array<i64: 1, 384>}, {transform_indices = @transform_3, window_bounds = array<i64: 1, 384>}, {transform_indices = @transform_4, window_bounds = array<i64: 1, 128>}, {transform_indices = @transform_5, window_bounds = array<i64: 1, 128>}, {transform_indices = @transform_6, window_bounds = array<i64: 64, 384>}]} {
    %c0 = arith.constant 0 : index
    %c0_0 = arith.constant 0 : index
    %0 = vector.load %arg3[%c0, %c0_0] : memref<64x128xf32, #tpu.memory_space<vmem>>, vector<64x128xf32>
    %cst = arith.constant dense<0.000000e+00> : vector<64xf32>
    %1 = vector.multi_reduction <add>, %0, %cst [1] : vector<64x128xf32> to vector<64xf32>
    %2 = vector.shape_cast %1 : vector<64xf32> to vector<64x1xf32>
    %cst_1 = arith.constant 1.280000e+02 : f32
    %3 = vector.broadcast %cst_1 : f32 to vector<64x1xf32>
    %4 = arith.divf %2, %3 : vector<64x1xf32>
    %5 = vector.broadcast %4 : vector<64x1xf32> to vector<64x128xf32>
    %6 = arith.subf %0, %5 : vector<64x128xf32>
    %7 = arith.mulf %6, %6 : vector<64x128xf32>
    %cst_2 = arith.constant dense<0.000000e+00> : vector<64xf32>
    %8 = vector.multi_reduction <add>, %7, %cst_2 [1] : vector<64x128xf32> to vector<64xf32>
    %9 = vector.shape_cast %8 : vector<64xf32> to vector<64x1xf32>
    %cst_3 = arith.constant 1.280000e+02 : f32
    %10 = vector.broadcast %cst_3 : f32 to vector<64x1xf32>
    %11 = arith.divf %9, %10 : vector<64x1xf32>
    %cst_4 = arith.constant 9.99999997E-7 : f32
    %12 = vector.broadcast %cst_4 : f32 to vector<64x1xf32>
    %13 = arith.addf %11, %12 : vector<64x1xf32>
    %14 = math.rsqrt %13 : vector<64x1xf32>
    %15 = vector.broadcast %14 : vector<64x1xf32> to vector<64x128xf32>
    %16 = arith.mulf %6, %15 : vector<64x128xf32>
    %c0_5 = arith.constant 0 : index
    %c0_6 = arith.constant 0 : index
    %17 = vector.load %arg7[%c0_5, %c0_6] : memref<1x128xf32, #tpu.memory_space<vmem>>, vector<1x128xf32>
    %18 = vector.broadcast %17 : vector<1x128xf32> to vector<64x128xf32>
    %19 = arith.mulf %16, %18 : vector<64x128xf32>
    %c0_7 = arith.constant 0 : index
    %c0_8 = arith.constant 0 : index
    %20 = vector.load %arg8[%c0_7, %c0_8] : memref<1x128xf32, #tpu.memory_space<vmem>>, vector<1x128xf32>
    %21 = vector.broadcast %20 : vector<1x128xf32> to vector<64x128xf32>
    %22 = arith.addf %19, %21 : vector<64x128xf32>
    %23 = arith.truncf %22 : vector<64x128xf32> to vector<64x128xbf16>
    %c0_9 = arith.constant 0 : index
    %c0_10 = arith.constant 0 : index
    %24 = vector.load %arg4[%c0_9, %c0_10] : memref<128x384xbf16, #tpu.memory_space<vmem>>, vector<128x384xbf16>
    %cst_11 = arith.constant dense<0.000000e+00> : vector<64x384xf32>
    %25 = tpu.matmul %23, %24, %cst_11 {dimension_numbers = #tpu.dot_dimension_numbers<[1], [0], [0], [1], [0, 0, 1, 1], [], []>} : vector<64x128xbf16>, vector<128x384xbf16>, vector<64x384xf32> -> vector<64x384xf32>
    %c0_12 = arith.constant 0 : index
    %c0_13 = arith.constant 0 : index
    %26 = vector.load %arg5[%c0_12, %c0_13] : memref<1x384xf32, #tpu.memory_space<vmem>>, vector<1x384xf32>
    %27 = vector.broadcast %26 : vector<1x384xf32> to vector<64x384xf32>
    %28 = arith.mulf %25, %27 : vector<64x384xf32>
    %c0_14 = arith.constant 0 : index
    %c0_15 = arith.constant 0 : index
    %29 = vector.load %arg6[%c0_14, %c0_15] : memref<1x384xf32, #tpu.memory_space<vmem>>, vector<1x384xf32>
    %30 = vector.broadcast %29 : vector<1x384xf32> to vector<64x384xf32>
    %31 = arith.addf %28, %30 : vector<64x384xf32>
    %32 = arith.truncf %31 : vector<64x384xf32> to vector<64x384xbf16>
    %c0_16 = arith.constant 0 : index
    %c0_17 = arith.constant 0 : index
    %33 = vector.load %arg9[%c0_16, %c0_17] : memref<64x384xbf16, #tpu.memory_space<vmem>>, vector<64x384xbf16>
    tpu.vector_store %arg9[%c0_16, %c0_17], %32 {strides = array<i32>} : memref<64x384xbf16, #tpu.memory_space<vmem>>, vector<64x384xbf16>,
    return
  }
  func.func @transform_0(%arg0: i32, %arg1: i32, %arg2: i32) -> (i32, i32) {
    %c0_i32 = arith.constant 0 : i32
    return %arg0, %arg2 : i32, i32
  }
  func.func @transform_1(%arg0: i32, %arg1: i32, %arg2: i32) -> (i32, i32) {
    %c0_i32 = arith.constant 0 : i32
    return %arg2, %arg1 : i32, i32
  }
  func.func @transform_2(%arg0: i32, %arg1: i32, %arg2: i32) -> (i32, i32) {
    %c0_i32 = arith.constant 0 : i32
    %c0_i32_0 = arith.constant 0 : i32
    return %c0_i32, %arg1 : i32, i32
  }
  func.func @transform_3(%arg0: i32, %arg1: i32, %arg2: i32) -> (i32, i32) {
    %c0_i32 = arith.constant 0 : i32
    %c0_i32_0 = arith.constant 0 : i32
    return %c0_i32, %arg1 : i32, i32
  }
  func.func @transform_4(%arg0: i32, %arg1: i32, %arg2: i32) -> (i32, i32) {
    %c0_i32 = arith.constant 0 : i32
    %c0_i32_0 = arith.constant 0 : i32
    return %c0_i32, %arg2 : i32, i32
  }
  func.func @transform_5(%arg0: i32, %arg1: i32, %arg2: i32) -> (i32, i32) {
    %c0_i32 = arith.constant 0 : i32
    %c0_i32_0 = arith.constant 0 : i32
    return %c0_i32, %arg2 : i32, i32
  }
  func.func @transform_6(%arg0: i32, %arg1: i32, %arg2: i32) -> (i32, i32) {
    %c0_i32 = arith.constant 0 : i32
    return %arg0, %arg1 : i32, i32
  }
}

module attributes {stable_mosaic.version = 11 : i64} {
  func.func @_attention_kernel(%arg0: i32, %arg1: memref<1x32x384xbf16, #tpu.memory_space<vmem>>, %arg2: memref<1x32x128xbf16, #tpu.memory_space<vmem>>) attributes {dimension_semantics = [#tpu.dimension_semantics<parallel>], iteration_bounds = array<i64: 2>, scalar_prefetch = 0 : i64, scratch_operands = 0 : i64, tpu.core_type = #tpu.core_type<tc>, window_params = [{transform_indices = @transform_0, window_bounds = array<i64: 1, 32, 384>}, {transform_indices = @transform_1, window_bounds = array<i64: 1, 32, 128>}]} {
    %c0 = arith.constant 0 : index
    %c0_0 = arith.constant 0 : index
    %c0_1 = arith.constant 0 : index
    %0 = vector.load %arg1[%c0, %c0_0, %c0_1] : memref<1x32x384xbf16, #tpu.memory_space<vmem>>, vector<1x32x384xbf16>
    %1 = vector.shape_cast %0 : vector<1x32x384xbf16> to vector<32x384xbf16>
    %2 = vector.extract_strided_slice %1 {offsets = [0, 0], sizes = [32, 64], strides = [1, 1]} : vector<32x384xbf16> to vector<32x64xbf16>
    %3 = vector.extract_strided_slice %1 {offsets = [0, 128], sizes = [32, 64], strides = [1, 1]} : vector<32x384xbf16> to vector<32x64xbf16>
    %4 = vector.extract_strided_slice %1 {offsets = [0, 256], sizes = [32, 64], strides = [1, 1]} : vector<32x384xbf16> to vector<32x64xbf16>
    %cst = arith.constant dense<0.000000e+00> : vector<32x32xf32>
    %5 = tpu.matmul %2, %3, %cst {dimension_numbers = #tpu.dot_dimension_numbers<[1], [1], [0], [0], [0, 0, 1, 0], [], []>} : vector<32x64xbf16>, vector<32x64xbf16>, vector<32x32xf32> -> vector<32x32xf32>
    %cst_2 = arith.constant 1.250000e-01 : f32
    %6 = vector.broadcast %cst_2 : f32 to vector<32x32xf32>
    %7 = arith.mulf %5, %6 : vector<32x32xf32>
    %8 = tpu.iota {dimensions = array<i32: 1>} : vector<32x32xi32>
    %c21_i32 = arith.constant 21 : i32
    %9 = vector.broadcast %c21_i32 : i32 to vector<32x32xi32>
    %10 = arith.cmpi slt, %8, %9 : vector<32x32xi32>
    %cst_3 = arith.constant -1.000000e+30 : f32
    %11 = vector.broadcast %cst_3 : f32 to vector<32x32xf32>
    %12 = arith.select %10, %7, %11 : vector<32x32xi1>, vector<32x32xf32>
    %cst_4 = arith.constant dense<0xFF800000> : vector<32xf32>
    %13 = vector.multi_reduction <maximumf>, %12, %cst_4 [1] : vector<32x32xf32> to vector<32xf32>
    %14 = vector.shape_cast %13 : vector<32xf32> to vector<32x1xf32>
    %15 = vector.broadcast %14 : vector<32x1xf32> to vector<32x32xf32>
    %16 = arith.subf %12, %15 : vector<32x32xf32>
    %17 = math.exp %16 : vector<32x32xf32>
    %cst_5 = arith.constant dense<0.000000e+00> : vector<32xf32>
    %18 = vector.multi_reduction <add>, %17, %cst_5 [1] : vector<32x32xf32> to vector<32xf32>
    %19 = vector.shape_cast %18 : vector<32xf32> to vector<32x1xf32>
    %20 = arith.truncf %17 : vector<32x32xf32> to vector<32x32xbf16>
    %cst_6 = arith.constant dense<0.000000e+00> : vector<32x64xf32>
    %21 = tpu.matmul %20, %4, %cst_6 {dimension_numbers = #tpu.dot_dimension_numbers<[1], [0], [0], [1], [0, 0, 1, 1], [], []>} : vector<32x32xbf16>, vector<32x64xbf16>, vector<32x64xf32> -> vector<32x64xf32>
    %22 = tpu.reciprocal %19 {approx = true} : vector<32x1xf32> -> vector<32x1xf32>
    %23 = vector.broadcast %22 : vector<32x1xf32> to vector<32x64xf32>
    %24 = arith.mulf %21, %23 : vector<32x64xf32>
    %25 = vector.extract_strided_slice %1 {offsets = [0, 64], sizes = [32, 64], strides = [1, 1]} : vector<32x384xbf16> to vector<32x64xbf16>
    %26 = vector.extract_strided_slice %1 {offsets = [0, 192], sizes = [32, 64], strides = [1, 1]} : vector<32x384xbf16> to vector<32x64xbf16>
    %27 = vector.extract_strided_slice %1 {offsets = [0, 320], sizes = [32, 64], strides = [1, 1]} : vector<32x384xbf16> to vector<32x64xbf16>
    %cst_7 = arith.constant dense<0.000000e+00> : vector<32x32xf32>
    %28 = tpu.matmul %25, %26, %cst_7 {dimension_numbers = #tpu.dot_dimension_numbers<[1], [1], [0], [0], [0, 0, 1, 0], [], []>} : vector<32x64xbf16>, vector<32x64xbf16>, vector<32x32xf32> -> vector<32x32xf32>
    %cst_8 = arith.constant 1.250000e-01 : f32
    %29 = vector.broadcast %cst_8 : f32 to vector<32x32xf32>
    %30 = arith.mulf %28, %29 : vector<32x32xf32>
    %31 = tpu.iota {dimensions = array<i32: 1>} : vector<32x32xi32>
    %c21_i32_9 = arith.constant 21 : i32
    %32 = vector.broadcast %c21_i32_9 : i32 to vector<32x32xi32>
    %33 = arith.cmpi slt, %31, %32 : vector<32x32xi32>
    %cst_10 = arith.constant -1.000000e+30 : f32
    %34 = vector.broadcast %cst_10 : f32 to vector<32x32xf32>
    %35 = arith.select %33, %30, %34 : vector<32x32xi1>, vector<32x32xf32>
    %cst_11 = arith.constant dense<0xFF800000> : vector<32xf32>
    %36 = vector.multi_reduction <maximumf>, %35, %cst_11 [1] : vector<32x32xf32> to vector<32xf32>
    %37 = vector.shape_cast %36 : vector<32xf32> to vector<32x1xf32>
    %38 = vector.broadcast %37 : vector<32x1xf32> to vector<32x32xf32>
    %39 = arith.subf %35, %38 : vector<32x32xf32>
    %40 = math.exp %39 : vector<32x32xf32>
    %cst_12 = arith.constant dense<0.000000e+00> : vector<32xf32>
    %41 = vector.multi_reduction <add>, %40, %cst_12 [1] : vector<32x32xf32> to vector<32xf32>
    %42 = vector.shape_cast %41 : vector<32xf32> to vector<32x1xf32>
    %43 = arith.truncf %40 : vector<32x32xf32> to vector<32x32xbf16>
    %cst_13 = arith.constant dense<0.000000e+00> : vector<32x64xf32>
    %44 = tpu.matmul %43, %27, %cst_13 {dimension_numbers = #tpu.dot_dimension_numbers<[1], [0], [0], [1], [0, 0, 1, 1], [], []>} : vector<32x32xbf16>, vector<32x64xbf16>, vector<32x64xf32> -> vector<32x64xf32>
    %45 = tpu.reciprocal %42 {approx = true} : vector<32x1xf32> -> vector<32x1xf32>
    %46 = vector.broadcast %45 : vector<32x1xf32> to vector<32x64xf32>
    %47 = arith.mulf %44, %46 : vector<32x64xf32>
    %48 = tpu.concatenate %24, %47 in 1 : vector<32x64xf32>, vector<32x64xf32> -> vector<32x128xf32>
    %49 = arith.truncf %48 : vector<32x128xf32> to vector<32x128xbf16>
    %c0_14 = arith.constant 0 : index
    %c0_15 = arith.constant 0 : index
    %c0_16 = arith.constant 0 : index
    %50 = vector.load %arg2[%c0_14, %c0_15, %c0_16] : memref<1x32x128xbf16, #tpu.memory_space<vmem>>, vector<1x32x128xbf16>
    %51 = vector.shape_cast %50 : vector<1x32x128xbf16> to vector<32x128xbf16>
    %52 = vector.shape_cast %49 : vector<32x128xbf16> to vector<1x32x128xbf16>
    tpu.vector_store %arg2[%c0_14, %c0_15, %c0_16], %52 {strides = array<i32>} : memref<1x32x128xbf16, #tpu.memory_space<vmem>>, vector<1x32x128xbf16>,
    return
  }
  func.func @transform_0(%arg0: i32) -> (i32, i32, i32) {
    %c0_i32 = arith.constant 0 : i32
    %c0_i32_0 = arith.constant 0 : i32
    %c0_i32_1 = arith.constant 0 : i32
    return %arg0, %c0_i32, %c0_i32_0 : i32, i32, i32
  }
  func.func @transform_1(%arg0: i32) -> (i32, i32, i32) {
    %c0_i32 = arith.constant 0 : i32
    %c0_i32_0 = arith.constant 0 : i32
    %c0_i32_1 = arith.constant 0 : i32
    return %arg0, %c0_i32, %c0_i32_0 : i32, i32, i32
  }
}

module attributes {stable_mosaic.version = 11 : i64} {
  func.func @_fused_linear_kernel(%arg0: i32, %arg1: i32, %arg2: i32, %arg3: memref<64x128xbf16, #tpu.memory_space<vmem>>, %arg4: memref<128x128xbf16, #tpu.memory_space<vmem>>, %arg5: memref<1x128xf32, #tpu.memory_space<vmem>>, %arg6: memref<1x128xf32, #tpu.memory_space<vmem>>, %arg7: memref<64x128xf32, #tpu.memory_space<vmem>>, %arg8: memref<64x128xf32, #tpu.memory_space<vmem>>) attributes {dimension_semantics = [#tpu.dimension_semantics<parallel>, #tpu.dimension_semantics<parallel>, #tpu.dimension_semantics<arbitrary>], iteration_bounds = array<i64: 1, 1, 1>, scalar_prefetch = 0 : i64, scratch_operands = 0 : i64, tpu.core_type = #tpu.core_type<tc>, window_params = [{transform_indices = @transform_0, window_bounds = array<i64: 64, 128>}, {transform_indices = @transform_1, window_bounds = array<i64: 128, 128>}, {transform_indices = @transform_2, window_bounds = array<i64: 1, 128>}, {transform_indices = @transform_3, window_bounds = array<i64: 1, 128>}, {transform_indices = @transform_4, window_bounds = array<i64: 64, 128>}, {transform_indices = @transform_5, window_bounds = array<i64: 64, 128>}]} {
    %c0 = arith.constant 0 : index
    %c0_0 = arith.constant 0 : index
    %0 = vector.load %arg3[%c0, %c0_0] : memref<64x128xbf16, #tpu.memory_space<vmem>>, vector<64x128xbf16>
    %c0_1 = arith.constant 0 : index
    %c0_2 = arith.constant 0 : index
    %1 = vector.load %arg4[%c0_1, %c0_2] : memref<128x128xbf16, #tpu.memory_space<vmem>>, vector<128x128xbf16>
    %cst = arith.constant dense<0.000000e+00> : vector<64x128xf32>
    %2 = tpu.matmul %0, %1, %cst {dimension_numbers = #tpu.dot_dimension_numbers<[1], [0], [0], [1], [0, 0, 1, 1], [], []>} : vector<64x128xbf16>, vector<128x128xbf16>, vector<64x128xf32> -> vector<64x128xf32>
    %c0_3 = arith.constant 0 : index
    %c0_4 = arith.constant 0 : index
    %3 = vector.load %arg5[%c0_3, %c0_4] : memref<1x128xf32, #tpu.memory_space<vmem>>, vector<1x128xf32>
    %4 = vector.broadcast %3 : vector<1x128xf32> to vector<64x128xf32>
    %5 = arith.mulf %2, %4 : vector<64x128xf32>
    %c0_5 = arith.constant 0 : index
    %c0_6 = arith.constant 0 : index
    %6 = vector.load %arg6[%c0_5, %c0_6] : memref<1x128xf32, #tpu.memory_space<vmem>>, vector<1x128xf32>
    %7 = vector.broadcast %6 : vector<1x128xf32> to vector<64x128xf32>
    %8 = arith.addf %5, %7 : vector<64x128xf32>
    %c0_7 = arith.constant 0 : index
    %c0_8 = arith.constant 0 : index
    %9 = vector.load %arg7[%c0_7, %c0_8] : memref<64x128xf32, #tpu.memory_space<vmem>>, vector<64x128xf32>
    %10 = arith.addf %8, %9 : vector<64x128xf32>
    %c0_9 = arith.constant 0 : index
    %c0_10 = arith.constant 0 : index
    %11 = vector.load %arg8[%c0_9, %c0_10] : memref<64x128xf32, #tpu.memory_space<vmem>>, vector<64x128xf32>
    tpu.vector_store %arg8[%c0_9, %c0_10], %10 {strides = array<i32>} : memref<64x128xf32, #tpu.memory_space<vmem>>, vector<64x128xf32>,
    return
  }
  func.func @transform_0(%arg0: i32, %arg1: i32, %arg2: i32) -> (i32, i32) {
    %c0_i32 = arith.constant 0 : i32
    return %arg0, %arg2 : i32, i32
  }
  func.func @transform_1(%arg0: i32, %arg1: i32, %arg2: i32) -> (i32, i32) {
    %c0_i32 = arith.constant 0 : i32
    return %arg2, %arg1 : i32, i32
  }
  func.func @transform_2(%arg0: i32, %arg1: i32, %arg2: i32) -> (i32, i32) {
    %c0_i32 = arith.constant 0 : i32
    %c0_i32_0 = arith.constant 0 : i32
    return %c0_i32, %arg1 : i32, i32
  }
  func.func @transform_3(%arg0: i32, %arg1: i32, %arg2: i32) -> (i32, i32) {
    %c0_i32 = arith.constant 0 : i32
    %c0_i32_0 = arith.constant 0 : i32
    return %c0_i32, %arg1 : i32, i32
  }
  func.func @transform_4(%arg0: i32, %arg1: i32, %arg2: i32) -> (i32, i32) {
    %c0_i32 = arith.constant 0 : i32
    return %arg0, %arg1 : i32, i32
  }
  func.func @transform_5(%arg0: i32, %arg1: i32, %arg2: i32) -> (i32, i32) {
    %c0_i32 = arith.constant 0 : i32
    return %arg0, %arg1 : i32, i32
  }
}

module attributes {stable_mosaic.version = 11 : i64} {
  func.func @_fused_linear_kernel(%arg0: i32, %arg1: i32, %arg2: i32, %arg3: memref<64x128xf32, #tpu.memory_space<vmem>>, %arg4: memref<128x512xbf16, #tpu.memory_space<vmem>>, %arg5: memref<1x512xf32, #tpu.memory_space<vmem>>, %arg6: memref<1x512xf32, #tpu.memory_space<vmem>>, %arg7: memref<1x128xf32, #tpu.memory_space<vmem>>, %arg8: memref<1x128xf32, #tpu.memory_space<vmem>>, %arg9: memref<64x512xbf16, #tpu.memory_space<vmem>>) attributes {dimension_semantics = [#tpu.dimension_semantics<parallel>, #tpu.dimension_semantics<parallel>, #tpu.dimension_semantics<arbitrary>], iteration_bounds = array<i64: 1, 1, 1>, scalar_prefetch = 0 : i64, scratch_operands = 0 : i64, tpu.core_type = #tpu.core_type<tc>, window_params = [{transform_indices = @transform_0, window_bounds = array<i64: 64, 128>}, {transform_indices = @transform_1, window_bounds = array<i64: 128, 512>}, {transform_indices = @transform_2, window_bounds = array<i64: 1, 512>}, {transform_indices = @transform_3, window_bounds = array<i64: 1, 512>}, {transform_indices = @transform_4, window_bounds = array<i64: 1, 128>}, {transform_indices = @transform_5, window_bounds = array<i64: 1, 128>}, {transform_indices = @transform_6, window_bounds = array<i64: 64, 512>}]} {
    %c0 = arith.constant 0 : index
    %c0_0 = arith.constant 0 : index
    %0 = vector.load %arg3[%c0, %c0_0] : memref<64x128xf32, #tpu.memory_space<vmem>>, vector<64x128xf32>
    %cst = arith.constant dense<0.000000e+00> : vector<64xf32>
    %1 = vector.multi_reduction <add>, %0, %cst [1] : vector<64x128xf32> to vector<64xf32>
    %2 = vector.shape_cast %1 : vector<64xf32> to vector<64x1xf32>
    %cst_1 = arith.constant 1.280000e+02 : f32
    %3 = vector.broadcast %cst_1 : f32 to vector<64x1xf32>
    %4 = arith.divf %2, %3 : vector<64x1xf32>
    %5 = vector.broadcast %4 : vector<64x1xf32> to vector<64x128xf32>
    %6 = arith.subf %0, %5 : vector<64x128xf32>
    %7 = arith.mulf %6, %6 : vector<64x128xf32>
    %cst_2 = arith.constant dense<0.000000e+00> : vector<64xf32>
    %8 = vector.multi_reduction <add>, %7, %cst_2 [1] : vector<64x128xf32> to vector<64xf32>
    %9 = vector.shape_cast %8 : vector<64xf32> to vector<64x1xf32>
    %cst_3 = arith.constant 1.280000e+02 : f32
    %10 = vector.broadcast %cst_3 : f32 to vector<64x1xf32>
    %11 = arith.divf %9, %10 : vector<64x1xf32>
    %cst_4 = arith.constant 9.99999997E-7 : f32
    %12 = vector.broadcast %cst_4 : f32 to vector<64x1xf32>
    %13 = arith.addf %11, %12 : vector<64x1xf32>
    %14 = math.rsqrt %13 : vector<64x1xf32>
    %15 = vector.broadcast %14 : vector<64x1xf32> to vector<64x128xf32>
    %16 = arith.mulf %6, %15 : vector<64x128xf32>
    %c0_5 = arith.constant 0 : index
    %c0_6 = arith.constant 0 : index
    %17 = vector.load %arg7[%c0_5, %c0_6] : memref<1x128xf32, #tpu.memory_space<vmem>>, vector<1x128xf32>
    %18 = vector.broadcast %17 : vector<1x128xf32> to vector<64x128xf32>
    %19 = arith.mulf %16, %18 : vector<64x128xf32>
    %c0_7 = arith.constant 0 : index
    %c0_8 = arith.constant 0 : index
    %20 = vector.load %arg8[%c0_7, %c0_8] : memref<1x128xf32, #tpu.memory_space<vmem>>, vector<1x128xf32>
    %21 = vector.broadcast %20 : vector<1x128xf32> to vector<64x128xf32>
    %22 = arith.addf %19, %21 : vector<64x128xf32>
    %23 = arith.truncf %22 : vector<64x128xf32> to vector<64x128xbf16>
    %c0_9 = arith.constant 0 : index
    %c0_10 = arith.constant 0 : index
    %24 = vector.load %arg4[%c0_9, %c0_10] : memref<128x512xbf16, #tpu.memory_space<vmem>>, vector<128x512xbf16>
    %cst_11 = arith.constant dense<0.000000e+00> : vector<64x512xf32>
    %25 = tpu.matmul %23, %24, %cst_11 {dimension_numbers = #tpu.dot_dimension_numbers<[1], [0], [0], [1], [0, 0, 1, 1], [], []>} : vector<64x128xbf16>, vector<128x512xbf16>, vector<64x512xf32> -> vector<64x512xf32>
    %c0_12 = arith.constant 0 : index
    %c0_13 = arith.constant 0 : index
    %26 = vector.load %arg5[%c0_12, %c0_13] : memref<1x512xf32, #tpu.memory_space<vmem>>, vector<1x512xf32>
    %27 = vector.broadcast %26 : vector<1x512xf32> to vector<64x512xf32>
    %28 = arith.mulf %25, %27 : vector<64x512xf32>
    %c0_14 = arith.constant 0 : index
    %c0_15 = arith.constant 0 : index
    %29 = vector.load %arg6[%c0_14, %c0_15] : memref<1x512xf32, #tpu.memory_space<vmem>>, vector<1x512xf32>
    %30 = vector.broadcast %29 : vector<1x512xf32> to vector<64x512xf32>
    %31 = arith.addf %28, %30 : vector<64x512xf32>
    %cst_16 = arith.constant 5.000000e-01 : f32
    %32 = vector.broadcast %cst_16 : f32 to vector<64x512xf32>
    %33 = arith.mulf %32, %31 : vector<64x512xf32>
    %cst_17 = arith.constant 4.471500e-02 : f32
    %34 = vector.broadcast %cst_17 : f32 to vector<64x512xf32>
    %35 = arith.mulf %34, %31 : vector<64x512xf32>
    %36 = arith.mulf %35, %31 : vector<64x512xf32>
    %37 = arith.mulf %36, %31 : vector<64x512xf32>
    %38 = arith.addf %31, %37 : vector<64x512xf32>
    %cst_18 = arith.constant 0.797884583 : f32
    %39 = vector.broadcast %cst_18 : f32 to vector<64x512xf32>
    %40 = arith.mulf %39, %38 : vector<64x512xf32>
    %41 = math.tanh %40 : vector<64x512xf32>
    %cst_19 = arith.constant 1.000000e+00 : f32
    %42 = vector.broadcast %cst_19 : f32 to vector<64x512xf32>
    %43 = arith.addf %42, %41 : vector<64x512xf32>
    %44 = arith.mulf %33, %43 : vector<64x512xf32>
    %45 = arith.truncf %44 : vector<64x512xf32> to vector<64x512xbf16>
    %c0_20 = arith.constant 0 : index
    %c0_21 = arith.constant 0 : index
    %46 = vector.load %arg9[%c0_20, %c0_21] : memref<64x512xbf16, #tpu.memory_space<vmem>>, vector<64x512xbf16>
    tpu.vector_store %arg9[%c0_20, %c0_21], %45 {strides = array<i32>} : memref<64x512xbf16, #tpu.memory_space<vmem>>, vector<64x512xbf16>,
    return
  }
  func.func @transform_0(%arg0: i32, %arg1: i32, %arg2: i32) -> (i32, i32) {
    %c0_i32 = arith.constant 0 : i32
    return %arg0, %arg2 : i32, i32
  }
  func.func @transform_1(%arg0: i32, %arg1: i32, %arg2: i32) -> (i32, i32) {
    %c0_i32 = arith.constant 0 : i32
    return %arg2, %arg1 : i32, i32
  }
  func.func @transform_2(%arg0: i32, %arg1: i32, %arg2: i32) -> (i32, i32) {
    %c0_i32 = arith.constant 0 : i32
    %c0_i32_0 = arith.constant 0 : i32
    return %c0_i32, %arg1 : i32, i32
  }
  func.func @transform_3(%arg0: i32, %arg1: i32, %arg2: i32) -> (i32, i32) {
    %c0_i32 = arith.constant 0 : i32
    %c0_i32_0 = arith.constant 0 : i32
    return %c0_i32, %arg1 : i32, i32
  }
  func.func @transform_4(%arg0: i32, %arg1: i32, %arg2: i32) -> (i32, i32) {
    %c0_i32 = arith.constant 0 : i32
    %c0_i32_0 = arith.constant 0 : i32
    return %c0_i32, %arg2 : i32, i32
  }
  func.func @transform_5(%arg0: i32, %arg1: i32, %arg2: i32) -> (i32, i32) {
    %c0_i32 = arith.constant 0 : i32
    %c0_i32_0 = arith.constant 0 : i32
    return %c0_i32, %arg2 : i32, i32
  }
  func.func @transform_6(%arg0: i32, %arg1: i32, %arg2: i32) -> (i32, i32) {
    %c0_i32 = arith.constant 0 : i32
    return %arg0, %arg1 : i32, i32
  }
}

module attributes {stable_mosaic.version = 11 : i64} {
  func.func @_fused_linear_kernel(%arg0: i32, %arg1: i32, %arg2: i32, %arg3: memref<64x512xbf16, #tpu.memory_space<vmem>>, %arg4: memref<512x128xbf16, #tpu.memory_space<vmem>>, %arg5: memref<1x128xf32, #tpu.memory_space<vmem>>, %arg6: memref<1x128xf32, #tpu.memory_space<vmem>>, %arg7: memref<64x128xf32, #tpu.memory_space<vmem>>, %arg8: memref<64x128xf32, #tpu.memory_space<vmem>>) attributes {dimension_semantics = [#tpu.dimension_semantics<parallel>, #tpu.dimension_semantics<parallel>, #tpu.dimension_semantics<arbitrary>], iteration_bounds = array<i64: 1, 1, 1>, scalar_prefetch = 0 : i64, scratch_operands = 0 : i64, tpu.core_type = #tpu.core_type<tc>, window_params = [{transform_indices = @transform_0, window_bounds = array<i64: 64, 512>}, {transform_indices = @transform_1, window_bounds = array<i64: 512, 128>}, {transform_indices = @transform_2, window_bounds = array<i64: 1, 128>}, {transform_indices = @transform_3, window_bounds = array<i64: 1, 128>}, {transform_indices = @transform_4, window_bounds = array<i64: 64, 128>}, {transform_indices = @transform_5, window_bounds = array<i64: 64, 128>}]} {
    %c0 = arith.constant 0 : index
    %c0_0 = arith.constant 0 : index
    %0 = vector.load %arg3[%c0, %c0_0] : memref<64x512xbf16, #tpu.memory_space<vmem>>, vector<64x512xbf16>
    %c0_1 = arith.constant 0 : index
    %c0_2 = arith.constant 0 : index
    %1 = vector.load %arg4[%c0_1, %c0_2] : memref<512x128xbf16, #tpu.memory_space<vmem>>, vector<512x128xbf16>
    %cst = arith.constant dense<0.000000e+00> : vector<64x128xf32>
    %2 = tpu.matmul %0, %1, %cst {dimension_numbers = #tpu.dot_dimension_numbers<[1], [0], [0], [1], [0, 0, 1, 1], [], []>} : vector<64x512xbf16>, vector<512x128xbf16>, vector<64x128xf32> -> vector<64x128xf32>
    %c0_3 = arith.constant 0 : index
    %c0_4 = arith.constant 0 : index
    %3 = vector.load %arg5[%c0_3, %c0_4] : memref<1x128xf32, #tpu.memory_space<vmem>>, vector<1x128xf32>
    %4 = vector.broadcast %3 : vector<1x128xf32> to vector<64x128xf32>
    %5 = arith.mulf %2, %4 : vector<64x128xf32>
    %c0_5 = arith.constant 0 : index
    %c0_6 = arith.constant 0 : index
    %6 = vector.load %arg6[%c0_5, %c0_6] : memref<1x128xf32, #tpu.memory_space<vmem>>, vector<1x128xf32>
    %7 = vector.broadcast %6 : vector<1x128xf32> to vector<64x128xf32>
    %8 = arith.addf %5, %7 : vector<64x128xf32>
    %c0_7 = arith.constant 0 : index
    %c0_8 = arith.constant 0 : index
    %9 = vector.load %arg7[%c0_7, %c0_8] : memref<64x128xf32, #tpu.memory_space<vmem>>, vector<64x128xf32>
    %10 = arith.addf %8, %9 : vector<64x128xf32>
    %c0_9 = arith.constant 0 : index
    %c0_10 = arith.constant 0 : index
    %11 = vector.load %arg8[%c0_9, %c0_10] : memref<64x128xf32, #tpu.memory_space<vmem>>, vector<64x128xf32>
    tpu.vector_store %arg8[%c0_9, %c0_10], %10 {strides = array<i32>} : memref<64x128xf32, #tpu.memory_space<vmem>>, vector<64x128xf32>,
    return
  }
  func.func @transform_0(%arg0: i32, %arg1: i32, %arg2: i32) -> (i32, i32) {
    %c0_i32 = arith.constant 0 : i32
    return %arg0, %arg2 : i32, i32
  }
  func.func @transform_1(%arg0: i32, %arg1: i32, %arg2: i32) -> (i32, i32) {
    %c0_i32 = arith.constant 0 : i32
    return %arg2, %arg1 : i32, i32
  }
  func.func @transform_2(%arg0: i32, %arg1: i32, %arg2: i32) -> (i32, i32) {
    %c0_i32 = arith.constant 0 : i32
    %c0_i32_0 = arith.constant 0 : i32
    return %c0_i32, %arg1 : i32, i32
  }
  func.func @transform_3(%arg0: i32, %arg1: i32, %arg2: i32) -> (i32, i32) {
    %c0_i32 = arith.constant 0 : i32
    %c0_i32_0 = arith.constant 0 : i32
    return %c0_i32, %arg1 : i32, i32
  }
  func.func @transform_4(%arg0: i32, %arg1: i32, %arg2: i32) -> (i32, i32) {
    %c0_i32 = arith.constant 0 : i32
    return %arg0, %arg1 : i32, i32
  }
  func.func @transform_5(%arg0: i32, %arg1: i32, %arg2: i32) -> (i32, i32) {
    %c0_i32 = arith.constant 0 : i32
    return %arg0, %arg1 : i32, i32
  }
}

module attributes {stable_mosaic.version = 11 : i64} {
  func.func @_layernorm_kernel(%arg0: i32, %arg1: memref<64x128xf32, #tpu.memory_space<vmem>>, %arg2: memref<1x128xf32, #tpu.memory_space<vmem>>, %arg3: memref<1x128xf32, #tpu.memory_space<vmem>>, %arg4: memref<64x128xf32, #tpu.memory_space<vmem>>) attributes {dimension_semantics = [#tpu.dimension_semantics<arbitrary>], iteration_bounds = array<i64: 1>, scalar_prefetch = 0 : i64, scratch_operands = 0 : i64, tpu.core_type = #tpu.core_type<tc>, window_params = [{pipeline_mode = #tpu.pipeline_mode<synchronous>, transform_indices = @transform_0, window_bounds = array<i64: 64, 128>}, {pipeline_mode = #tpu.pipeline_mode<synchronous>, transform_indices = @transform_1, window_bounds = array<i64: 1, 128>}, {pipeline_mode = #tpu.pipeline_mode<synchronous>, transform_indices = @transform_2, window_bounds = array<i64: 1, 128>}, {pipeline_mode = #tpu.pipeline_mode<synchronous>, transform_indices = @transform_3, window_bounds = array<i64: 64, 128>}]} {
    %c0 = arith.constant 0 : index
    %c0_0 = arith.constant 0 : index
    %0 = vector.load %arg1[%c0, %c0_0] : memref<64x128xf32, #tpu.memory_space<vmem>>, vector<64x128xf32>
    %cst = arith.constant dense<0.000000e+00> : vector<64xf32>
    %1 = vector.multi_reduction <add>, %0, %cst [1] : vector<64x128xf32> to vector<64xf32>
    %2 = vector.shape_cast %1 : vector<64xf32> to vector<64x1xf32>
    %cst_1 = arith.constant 1.280000e+02 : f32
    %3 = vector.broadcast %cst_1 : f32 to vector<64x1xf32>
    %4 = arith.divf %2, %3 : vector<64x1xf32>
    %5 = vector.broadcast %4 : vector<64x1xf32> to vector<64x128xf32>
    %6 = arith.subf %0, %5 : vector<64x128xf32>
    %7 = arith.mulf %6, %6 : vector<64x128xf32>
    %cst_2 = arith.constant dense<0.000000e+00> : vector<64xf32>
    %8 = vector.multi_reduction <add>, %7, %cst_2 [1] : vector<64x128xf32> to vector<64xf32>
    %9 = vector.shape_cast %8 : vector<64xf32> to vector<64x1xf32>
    %cst_3 = arith.constant 1.280000e+02 : f32
    %10 = vector.broadcast %cst_3 : f32 to vector<64x1xf32>
    %11 = arith.divf %9, %10 : vector<64x1xf32>
    %cst_4 = arith.constant 9.99999997E-7 : f32
    %12 = vector.broadcast %cst_4 : f32 to vector<64x1xf32>
    %13 = arith.addf %11, %12 : vector<64x1xf32>
    %14 = math.rsqrt %13 : vector<64x1xf32>
    %15 = vector.broadcast %14 : vector<64x1xf32> to vector<64x128xf32>
    %16 = arith.mulf %6, %15 : vector<64x128xf32>
    %c0_5 = arith.constant 0 : index
    %c0_6 = arith.constant 0 : index
    %17 = vector.load %arg2[%c0_5, %c0_6] : memref<1x128xf32, #tpu.memory_space<vmem>>, vector<1x128xf32>
    %18 = vector.broadcast %17 : vector<1x128xf32> to vector<64x128xf32>
    %19 = arith.mulf %16, %18 : vector<64x128xf32>
    %c0_7 = arith.constant 0 : index
    %c0_8 = arith.constant 0 : index
    %20 = vector.load %arg3[%c0_7, %c0_8] : memref<1x128xf32, #tpu.memory_space<vmem>>, vector<1x128xf32>
    %21 = vector.broadcast %20 : vector<1x128xf32> to vector<64x128xf32>
    %22 = arith.addf %19, %21 : vector<64x128xf32>
    %c0_9 = arith.constant 0 : index
    %c0_10 = arith.constant 0 : index
    %23 = vector.load %arg4[%c0_9, %c0_10] : memref<64x128xf32, #tpu.memory_space<vmem>>, vector<64x128xf32>
    tpu.vector_store %arg4[%c0_9, %c0_10], %22 {strides = array<i32>} : memref<64x128xf32, #tpu.memory_space<vmem>>, vector<64x128xf32>,
    return
  }
  func.func @transform_0(%arg0: i32) -> (i32, i32) {
    %c0_i32 = arith.constant 0 : i32
    %c0_i32_0 = arith.constant 0 : i32
    %c0_i32_1 = arith.constant 0 : i32
    return %c0_i32, %c0_i32_0 : i32, i32
  }
  func.func @transform_1(%arg0: i32) -> (i32, i32) {
    %c0_i32 = arith.constant 0 : i32
    %c0_i32_0 = arith.constant 0 : i32
    %c0_i32_1 = arith.constant 0 : i32
    return %c0_i32, %c0_i32_0 : i32, i32
  }
  func.func @transform_2(%arg0: i32) -> (i32, i32) {
    %c0_i32 = arith.constant 0 : i32
    %c0_i32_0 = arith.constant 0 : i32
    %c0_i32_1 = arith.constant 0 : i32
    return %c0_i32, %c0_i32_0 : i32, i32
  }
  func.func @transform_3(%arg0: i32) -> (i32, i32) {
    %c0_i32 = arith.constant 0 : i32
    %c0_i32_0 = arith.constant 0 : i32
    %c0_i32_1 = arith.constant 0 : i32
    return %c0_i32, %c0_i32_0 : i32, i32
  }
}

module attributes {stable_mosaic.version = 11 : i64} {
  func.func @_fused_linear_kernel(%arg0: i32, %arg1: i32, %arg2: i32, %arg3: memref<16x256xf32, #tpu.memory_space<vmem>>, %arg4: memref<256x256xbf16, #tpu.memory_space<vmem>>, %arg5: memref<1x256xf32, #tpu.memory_space<vmem>>, %arg6: memref<1x256xf32, #tpu.memory_space<vmem>>, %arg7: memref<16x256xbf16, #tpu.memory_space<vmem>>) attributes {dimension_semantics = [#tpu.dimension_semantics<parallel>, #tpu.dimension_semantics<parallel>, #tpu.dimension_semantics<arbitrary>], iteration_bounds = array<i64: 1, 1, 1>, scalar_prefetch = 0 : i64, scratch_operands = 0 : i64, tpu.core_type = #tpu.core_type<tc>, window_params = [{transform_indices = @transform_0, window_bounds = array<i64: 16, 256>}, {transform_indices = @transform_1, window_bounds = array<i64: 256, 256>}, {transform_indices = @transform_2, window_bounds = array<i64: 1, 256>}, {transform_indices = @transform_3, window_bounds = array<i64: 1, 256>}, {transform_indices = @transform_4, window_bounds = array<i64: 16, 256>}]} {
    %c0 = arith.constant 0 : index
    %c0_0 = arith.constant 0 : index
    %0 = vector.load %arg3[%c0, %c0_0] : memref<16x256xf32, #tpu.memory_space<vmem>>, vector<16x256xf32>
    %1 = arith.truncf %0 : vector<16x256xf32> to vector<16x256xbf16>
    %c0_1 = arith.constant 0 : index
    %c0_2 = arith.constant 0 : index
    %2 = vector.load %arg4[%c0_1, %c0_2] : memref<256x256xbf16, #tpu.memory_space<vmem>>, vector<256x256xbf16>
    %cst = arith.constant dense<0.000000e+00> : vector<16x256xf32>
    %3 = tpu.matmul %1, %2, %cst {dimension_numbers = #tpu.dot_dimension_numbers<[1], [0], [0], [1], [0, 0, 1, 1], [], []>} : vector<16x256xbf16>, vector<256x256xbf16>, vector<16x256xf32> -> vector<16x256xf32>
    %c0_3 = arith.constant 0 : index
    %c0_4 = arith.constant 0 : index
    %4 = vector.load %arg5[%c0_3, %c0_4] : memref<1x256xf32, #tpu.memory_space<vmem>>, vector<1x256xf32>
    %5 = vector.broadcast %4 : vector<1x256xf32> to vector<16x256xf32>
    %6 = arith.mulf %3, %5 : vector<16x256xf32>
    %c0_5 = arith.constant 0 : index
    %c0_6 = arith.constant 0 : index
    %7 = vector.load %arg6[%c0_5, %c0_6] : memref<1x256xf32, #tpu.memory_space<vmem>>, vector<1x256xf32>
    %8 = vector.broadcast %7 : vector<1x256xf32> to vector<16x256xf32>
    %9 = arith.addf %6, %8 : vector<16x256xf32>
    %cst_7 = arith.constant 0.000000e+00 : f32
    %10 = vector.broadcast %cst_7 : f32 to vector<16x256xf32>
    %11 = arith.cmpf ogt, %9, %10 : vector<16x256xf32>
    %cst_8 = arith.constant 0.000000e+00 : f32
    %12 = vector.broadcast %cst_8 : f32 to vector<16x256xf32>
    %13 = arith.minimumf %9, %12 : vector<16x256xf32>
    %14 = math.exp %13 : vector<16x256xf32>
    %cst_9 = arith.constant 1.000000e+00 : f32
    %15 = vector.broadcast %cst_9 : f32 to vector<16x256xf32>
    %16 = arith.subf %14, %15 : vector<16x256xf32>
    %17 = arith.select %11, %9, %16 : vector<16x256xi1>, vector<16x256xf32>
    %18 = arith.truncf %17 : vector<16x256xf32> to vector<16x256xbf16>
    %c0_10 = arith.constant 0 : index
    %c0_11 = arith.constant 0 : index
    %19 = vector.load %arg7[%c0_10, %c0_11] : memref<16x256xbf16, #tpu.memory_space<vmem>>, vector<16x256xbf16>
    tpu.vector_store %arg7[%c0_10, %c0_11], %18 {strides = array<i32>} : memref<16x256xbf16, #tpu.memory_space<vmem>>, vector<16x256xbf16>,
    return
  }
  func.func @transform_0(%arg0: i32, %arg1: i32, %arg2: i32) -> (i32, i32) {
    %c0_i32 = arith.constant 0 : i32
    return %arg0, %arg2 : i32, i32
  }
  func.func @transform_1(%arg0: i32, %arg1: i32, %arg2: i32) -> (i32, i32) {
    %c0_i32 = arith.constant 0 : i32
    return %arg2, %arg1 : i32, i32
  }
  func.func @transform_2(%arg0: i32, %arg1: i32, %arg2: i32) -> (i32, i32) {
    %c0_i32 = arith.constant 0 : i32
    %c0_i32_0 = arith.constant 0 : i32
    return %c0_i32, %arg1 : i32, i32
  }
  func.func @transform_3(%arg0: i32, %arg1: i32, %arg2: i32) -> (i32, i32) {
    %c0_i32 = arith.constant 0 : i32
    %c0_i32_0 = arith.constant 0 : i32
    return %c0_i32, %arg1 : i32, i32
  }
  func.func @transform_4(%arg0: i32, %arg1: i32, %arg2: i32) -> (i32, i32) {
    %c0_i32 = arith.constant 0 : i32
    return %arg0, %arg1 : i32, i32
  }
}

module attributes {stable_mosaic.version = 11 : i64} {
  func.func @_fused_linear_kernel(%arg0: i32, %arg1: i32, %arg2: i32, %arg3: memref<16x256xbf16, #tpu.memory_space<vmem>>, %arg4: memref<256x128xbf16, #tpu.memory_space<vmem>>, %arg5: memref<1x128xf32, #tpu.memory_space<vmem>>, %arg6: memref<1x128xf32, #tpu.memory_space<vmem>>, %arg7: memref<16x128xf32, #tpu.memory_space<vmem>>) attributes {dimension_semantics = [#tpu.dimension_semantics<parallel>, #tpu.dimension_semantics<parallel>, #tpu.dimension_semantics<arbitrary>], iteration_bounds = array<i64: 1, 1, 1>, scalar_prefetch = 0 : i64, scratch_operands = 0 : i64, tpu.core_type = #tpu.core_type<tc>, window_params = [{transform_indices = @transform_0, window_bounds = array<i64: 16, 256>}, {transform_indices = @transform_1, window_bounds = array<i64: 256, 128>}, {transform_indices = @transform_2, window_bounds = array<i64: 1, 128>}, {transform_indices = @transform_3, window_bounds = array<i64: 1, 128>}, {transform_indices = @transform_4, window_bounds = array<i64: 16, 128>}]} {
    %c0 = arith.constant 0 : index
    %c0_0 = arith.constant 0 : index
    %0 = vector.load %arg3[%c0, %c0_0] : memref<16x256xbf16, #tpu.memory_space<vmem>>, vector<16x256xbf16>
    %c0_1 = arith.constant 0 : index
    %c0_2 = arith.constant 0 : index
    %1 = vector.load %arg4[%c0_1, %c0_2] : memref<256x128xbf16, #tpu.memory_space<vmem>>, vector<256x128xbf16>
    %cst = arith.constant dense<0.000000e+00> : vector<16x128xf32>
    %2 = tpu.matmul %0, %1, %cst {dimension_numbers = #tpu.dot_dimension_numbers<[1], [0], [0], [1], [0, 0, 1, 1], [], []>} : vector<16x256xbf16>, vector<256x128xbf16>, vector<16x128xf32> -> vector<16x128xf32>
    %c0_3 = arith.constant 0 : index
    %c0_4 = arith.constant 0 : index
    %3 = vector.load %arg5[%c0_3, %c0_4] : memref<1x128xf32, #tpu.memory_space<vmem>>, vector<1x128xf32>
    %4 = vector.broadcast %3 : vector<1x128xf32> to vector<16x128xf32>
    %5 = arith.mulf %2, %4 : vector<16x128xf32>
    %c0_5 = arith.constant 0 : index
    %c0_6 = arith.constant 0 : index
    %6 = vector.load %arg6[%c0_5, %c0_6] : memref<1x128xf32, #tpu.memory_space<vmem>>, vector<1x128xf32>
    %7 = vector.broadcast %6 : vector<1x128xf32> to vector<16x128xf32>
    %8 = arith.addf %5, %7 : vector<16x128xf32>
    %c0_7 = arith.constant 0 : index
    %c0_8 = arith.constant 0 : index
    %9 = vector.load %arg7[%c0_7, %c0_8] : memref<16x128xf32, #tpu.memory_space<vmem>>, vector<16x128xf32>
    tpu.vector_store %arg7[%c0_7, %c0_8], %8 {strides = array<i32>} : memref<16x128xf32, #tpu.memory_space<vmem>>, vector<16x128xf32>,
    return
  }
  func.func @transform_0(%arg0: i32, %arg1: i32, %arg2: i32) -> (i32, i32) {
    %c0_i32 = arith.constant 0 : i32
    return %arg0, %arg2 : i32, i32
  }
  func.func @transform_1(%arg0: i32, %arg1: i32, %arg2: i32) -> (i32, i32) {
    %c0_i32 = arith.constant 0 : i32
    return %arg2, %arg1 : i32, i32
  }
  func.func @transform_2(%arg0: i32, %arg1: i32, %arg2: i32) -> (i32, i32) {
    %c0_i32 = arith.constant 0 : i32
    %c0_i32_0 = arith.constant 0 : i32
    return %c0_i32, %arg1 : i32, i32
  }
  func.func @transform_3(%arg0: i32, %arg1: i32, %arg2: i32) -> (i32, i32) {
    %c0_i32 = arith.constant 0 : i32
    %c0_i32_0 = arith.constant 0 : i32
    return %c0_i32, %arg1 : i32, i32
  }
  func.func @transform_4(%arg0: i32, %arg1: i32, %arg2: i32) -> (i32, i32) {
    %c0_i32 = arith.constant 0 : i32
    return %arg0, %arg1 : i32, i32
  }
}

</mosaic_0001>

<bundles_post_ra>
// kernel: vit_encoder_forward.14
= control target key start
LH: loop header
LB: loop body
LE: loop exit
PB: predicated region body
PF: predicated region fallthrough
CT: control target
= control target key end

     0   :  { %s936_s1 = inlined_call_operand.vmem [shape: bf16[640,128], index: 1, kind: input, shape index: {}]   ;;  %s937_s0 = inlined_call_operand.vmem [shape: f32[32,640], index: 0, kind: input, shape index: {}]   ;;  %s938_s2 = inlined_call_operand.vmem [shape: f32[1,128], index: 2, kind: input, shape index: {}]   ;;  %s939_s3 = inlined_call_operand.vmem [shape: f32[1,128], index: 3, kind: input, shape index: {}]   ;;  %s940_s4 = inlined_call_operand.vmem [shape: f32[32,128], index: 4, kind: output, shape index: {}]  }
   0x1   :  { %v673_v0 = vld [vmem:[%s936_s1 + $0x78] sm:$0xff]   ;;  %v677_v4 = vld [vmem:[%s936_s1 + $0x70] sm:$0xff]   ;;  %v681_v8 = vld [vmem:[%s936_s1 + $0x68] sm:$0xff]  }
   0x2   :  { %v674_v1 = vld [vmem:[%s936_s1 + $0xf8] sm:$0xff]   ;;  %587 = vmatprep.subr.bf16.mxu0 %v673_v0  ;;  %v678_v5 = vld [vmem:[%s936_s1 + $0xf0] sm:$0xff]   ;;  %v682_v9 = vld [vmem:[%s936_s1 + $0xe8] sm:$0xff]  }
   0x3   :  { %v675_v2 = vld [vmem:[%s936_s1 + $0x38] sm:$0xff]   ;;  %615 = vmatprep.subr.bf16.mxu1 %v674_v1  ;;  %v679_v6 = vld [vmem:[%s936_s1 + $0x30] sm:$0xff]   ;;  %v683_v10 = vld [vmem:[%s936_s1 + $0x28] sm:$0xff]  }
   0x4   :  { %v676_v3 = vld [vmem:[%s936_s1 + $0xb8] sm:$0xff]   ;;  %588 = vmatpush3.bf16.msra.mxu0 %v675_v2  ;;  %v680_v7 = vld [vmem:[%s936_s1 + $0xb0] sm:$0xff]   ;;  %v684_v11 = vld [vmem:[%s936_s1 + $0xa8] sm:$0xff]  }
   0x5   :  { %616 = vmatpush3.bf16.msra.mxu1 %v676_v3  ;;  %589 = vmatprep.subr.bf16.mxu0 %v677_v4  ;;  %v685_v12 = vld [vmem:[%s936_s1 + $0x60] sm:$0xff]   ;;  %v689_v16 = vld [vmem:[%s936_s1 + $0x58] sm:$0xff]   ;;  %v693_v20 = vld [vmem:[%s936_s1 + $0x50] sm:$0xff]  }
   0x6   :  { %617 = vmatprep.subr.bf16.mxu1 %v678_v5  ;;  %v686_v13 = vld [vmem:[%s936_s1 + $0xe0] sm:$0xff]   ;;  %v690_v17 = vld [vmem:[%s936_s1 + $0xd8] sm:$0xff]   ;;  %v694_v21 = vld [vmem:[%s936_s1 + $0xd0] sm:$0xff]  }
   0x7   :  { %v687_v14 = vld [vmem:[%s936_s1 + $0x20] sm:$0xff]   ;;  %v691_v18 = vld [vmem:[%s936_s1 + $0x18] sm:$0xff]   ;;  %v695_v22 = vld [vmem:[%s936_s1 + $0x10] sm:$0xff]  }
   0x8   :  { %590 = vmatpush3.bf16.msra.mxu0 %v679_v6  ;;  %v688_v15 = vld [vmem:[%s936_s1 + $0xa0] sm:$0xff]   ;;  %v692_v19 = vld [vmem:[%s936_s1 + $0x98] sm:$0xff]   ;;  %v696_v23 = vld [vmem:[%s936_s1 + $0x90] sm:$0xff]  }
   0x9   :  { %618 = vmatpush3.bf16.msra.mxu1 %v680_v7  ;;  %591 = vmatprep.subr.bf16.mxu0 %v681_v8  ;;  %v697_v24 = vld [vmem:[%s936_s1 + $0x48] sm:$0xff]   ;;  %v701_v28 = vld [vmem:[%s936_s1 + $0x40] sm:$0xff]   ;;  %v24_v33 = vld [vmem:[%s937_s0 + $0x30] sm:$0xff] }
   0xa   :  { %619 = vmatprep.subr.bf16.mxu1 %v682_v9  ;;  %v698_v25 = vld [vmem:[%s936_s1 + $0xc8] sm:$0xff]   ;;  %v702_v29 = vld [vmem:[%s936_s1 + $0xc0] sm:$0xff]   ;;  %v21_v34 = vld [vmem:[%s937_s0 + $0x18] sm:$0xff] }
   0xb   :  { %v699_v26 = vld [vmem:[%s936_s1 + $0x8] sm:$0xff]   ;;  %v703_v30 = vld [vmem:[%s936_s1] sm:$0xff]   ;;  %v20_v41 = vld [vmem:[%s937_s0 + $0x10] sm:$0xff] }
   0xc   :  { %592 = vmatpush3.bf16.msra.mxu0 %v683_v10  ;;  %v700_v27 = vld [vmem:[%s936_s1 + $0x88] sm:$0xff]   ;;  %v704_v31 = vld [vmem:[%s936_s1 + $0x80] sm:$0xff]   ;;  %v25_v42 = vld [vmem:[%s937_s0 + $0x38] sm:$0xff] }
   0xd   :  { %620 = vmatpush3.bf16.msra.mxu1 %v684_v11  ;;  %593 = vmatprep.subr.bf16.mxu0 %v685_v12  ;;  %v19_v32 = vld [vmem:[%s937_s0 + $0x8] sm:$0xff]  ;;  %v26_v36 = vld [vmem:[%s937_s0 + $0x40] sm:$0xff]  ;;  %v40_v43 = vpack.c.bf16 %v25_v42, %v20_v41  ;;  %v705_v44 = vld [vmem:[%s936_s1 + $0x138] sm:$0xff]  }
   0xe   :  { %621 = vmatprep.subr.bf16.mxu1 %v686_v13  ;;  %v39_v35 = vpack.c.bf16 %v24_v33, %v19_v32  ;;  %v18_v37 = vld [vmem:[%s937_s0] sm:$0xff]  ;;  %v23_v38 = vld [vmem:[%s937_s0 + $0x28] sm:$0xff]  ;;  %v41_v39 = vpack.c.bf16 %v26_v36, %v21_v34  ;;  %v706_v45 = vld [vmem:[%s936_s1 + $0x130] sm:$0xff]  }
   0xf   :  { %v38_v40 = vpack.c.bf16 %v23_v38, %v18_v37  ;;  %v707_v46 = vld [vmem:[%s936_s1 + $0x128] sm:$0xff]   ;;  %v29_v47 = vld [vmem:[%s937_s0 + $0x58] sm:$0xff]  ;;  %v34_v48 = vld [vmem:[%s937_s0 + $0x80] sm:$0xff] }
  0x10   :  { %594 = vmatpush3.bf16.msra.mxu0 %v687_v14  ;;  %400 = vmatprep.mubr.bf16.mxu0 %v39_v35  ;;  %v31_v49 = vld [vmem:[%s937_s0 + $0x68] sm:$0xff]  ;;  %v36_v50 = vld [vmem:[%s937_s0 + $0x90] sm:$0xff]  ;;  %v44_v51 = vpack.c.bf16 %v34_v48, %v29_v47  ;;  %v33_v54 = vld [vmem:[%s937_s0 + $0x78] sm:$0xff] }
  0x11   :  { %622 = vmatpush3.bf16.msra.mxu1 %v688_v15  ;;  %595 = vmatprep.subr.bf16.mxu0 %v689_v16  ;;  %v46_v52 = vpack.c.bf16 %v36_v50, %v31_v49  ;;  %v28_v53 = vld [vmem:[%s937_s0 + $0x50] sm:$0xff]  ;;  %v30_v55 = vld [vmem:[%s937_s0 + $0x60] sm:$0xff]  ;;  %v35_v57 = vld [vmem:[%s937_s0 + $0x88] sm:$0xff] }
  0x12   :  { %623 = vmatprep.subr.bf16.mxu1 %v690_v17  ;;  %449 = vmatprep.mubr.bf16.mxu1 %v41_v39  ;;  %v43_v56 = vpack.c.bf16 %v33_v54, %v28_v53  ;;  %v708_v58 = vld [vmem:[%s936_s1 + $0x120] sm:$0xff]   ;;  %v45_v59 = vpack.c.bf16 %v35_v57, %v30_v55  ;;  %v27_v61 = vld [vmem:[%s937_s0 + $0x48] sm:$0xff]  ;;  %v709_v63 = vld [vmem:[%s936_s1 + $0x118] sm:$0xff]  }
  0x13   :  { %v22_v60 = vld [vmem:[%s937_s0 + $0x20] sm:$0xff]  ;;  %v710_v0 = vld [vmem:[%s936_s1 + $0x110] sm:$0xff]   ;;  %v711_v1 = vld [vmem:[%s936_s1 + $0x108] sm:$0xff]  }
  0x14   :  { %596 = vmatpush3.bf16.msra.mxu0 %v691_v18  ;;  %v42_v62 = vpack.c.bf16 %v27_v61, %v22_v60  ;;  %v712_v2 = vld [vmem:[%s936_s1 + $0x100] sm:$0xff]   ;;  %v32_v3 = vld [vmem:[%s937_s0 + $0x70] sm:$0xff]  ;;  %v37_v4 = vld [vmem:[%s937_s0 + $0x98] sm:$0xff] }
  0x15   :  { %624 = vmatpush3.bf16.msra.mxu1 %v692_v19  ;;  %597 = vmatprep.subr.bf16.mxu0 %v693_v20  ;;  %v47_v5 = vpack.c.bf16 %v37_v4, %v32_v3  ;;  %v586_v35 = vld [vmem:[%s939_s3] ss:$0 sm:$0xff] }
  0x16   :  { %625 = vmatprep.subr.bf16.mxu1 %v694_v21 }
  0x18   :  { %598 = vmatpush3.bf16.msra.mxu0 %v695_v22 }
  0x19   :  { %626 = vmatpush3.bf16.msra.mxu1 %v696_v23  ;;  %599 = vmatprep.subr.bf16.mxu0 %v697_v24 }
  0x1a   :  { %627 = vmatprep.subr.bf16.mxu1 %v698_v25 }
  0x1c   :  { %600 = vmatpush3.bf16.msra.mxu0 %v699_v26 }
  0x1d   :  { %628 = vmatpush3.bf16.msra.mxu1 %v700_v27  ;;  %601 = vmatprep.subr.bf16.mxu0 %v701_v28 }
  0x1e   :  { %629 = vmatprep.subr.bf16.mxu1 %v702_v29 }
  0x20   :  { %602 = vmatpush3.bf16.msra.mxu0 %v703_v30  ;;  %v585_v30 = vld [vmem:[%s938_s2] ss:$0 sm:$0xff] }
  0x21   :  { %630 = vmatpush3.bf16.msra.mxu1 %v704_v31  ;;  %653 = vmatprep.subr.bf16.mxu0 %v705_v44 }
  0x23   :  { %401 = vmatmul.mubr.bf16.vlgmr.msra.gmra.mxu0 %v38_v40 }
  0x24   :  { %450 = vmatmul.mubr.bf16.vlgmr.msra.gmra.mxu1 %v40_v43  ;;  %654 = vmatpush3.bf16.msra.mxu0 %v705_v44 }
  0x25   :  { %655 = vmatprep.subr.bf16.mxu0 %v706_v45  ;;  %408 = vmatprep.mubr.bf16.mxu0 %v44_v51 }
  0x26   :  { %457 = vmatprep.mubr.bf16.mxu1 %v46_v52 }
  0x28   :  { %656 = vmatpush3.bf16.msra.mxu0 %v706_v45 }
  0x29   :  { %657 = vmatprep.subr.bf16.mxu0 %v707_v46 }
  0x2b   :  { %409 = vmatmul.mubr.bf16.gmra.mxu0 %v43_v56 }
  0x2c   :  { %458 = vmatmul.mubr.bf16.gmra.mxu1 %v45_v59  ;;  %658 = vmatpush3.bf16.msra.mxu0 %v707_v46 }
  0x2d   :  { %659 = vmatprep.subr.bf16.mxu0 %v708_v58  ;;  %669 = vmatprep.mubr.bf16.mxu0 %v42_v62 }
  0x30   :  { %660 = vmatpush3.bf16.msra.mxu0 %v708_v58 }
  0x31   :  { %661 = vmatprep.subr.bf16.mxu0 %v709_v63 }
  0x34   :  { %662 = vmatpush3.bf16.msra.mxu0 %v709_v63 }
  0x35   :  { %663 = vmatprep.subr.bf16.mxu0 %v710_v0 }
  0x38   :  { %664 = vmatpush3.bf16.msra.mxu0 %v710_v0 }
  0x39   :  { %665 = vmatprep.subr.bf16.mxu0 %v711_v1 }
  0x3c   :  { %666 = vmatpush3.bf16.msra.mxu0 %v711_v1 }
  0x3d   :  { %667 = vmatprep.subr.bf16.mxu0 %v712_v2 }
  0x40   :  { %668 = vmatpush3.bf16.msra.mxu0 %v712_v2 }
  0x43   :  { %670 = vmatmul.mubr.bf16.vlgmr.msra.gmra.mxu0 %v47_v5 }
  0xe3   :  { %v603_v6 = vpop.f32.mrf.mxu0 }
  0xe4   :  { %v631_v7 = vpop.f32.mrf.mxu1 }
  0xe5   :  { %v604_v8 = vpop.f32.mrf.mxu0 }
  0xe6   :  { %v632_v9 = vpop.f32.mrf.mxu1  ;;  %v605_v24 = vadd.f32 %v604_v8, %v603_v6 }
  0xe7   :  { %v606_v10 = vpop.f32.mrf.mxu0  ;;  %v633_v25 = vadd.f32 %v632_v9, %v631_v7 }
  0xe8   :  { %v634_v11 = vpop.f32.mrf.mxu1 }
  0xe9   :  { %v607_v12 = vpop.f32.mrf.mxu0  ;;  %v452_v34 = vadd.f32 %v633_v25, %v605_v24 }
  0xea   :  { %v635_v13 = vpop.f32.mrf.mxu1  ;;  %v608_v31 = vadd.f32 %v607_v12, %v606_v10 }
  0xeb   :  { %v609_v14 = vpop.f32.mrf.mxu0  ;;  %v636_v32 = vadd.f32 %v635_v13, %v634_v11 }
  0xec   :  { %v637_v15 = vpop.f32.mrf.mxu1 }
  0xed   :  { %v610_v16 = vpop.f32.mrf.mxu0  ;;  %v455_v44 = vadd.f32 %v636_v32, %v608_v31 }
  0xee   :  { %v638_v17 = vpop.f32.mrf.mxu1  ;;  %v611_v20 = vadd.f32 %v610_v16, %v609_v14 }
  0xef   :  { %v612_v18 = vpop.f32.mrf.mxu0  ;;  %v639_v21 = vadd.f32 %v638_v17, %v637_v15 }
  0xf0   :  { %v640_v19 = vpop.f32.mrf.mxu1 }
  0xf1   :  { %v613_v22 = vpop.f32.mrf.mxu0  ;;  %v460_v28 = vadd.f32 %v639_v21, %v611_v20 }
  0xf2   :  { %v641_v23 = vpop.f32.mrf.mxu1  ;;  %v614_v26 = vadd.f32 %v613_v22, %v612_v18 }
  0xf3   :  { %v642_v27 = vadd.f32 %v641_v23, %v640_v19 }
  0xf5   :  { %v463_v39 = vadd.f32 %v642_v27, %v614_v26 }
 0x103   :  { %v671_v29 = vpop.f32.mrf.mxu0 }
 0x104   :  { %v509_v33 = vadd.f32 %v671_v29, %v460_v28 }
 0x105   :  { %v500_v36 = vpop.f32.mrf.mxu0 }
 0x106   :  { %v524_v37 = vmul.f32 %v585_v30, %v509_v33  ;;  %v501_v38 = vadd.f32 %v500_v36, %v452_v34 }
 0x107   :  { %v672_v40 = vpop.f32.mrf.mxu0 }
 0x108   :  { %v535_v41 = vadd.f32 %v586_v35, %v524_v37  ;;  %v522_v42 = vmul.f32 %v585_v30, %v501_v38  ;;  %v512_v43 = vadd.f32 %v672_v40, %v463_v39 }
 0x109   :  { %v503_v45 = vpop.f32.mrf.mxu0 }
 0x10a   :  { %539 = vst [vmem:[%s940_s4 + $0x10] sm:$0xff] %v535_v41  ;;  %v533_v46 = vadd.f32 %v586_v35, %v522_v42  ;;  %v525_v47 = vmul.f32 %v585_v30, %v512_v43  ;;  %v504_v48 = vadd.f32 %v503_v45, %v455_v44 }
 0x10c   :  { %537 = vst [vmem:[%s940_s4] sm:$0xff] %v533_v46  ;;  %v536_v49 = vadd.f32 %v586_v35, %v525_v47  ;;  %v523_v50 = vmul.f32 %v585_v30, %v504_v48 }
 0x10e   :  { %540 = vst [vmem:[%s940_s4 + $0x18] sm:$0xff] %v536_v49  ;;  %v534_v51 = vadd.f32 %v586_v35, %v523_v50 }
 0x110   :  { %538 = vst [vmem:[%s940_s4 + $0x8] sm:$0xff] %v534_v51 }

// kernel: vit_encoder_forward.15
= control target key start
LH: loop header
LB: loop body
LE: loop exit
PB: predicated region body
PF: predicated region fallthrough
CT: control target
= control target key end

     0   :  { %v778_v62 = vmov 0   ;;  %s1074_s0 = inlined_call_operand.vmem [shape: f32[64,128], index: 0, kind: input, shape index: {}]   ;;  %s1075_s1 = inlined_call_operand.vmem [shape: bf16[128,384], index: 1, kind: input, shape index: {}]   ;;  %s1076_s4 = inlined_call_operand.vmem [shape: f32[1,128], index: 4, kind: input, shape index: {}]   ;;  %s1077_s5 = inlined_call_operand.vmem [shape: f32[1,128], index: 5, kind: input, shape index: {}]   ;;  %s1078_s2 = inlined_call_operand.vmem [shape: f32[1,384], index: 2, kind: input, shape index: {}]   ;;  %s1079_s3 = inlined_call_operand.vmem [shape: f32[1,384], index: 3, kind: input, shape index: {}]   ;;  %s1080_s6 = inlined_call_operand.vmem [shape: bf16[64,384], index: 6, kind: output, shape index: {}]  }
   0x1   :  { %v24_v0 = vld [vmem:[%s1074_s0] sm:$0xff]  ;;  %v26_v1 = vld [vmem:[%s1074_s0 + $0x10] sm:$0xff]  ;;  %v25_v2 = vld [vmem:[%s1074_s0 + $0x8] sm:$0xff]  ;;  %347 = vmatprep.mubr.bf16.mxu0 %v778_v62 }
   0x2   :  { %32 = vadd.xlane.f32.xlu0 %v24_v0  ;;  %36 = vadd.xlane.f32.xlu1 %v26_v1  ;;  %v27_v3 = vld [vmem:[%s1074_s0 + $0x18] sm:$0xff]  ;;  %v28_v4 = vld [vmem:[%s1074_s0 + $0x20] sm:$0xff]  ;;  %v29_v5 = vld [vmem:[%s1074_s0 + $0x28] sm:$0xff] }
   0x3   :  { %v30_v6 = vld [vmem:[%s1074_s0 + $0x30] sm:$0xff]  ;;  %v31_v7 = vld [vmem:[%s1074_s0 + $0x38] sm:$0xff]  ;;  %v743_v49 = vld [vmem:[%s1075_s1 + $0x80] ss:$12 sps:$4 sm:$0xff]  }
   0x4   :  { %v730_v8 = vld [vmem:[%s1075_s1 + $0xac] ss:$12 sps:$4 sm:$0xff]   ;;  %v732_v9 = vld [vmem:[%s1075_s1 + $0xa8] ss:$12 sps:$4 sm:$0xff]   ;;  %v735_v42 = vld [vmem:[%s1075_s1 + $0xb0] ss:$12 sps:$4 sm:$0xff]  }
   0x5   :  { %315 = vmatprep.subr.bf16.mxu0 %v730_v8  ;;  %v733_v41 = vld [vmem:[%s1075_s1 + $0x94] ss:$12 sps:$4 sm:$0xff]   ;;  %v736_v43 = vld [vmem:[%s1075_s1 + $0x90] ss:$12 sps:$4 sm:$0xff]   ;;  %705 = vmatprep.subr.bf16.mxu1 %v735_v42  ;;  %v739_v46 = vld [vmem:[%s1075_s1 + $0x98] ss:$12 sps:$4 sm:$0xff]  }
   0x6   :  { %34 = vadd.xlane.f32.xlu0 %v25_v2  ;;  %38 = vadd.xlane.f32.xlu1 %v27_v3  ;;  %v737_v45 = vld [vmem:[%s1075_s1 + $0x7c] ss:$12 sps:$4 sm:$0xff]   ;;  %v740_v47 = vld [vmem:[%s1075_s1 + $0x78] ss:$12 sps:$4 sm:$0xff]   ;;  %v744_v50 = vld [vmem:[%s1075_s1 + $0x60] ss:$12 sps:$4 sm:$0xff]  }
   0x7   :  { %316 = vmatpush1.bf16.msra.mxu0 %v732_v9  ;;  %706 = vmatpush3.bf16.msra.mxu1 %v735_v42  ;;  %v741_v48 = vld [vmem:[%s1075_s1 + $0x64] ss:$12 sps:$4 sm:$0xff]   ;;  %v745_v51 = vld [vmem:[%s1075_s1 + $0x4c] ss:$12 sps:$4 sm:$0xff]   ;;  %v747_v52 = vld [vmem:[%s1075_s1 + $0x68] ss:$12 sps:$4 sm:$0xff]  }
   0x8   :  { %317 = vmatprep.subr.bf16.mxu0 %v733_v41  ;;  %707 = vmatprep.subr.bf16.mxu1 %v739_v46  ;;  %v748_v53 = vld [vmem:[%s1075_s1 + $0x48] ss:$12 sps:$4 sm:$0xff]   ;;  %v751_v55 = vld [vmem:[%s1075_s1 + $0x50] ss:$12 sps:$4 sm:$0xff]   ;;  %v755_v58 = vld [vmem:[%s1075_s1 + $0x38] ss:$12 sps:$4 sm:$0xff]  }
   0x9   :  { %v749_v54 = vld [vmem:[%s1075_s1 + $0x34] ss:$12 sps:$4 sm:$0xff]   ;;  %v752_v56 = vld [vmem:[%s1075_s1 + $0x30] ss:$12 sps:$4 sm:$0xff]   ;;  %v756_v59 = vld [vmem:[%s1075_s1 + $0x18] ss:$12 sps:$4 sm:$0xff]  }
   0xa   :  { %40 = vadd.xlane.f32.xlu0 %v28_v4  ;;  %42 = vadd.xlane.f32.xlu1 %v29_v5  ;;  %v753_v57 = vld [vmem:[%s1075_s1 + $0x1c] ss:$12 sps:$4 sm:$0xff]   ;;  %v757_v60 = vld [vmem:[%s1075_s1 + $0x4] ss:$12 sps:$4 sm:$0xff]   ;;  %v759_v61 = vld [vmem:[%s1075_s1 + $0x20] ss:$12 sps:$4 sm:$0xff]  }
   0xb   :  { %318 = vmatpush1.bf16.msra.mxu0 %v736_v43  ;;  %708 = vmatpush3.bf16.msra.mxu1 %v739_v46  ;;  %v760_v63 = vld [vmem:[%s1075_s1] ss:$12 sps:$4 sm:$0xff]  }
   0xc   :  { %319 = vmatprep.subr.bf16.mxu0 %v737_v45  ;;  %709 = vmatprep.subr.bf16.mxu1 %v743_v49 }
   0xe   :  { %44 = vadd.xlane.f32.xlu0 %v30_v6  ;;  %46 = vadd.xlane.f32.xlu1 %v31_v7 }
   0xf   :  { %320 = vmatpush1.bf16.msra.mxu0 %v740_v47  ;;  %710 = vmatpush3.bf16.msra.mxu1 %v743_v49 }
  0x10   :  { %321 = vmatprep.subr.bf16.mxu0 %v741_v48  ;;  %711 = vmatprep.subr.bf16.mxu1 %v747_v52 }
  0x13   :  { %322 = vmatpush1.bf16.msra.mxu0 %v744_v50  ;;  %712 = vmatpush3.bf16.msra.mxu1 %v747_v52 }
  0x14   :  { %323 = vmatprep.subr.bf16.mxu0 %v745_v51  ;;  %713 = vmatprep.subr.bf16.mxu1 %v751_v55 }
  0x17   :  { %324 = vmatpush1.bf16.msra.mxu0 %v748_v53  ;;  %714 = vmatpush3.bf16.msra.mxu1 %v751_v55 }
  0x18   :  { %325 = vmatprep.subr.bf16.mxu0 %v749_v54  ;;  %715 = vmatprep.subr.bf16.mxu1 %v755_v58 }
  0x1b   :  { %326 = vmatpush1.bf16.msra.mxu0 %v752_v56  ;;  %716 = vmatpush3.bf16.msra.mxu1 %v755_v58 }
  0x1c   :  { %327 = vmatprep.subr.bf16.mxu0 %v753_v57  ;;  %717 = vmatprep.subr.bf16.mxu1 %v759_v61 }
  0x1f   :  { %328 = vmatpush1.bf16.msra.mxu0 %v756_v59  ;;  %718 = vmatpush3.bf16.msra.mxu1 %v759_v61 }
  0x20   :  { %329 = vmatprep.subr.bf16.mxu0 %v757_v60 }
  0x23   :  { %330 = vmatpush1.bf16.msra.mxu0 %v760_v63 }
  0x8b   :  { %v33_v10 = vpop.xlane.xlu0 %32  ;;  %v37_v11 = vpop.xlane.xlu1 %36 }
  0x8c   :  { %v49_v12 = vmul.f32 0.0078125, %v33_v10  ;;  %v51_v13 = vmul.f32 0.0078125, %v37_v11 }
  0x8e   :  { %v844_v14 = vsub.f32 %v24_v0, %v49_v12  ;;  %v846_v15 = vsub.f32 %v26_v1, %v51_v13  ;;  %v761_v0 = vld [vmem:[%s1075_s1 + $0x8] ss:$12 sps:$4 sm:$0xff]  }
  0x8f   :  { %v35_v16 = vpop.xlane.xlu0 %34  ;;  %v39_v17 = vpop.xlane.xlu1 %38  ;;  %719 = vmatprep.subr.bf16.mxu1 %v761_v0 }
  0x90   :  { %v50_v18 = vmul.f32 0.0078125, %v35_v16  ;;  %v65_v19 = vmul.f32 %v844_v14, %v844_v14  ;;  %v52_v20 = vmul.f32 0.0078125, %v39_v17  ;;  %v67_v23 = vmul.f32 %v846_v15, %v846_v15  ;;  %720 = vmatpush3.bf16.msra.mxu1 %v761_v0 }
  0x92   :  { %v850_v21 = vsub.f32 %v25_v2, %v50_v18  ;;  %73 = vadd.xlane.f32.xlu0 %v65_v19  ;;  %v852_v22 = vsub.f32 %v27_v3, %v52_v20 }
  0x93   :  { %v41_v24 = vpop.xlane.xlu0 %40  ;;  %v43_v25 = vpop.xlane.xlu1 %42 }
  0x94   :  { %v53_v26 = vmul.f32 0.0078125, %v41_v24  ;;  %v66_v27 = vmul.f32 %v850_v21, %v850_v21  ;;  %v54_v28 = vmul.f32 0.0078125, %v43_v25  ;;  %v68_v31 = vmul.f32 %v852_v22, %v852_v22 }
  0x96   :  { %v858_v29 = vsub.f32 %v28_v4, %v53_v26  ;;  %77 = vadd.xlane.f32.xlu0 %v67_v23  ;;  %75 = vadd.xlane.f32.xlu1 %v66_v27  ;;  %v860_v30 = vsub.f32 %v29_v5, %v54_v28 }
  0x97   :  { %v45_v32 = vpop.xlane.xlu0 %44  ;;  %v47_v33 = vpop.xlane.xlu1 %46 }
  0x98   :  { %v55_v34 = vmul.f32 0.0078125, %v45_v32  ;;  %v69_v35 = vmul.f32 %v858_v29, %v858_v29  ;;  %v56_v36 = vmul.f32 0.0078125, %v47_v33  ;;  %v70_v39 = vmul.f32 %v860_v30, %v860_v30  ;;  %v635_v33 = vld [vmem:[%s1076_s4] ss:$0 sm:$0xff] }
  0x9a   :  { %v866_v37 = vsub.f32 %v30_v6, %v55_v34  ;;  %79 = vadd.xlane.f32.xlu1 %v68_v31  ;;  %81 = vadd.xlane.f32.xlu0 %v69_v35  ;;  %v868_v38 = vsub.f32 %v31_v7, %v56_v36 }
  0x9c   :  { %v71_v40 = vmul.f32 %v866_v37, %v866_v37  ;;  %v72_v44 = vmul.f32 %v868_v38, %v868_v38 }
  0x9e   :  { %83 = vadd.xlane.f32.xlu1 %v70_v39  ;;  %85 = vadd.xlane.f32.xlu0 %v71_v40  ;;  %v636_v40 = vld [vmem:[%s1077_s5] ss:$0 sm:$0xff] }
  0xa2   :  { %87 = vadd.xlane.f32.xlu1 %v72_v44 }
 0x11b   :  { %v74_v1 = vpop.xlane.xlu0 %73 }
 0x11c   :  { %v89_v2 = vmul.f32 0.0078125, %v74_v1 }
 0x11e   :  { %v97_v3 = vadd.f32 1e-06, %v89_v2 }
 0x11f   :  { %v76_v4 = vpop.xlane.xlu1 %75  ;;  %v78_v5 = vpop.xlane.xlu0 %77 }
 0x120   :  { %762 = vrsqrt.f32 %v97_v3  ;;  %v90_v6 = vmul.f32 0.0078125, %v76_v4  ;;  %v91_v7 = vmul.f32 0.0078125, %v78_v5 }
 0x122   :  { %v98_v8 = vadd.f32 1e-06, %v90_v6  ;;  %v99_v9 = vadd.f32 1e-06, %v91_v7  ;;  %v494_v7 = vld [vmem:[%s1079_s3] sm:$0x7] }
 0x123   :  { %v80_v10 = vpop.xlane.xlu1 %79  ;;  %v82_v11 = vpop.xlane.xlu0 %81 }
 0x124   :  { %764 = vrsqrt.f32 %v98_v8  ;;  %v92_v12 = vmul.f32 0.0078125, %v80_v10  ;;  %v93_v13 = vmul.f32 0.0078125, %v82_v11 }
 0x125   :  { %766 = vrsqrt.f32 %v99_v9 }
 0x126   :  { %v100_v16 = vadd.f32 1e-06, %v92_v12  ;;  %v101_v17 = vadd.f32 1e-06, %v93_v13 }
 0x127   :  { %v84_v18 = vpop.xlane.xlu1 %83  ;;  %v86_v19 = vpop.xlane.xlu0 %85 }
 0x128   :  { %768 = vrsqrt.f32 %v100_v16  ;;  %v94_v20 = vmul.f32 0.0078125, %v84_v18  ;;  %v95_v23 = vmul.f32 0.0078125, %v86_v19 }
 0x129   :  { %770 = vrsqrt.f32 %v101_v17 }
 0x12a   :  { %v102_v24 = vadd.f32 1e-06, %v94_v20  ;;  %v103_v25 = vadd.f32 1e-06, %v95_v23 }
 0x12b   :  { %v88_v26 = vpop.xlane.xlu1 %87 }
 0x12c   :  { %772 = vrsqrt.f32 %v102_v24  ;;  %v96_v27 = vmul.f32 0.0078125, %v88_v26 }
 0x12d   :  { %v763_v28 = vpop.eup %762  ;;  %774 = vrsqrt.f32 %v103_v25 }
 0x12e   :  { %v104_v31 = vadd.f32 1e-06, %v96_v27  ;;  %v113_v32 = vmul.f32 %v763_v28, %v844_v14 }
 0x130   :  { %776 = vrsqrt.f32 %v104_v31  ;;  %v128_v39 = vmul.f32 %v635_v33, %v113_v32 }
 0x131   :  { %v765_v34 = vpop.eup %764 }
 0x132   :  { %v767_v35 = vpop.eup %766  ;;  %v114_v36 = vmul.f32 %v765_v34, %v850_v21  ;;  %v143_v45 = vadd.f32 %v636_v40, %v128_v39 }
 0x133   :  { %v115_v41 = vmul.f32 %v767_v35, %v846_v15 }
 0x134   :  { %v129_v42 = vmul.f32 %v635_v33, %v114_v36 }
 0x135   :  { %v769_v43 = vpop.eup %768  ;;  %v130_v44 = vmul.f32 %v635_v33, %v115_v41 }
 0x136   :  { %v771_v14 = vpop.eup %770  ;;  %v144_v46 = vadd.f32 %v636_v40, %v129_v42  ;;  %v116_v47 = vmul.f32 %v769_v43, %v852_v22 }
 0x137   :  { %v117_v48 = vmul.f32 %v771_v14, %v858_v29  ;;  %v145_v51 = vadd.f32 %v636_v40, %v130_v44 }
 0x138   :  { %v151_v49 = vpack.c.bf16 %v144_v46, %v143_v45  ;;  %v131_v50 = vmul.f32 %v635_v33, %v116_v47 }
 0x139   :  { %v773_v21 = vpop.eup %772  ;;  %v132_v54 = vmul.f32 %v635_v33, %v117_v48 }
 0x13a   :  { %v775_v52 = vpop.eup %774  ;;  %348 = vmatmul.mubr.bf16.vlgmr.msra.gmra.mxu0 %v151_v49  ;;  %721 = vmatprep.mubr.bf16.mxu1 %v151_v49  ;;  %v146_v53 = vadd.f32 %v636_v40, %v131_v50  ;;  %v118_v15 = vmul.f32 %v773_v21, %v860_v30 }
 0x13b   :  { %357 = vmatprep.mubr.bf16.mxu0 %v778_v62  ;;  %v119_v55 = vmul.f32 %v775_v52, %v866_v37  ;;  %v147_v29 = vadd.f32 %v636_v40, %v132_v54  ;;  %v455_v37 = vlaneseq }
 0x13c   :  { %v152_v56 = vpack.c.bf16 %v146_v53, %v145_v51  ;;  %v133_v57 = vmul.f32 %v635_v33, %v118_v15 }
 0x13d   :  { %v777_v22 = vpop.eup %776  ;;  %v134_v60 = vmul.f32 %v635_v33, %v119_v55  ;;  %v456_v2 = vshrl.u32 %v455_v37, 7 }
 0x13e   :  { %722 = vmatmul.mubr.bf16.vlgmr.msra.gmra.mxu1 %v152_v56  ;;  %v148_v58 = vadd.f32 %v636_v40, %v133_v57  ;;  %v120_v59 = vmul.f32 %v777_v22, %v868_v38  ;;  %v453_v38 = vld [vmem:[%s1078_s2] sm:$0x7] }
 0x13f   :  { %v149_v0 = vadd.f32 %v636_v40, %v134_v60  ;;  %v457_v3 = vsub.s32 0, %v456_v2  ;;  %v461_v4 = vsub.s32 1, %v456_v2  ;;  %v465_v6 = vsub.s32 2, %v456_v2 }
 0x140   :  { %v153_v61 = vpack.c.bf16 %v148_v58, %v147_v29  ;;  %v135_v63 = vmul.f32 %v635_v33, %v120_v59 }
 0x141   :  { %v963_v5 = vrot.slane %v453_v38, %v457_v3  ;;  %v968_v8 = vrot.slane %v453_v38, %v461_v4  ;;  %v971_v10 = vrot.slane %v494_v7, %v457_v3  ;;  %v973_v11 = vrot.slane %v494_v7, %v461_v4 }
 0x142   :  { %358 = vmatmul.mubr.bf16.gmra.mxu0 %v152_v56  ;;  %725 = vmatprep.mubr.bf16.mxu1 %v153_v61  ;;  %v150_v30 = vadd.f32 %v636_v40, %v135_v63  ;;  %v975_v12 = vrot.slane %v453_v38, %v465_v6  ;;  %v978_v17 = vrot.slane %v494_v7, %v465_v6 }
 0x143   :  { %367 = vmatprep.mubr.bf16.mxu0 %v778_v62 }
 0x144   :  { %v154_v1 = vpack.c.bf16 %v150_v30, %v149_v0 }
 0x146   :  { %726 = vmatmul.mubr.bf16.gmra.mxu1 %v154_v1 }
 0x14a   :  { %368 = vmatmul.mubr.bf16.gmra.mxu0 %v153_v61 }
 0x14b   :  { %377 = vmatprep.mubr.bf16.mxu0 %v778_v62 }
 0x152   :  { %378 = vmatmul.mubr.bf16.gmra.mxu0 %v154_v1 }
 0x1fa   :  { %v349_v9 = vpop.f32.mrf.mxu0 }
 0x1fb   :  { %v470_v62 = vmul.f32 %v963_v5, %v349_v9 }
 0x1fc   :  { %v351_v13 = vpop.f32.mrf.mxu0 }
 0x1fd   :  { %v471_v16 = vmul.f32 %v968_v8, %v351_v13  ;;  %v511_v20 = vadd.f32 %v971_v10, %v470_v62 }
 0x1fe   :  { %v353_v18 = vpop.f32.mrf.mxu0  ;;  %v723_v19 = vpop.f32.mrf.mxu1 }
 0x1ff   :  { %v512_v23 = vadd.f32 %v973_v11, %v471_v16  ;;  %v473_v24 = vmul.f32 %v963_v5, %v353_v18  ;;  %v478_v25 = vmul.f32 %v723_v19, %v975_v12 }
 0x200   :  { %v355_v26 = vpop.f32.mrf.mxu0  ;;  %v422_v27 = vpop.f32.mrf.mxu1 }
 0x201   :  { %v677_v28 = vpack.c.bf16 %v512_v23, %v511_v20  ;;  %v519_v31 = vadd.f32 %v978_v17, %v478_v25  ;;  %v474_v32 = vmul.f32 %v968_v8, %v355_v26  ;;  %v514_v33 = vadd.f32 %v971_v10, %v473_v24 }
 0x202   :  { %v472_v34 = vmul.f32 %v975_v12, %v422_v27  ;;  %v359_v35 = vpop.f32.mrf.mxu0  ;;  %v724_v36 = vpop.f32.mrf.mxu1 }
 0x203   :  { %615 = vst [vmem:[%s1080_s6] sm:$0xff] %v677_v28  ;;  %v682_v39 = vpack.c.bf16 %v519_v31, %v519_v31  ;;  %v515_v40 = vadd.f32 %v973_v11, %v474_v32  ;;  %v476_v41 = vmul.f32 %v963_v5, %v359_v35  ;;  %v481_v42 = vmul.f32 %v724_v36, %v975_v12 }
 0x204   :  { %v513_v43 = vadd.f32 %v978_v17, %v472_v34  ;;  %v361_v44 = vpop.f32.mrf.mxu0  ;;  %v425_v14 = vpop.f32.mrf.mxu1 }
 0x205   :  { %620 = vst [vmem:[%s1080_s6 + $0x20] sm:$0xf] %v682_v39  ;;  %v679_v45 = vpack.c.bf16 %v515_v40, %v514_v33  ;;  %v522_v46 = vadd.f32 %v978_v17, %v481_v42  ;;  %v477_v47 = vmul.f32 %v968_v8, %v361_v44  ;;  %v517_v49 = vadd.f32 %v971_v10, %v476_v41 }
 0x206   :  { %v678_v48 = vpack.c.bf16 %v513_v43, %v513_v43  ;;  %v475_v50 = vmul.f32 %v975_v12, %v425_v14  ;;  %v363_v21 = vpop.f32.mrf.mxu0  ;;  %v727_v51 = vpop.f32.mrf.mxu1 }
 0x207   :  { %617 = vst [vmem:[%s1080_s6 + $0xc] sm:$0xff] %v679_v45  ;;  %v684_v52 = vpack.c.bf16 %v522_v46, %v522_v46  ;;  %v518_v53 = vadd.f32 %v973_v11, %v477_v47  ;;  %v479_v15 = vmul.f32 %v963_v5, %v363_v21  ;;  %v490_v54 = vmul.f32 %v727_v51, %v975_v12 }
 0x208   :  { %616 = vst [vmem:[%s1080_s6 + $0x8] sm:$0xf] %v678_v48  ;;  %v516_v55 = vadd.f32 %v978_v17, %v475_v50  ;;  %v365_v56 = vpop.f32.mrf.mxu0  ;;  %v438_v57 = vpop.f32.mrf.mxu1 }
 0x209   :  { %622 = vst [vmem:[%s1080_s6 + $0x2c] sm:$0xf] %v684_v52  ;;  %v681_v22 = vpack.c.bf16 %v518_v53, %v517_v49  ;;  %v531_v29 = vadd.f32 %v978_v17, %v490_v54  ;;  %v480_v58 = vmul.f32 %v968_v8, %v365_v56  ;;  %v520_v60 = vadd.f32 %v971_v10, %v479_v15 }
 0x20a   :  { %v680_v59 = vpack.c.bf16 %v516_v55, %v516_v55  ;;  %v484_v61 = vmul.f32 %v975_v12, %v438_v57  ;;  %v369_v63 = vpop.f32.mrf.mxu0  ;;  %v728_v0 = vpop.f32.mrf.mxu1 }
 0x20b   :  { %619 = vst [vmem:[%s1080_s6 + $0x18] sm:$0xff] %v681_v22  ;;  %v690_v30 = vpack.c.bf16 %v531_v29, %v531_v29  ;;  %v521_v1 = vadd.f32 %v973_v11, %v480_v58  ;;  %v482_v37 = vmul.f32 %v963_v5, %v369_v63  ;;  %v493_v2 = vmul.f32 %v728_v0, %v975_v12 }
 0x20c   :  { %618 = vst [vmem:[%s1080_s6 + $0x14] sm:$0xf] %v680_v59  ;;  %v525_v3 = vadd.f32 %v978_v17, %v484_v61  ;;  %v371_v38 = vpop.f32.mrf.mxu0  ;;  %v441_v4 = vpop.f32.mrf.mxu1 }
 0x20d   :  { %628 = vst [vmem:[%s1080_s6 + $0x50] sm:$0xf] %v690_v30  ;;  %v683_v6 = vpack.c.bf16 %v521_v1, %v520_v60  ;;  %v534_v7 = vadd.f32 %v978_v17, %v493_v2  ;;  %v483_v9 = vmul.f32 %v968_v8, %v371_v38  ;;  %v487_v13 = vmul.f32 %v975_v12, %v441_v4 }
 0x20e   :  { %v686_v62 = vpack.c.bf16 %v525_v3, %v525_v3  ;;  %v373_v16 = vpop.f32.mrf.mxu0  ;;  %v523_v18 = vadd.f32 %v971_v10, %v482_v37 }
 0x20f   :  { %621 = vst [vmem:[%s1080_s6 + $0x24] sm:$0xff] %v683_v6  ;;  %v692_v19 = vpack.c.bf16 %v534_v7, %v534_v7  ;;  %v524_v20 = vadd.f32 %v973_v11, %v483_v9  ;;  %v485_v23 = vmul.f32 %v963_v5, %v373_v16  ;;  %v528_v24 = vadd.f32 %v978_v17, %v487_v13 }
 0x210   :  { %624 = vst [vmem:[%s1080_s6 + $0x38] sm:$0xf] %v686_v62  ;;  %v375_v25 = vpop.f32.mrf.mxu0 }
 0x211   :  { %630 = vst [vmem:[%s1080_s6 + $0x5c] sm:$0xf] %v692_v19  ;;  %v685_v12 = vpack.c.bf16 %v524_v20, %v523_v18  ;;  %v486_v26 = vmul.f32 %v968_v8, %v375_v25  ;;  %v688_v27 = vpack.c.bf16 %v528_v24, %v528_v24  ;;  %v526_v31 = vadd.f32 %v971_v10, %v485_v23 }
 0x212   :  { %v379_v28 = vpop.f32.mrf.mxu0 }
 0x213   :  { %623 = vst [vmem:[%s1080_s6 + $0x30] sm:$0xff] %v685_v12  ;;  %v527_v32 = vadd.f32 %v973_v11, %v486_v26  ;;  %v488_v17 = vmul.f32 %v963_v5, %v379_v28  ;;  %626 = vst [vmem:[%s1080_s6 + $0x44] sm:$0xf] %v688_v27 }
 0x214   :  { %v381_v33 = vpop.f32.mrf.mxu0 }
 0x215   :  { %v687_v34 = vpack.c.bf16 %v527_v32, %v526_v31  ;;  %v489_v35 = vmul.f32 %v968_v8, %v381_v33  ;;  %v529_v39 = vadd.f32 %v971_v10, %v488_v17 }
 0x216   :  { %v383_v36 = vpop.f32.mrf.mxu0 }
 0x217   :  { %625 = vst [vmem:[%s1080_s6 + $0x3c] sm:$0xff] %v687_v34  ;;  %v530_v40 = vadd.f32 %v973_v11, %v489_v35  ;;  %v491_v41 = vmul.f32 %v963_v5, %v383_v36 }
 0x218   :  { %v385_v42 = vpop.f32.mrf.mxu0 }
 0x219   :  { %v689_v43 = vpack.c.bf16 %v530_v40, %v529_v39  ;;  %v492_v44 = vmul.f32 %v968_v8, %v385_v42  ;;  %v532_v14 = vadd.f32 %v971_v10, %v491_v41 }
 0x21b   :  { %627 = vst [vmem:[%s1080_s6 + $0x48] sm:$0xff] %v689_v43  ;;  %v533_v45 = vadd.f32 %v973_v11, %v492_v44 }
 0x21d   :  { %v691_v46 = vpack.c.bf16 %v533_v45, %v532_v14 }
 0x21f   :  { %629 = vst [vmem:[%s1080_s6 + $0x54] sm:$0xff] %v691_v46 }

// kernel: vit_encoder_forward.16
= control target key start
LH: loop header
LB: loop body
LE: loop exit
PB: predicated region body
PF: predicated region fallthrough
CT: control target
= control target key end

     0   :  { %s783_s6 = smov 0   ;;  %s913_s0 = inlined_call_operand.vmem [shape: bf16[2,32,384], index: 0, kind: input, shape index: {}]   ;;  %s914_s1 = inlined_call_operand.vmem [shape: bf16[2,32,128], index: 1, kind: output, shape index: {}]  }
   0x1 LB: > { %s608_s7 = sadd.s32 4294967295, %s770_s6   ;;  %p612_p0 = scmp.ge.s32.totalorder %s770_s6, 1  ;;  %s770_s6 = sphi %s783_s6, %s11_s6  }
   0x2   : > { %p87_p1 = scmp.lt.s32.totalorder %s770_s6, 3 }
   0x4   : > { %p88_p2 = pnand %p612_p0, %p87_p1 }
   0x5   : > { %p107_p3 = scmp.lt.s32.totalorder (!%p88_p2), %s608_s7, 1  ;;  %s772_s12 = smov (!%p88_p2), 64  }
   0x6   : > { %91 = sbr.rel (%p88_p2) target bundleno = 1097 (0x449), region = 24 }
   0xb   : > { %s916_s7 = smov (!%p107_p3, %s608_s7), 1  ;;  %vm142_vm0 = vcmask 523264   ;;  %v208_v6 = vlaneseq  ;;  %vm215_vm2 = vcmask 261120  }
   0xc   : > { %s704_s8 = smul.u32 48, %s916_s7  ;;  %s636_s13 = sshll.u32 %s916_s7, 4 }
   0xd   : > { %v809_v7 = vand.u32 127, %v208_v6  ;;  %s116_s16 = scalar_lea.vmem %s914_s1, %s636_s13 }
   0xe   : > { %s797_s11 = scalar_lea.vmem %s913_s0, %s704_s8 }
   0xf   : > { %v726_v0 = vld [vmem:[%s797_s11 + $0x1c] ss:$12 sps:$4 sm:$0xff]   ;;  %v727_v1 = vld [vmem:[%s797_s11 + $0x4] ss:$12 sps:$4 sm:$0xff]   ;;  %v729_v2 = vld [vmem:[%s797_s11] ss:$12 sps:$4 sm:$0xff]  }
  0x10   : > { %700 = vmatprep.subr.msk.bf16.mxu0 %vm142_vm0, %v726_v0  ;;  %v153_v3 = vsel %vm142_vm0, %v726_v0, 0  ;;  %672 = vmatprep.mubr.msk.bf16.mxu0 %vm142_vm0, %v729_v2  ;;  %v150_v4 = vsel %vm142_vm0, %v727_v1, 0  ;;  %v724_v5 = vld [vmem:[%s797_s11 + $0x18] ss:$12 sps:$4 sm:$0xff]   ;;  %vm210_vm1 = vcmp.lt.s32.totalorder %v809_v7, 21 }
  0x11   : > { %669 = vmatpush3.bf16.xpose.msra.mxu0 %v153_v3  ;;  %v825_v24 = vld [vmem:[%s797_s11 + $0x20] ss:$12 sps:$4 sm:$0xff]   ;;  %v828_v25 = vld [vmem:[%s797_s11 + $0x8] ss:$12 sps:$4 sm:$0xff]  }
  0x12   : > { %701 = vmatprep.subr.msk.bf16.mxu0 %vm142_vm0, %v727_v1  ;;  %676 = vmatprep.subr.bf16.mxu1 %v825_v24 }
  0x13   : > { %677 = vmatpush3.bf16.msra.mxu1 %v825_v24 }
  0x14   : > { %678 = vmatprep.subr.bf16.mxu1 %v828_v25 }
  0x17   : > { %679 = vmatpush3.bf16.msra.mxu1 %v828_v25 }
  0x19   : > { %671 = vmatpush3.bf16.xpose.msra.mxu0 %v150_v4 }
  0x20   : > { %673 = vmatmul.mubr.msk.bf16.vlgmr.msra.gmra.mxu0 %vm142_vm0, %v724_v5 }
  0xe0   : > { %v674_v8 = vpop.f32.mrf.mxu0 }
  0xe1   : > { %v206_v9 = vmul.f32 0.125, %v674_v8 }
  0xe2   : > { %v189_v10 = vpop.f32.mrf.mxu0 }
  0xe3   : > { %v204_v11 = vmul.f32 0.125, %v189_v10  ;;  %v213_v12 = vsel %vm210_vm1, %v206_v9, -1e+30 }
  0xe4   : > { %v675_v13 = vpop.f32.mrf.mxu0  ;;  %v222_v14 = vsel %vm215_vm2, %v213_v12, -inf }
  0xe5   : > { %v207_v15 = vmul.f32 0.125, %v675_v13  ;;  %223 = vmax.xlane.f32.xlu1 %v222_v14  ;;  %v211_v16 = vsel %vm210_vm1, %v204_v11, -1e+30 }
  0xe6   : > { %v192_v17 = vpop.f32.mrf.mxu0  ;;  %v216_v18 = vsel %vm215_vm2, %v211_v16, -inf }
  0xe7   : > { %v205_v19 = vmul.f32 0.125, %v192_v17  ;;  %217 = vmax.xlane.f32.xlu0 %v216_v18  ;;  %v214_v20 = vsel %vm210_vm1, %v207_v15, -1e+30 }
  0xe8   : > { %v225_v21 = vsel %vm215_vm2, %v214_v20, -inf }
  0xe9   : > { %226 = vmax.xlane.f32.xlu1 %v225_v21  ;;  %v212_v22 = vsel %vm210_vm1, %v205_v19, -1e+30 }
  0xea   : > { %v219_v23 = vsel %vm215_vm2, %v212_v22, -inf }
  0xeb   : > { %220 = vmax.xlane.f32.xlu0 %v219_v23 }
  0xfa   : > { %333 = vrot.lane.b32.xlu1 %v727_v1, %s772_s12 }
  0xfe   : > { %329 = vrot.lane.b32.xlu1 %v729_v2, %s772_s12 }
 0x101   : > { %335 = vrot.lane.b32.xlu0 %v726_v0, %s772_s12 }
 0x102   : > { %331 = vrot.lane.b32.xlu1 %v724_v5, %s772_s12 }
 0x16e   : > { %v224_v26 = vpop.xlane.xlu1 %223 }
 0x16f   : > { %v230_v29 = vsub.f32 %v213_v12, %v224_v26 }
 0x170   : > { %v218_v27 = vpop.xlane.xlu0 %217 }
 0x171   : > { %v228_v28 = vsub.f32 %v211_v16, %v218_v27  ;;  %v236_v36 = vmul.f32 1.442695, %v230_v29 }
 0x172   : > { %v227_v30 = vpop.xlane.xlu1 %226 }
 0x173   : > { %v232_v31 = vmul.f32 1.442695, %v228_v28  ;;  %v231_v32 = vsub.f32 %v214_v20, %v227_v30 }
 0x174   : > { %v221_v33 = vpop.xlane.xlu0 %220 }
 0x175   : > { %v238_v34 = vmul.f32 1.442695, %v231_v32  ;;  %v229_v35 = vsub.f32 %v212_v22, %v221_v33  ;;  %732 = vpow2.f32 %v232_v31 }
 0x176   : > { %v334_v39 = vpop.permute.xlu1 %333 }
 0x177   : > { %v234_v37 = vmul.f32 1.442695, %v229_v35  ;;  %734 = vpow2.f32 %v238_v34  ;;  %v344_v48 = vsel %vm142_vm0, %v334_v39, 0 }
 0x178   : > { %v336_v38 = vpop.permute.xlu0 %335 }
 0x179   : > { %736 = vpow2.f32 %v234_v37  ;;  %702 = vmatprep.subr.msk.bf16.mxu1 %vm142_vm0, %v336_v38  ;;  %v347_v45 = vsel %vm142_vm0, %v336_v38, 0 }
 0x17a   : > { %738 = vpow2.f32 %v236_v36  ;;  %v330_v47 = vpop.permute.xlu1 %329 }
 0x17e   : > { %v332_v49 = vpop.permute.xlu1 %331 }
 0x182   : > { %v839_v40 = vpop.eup %732 }
 0x183   : > { %v240_v31 = vsel %vm215_vm2, %v839_v40, 0.0 }
 0x184   : > { %v841_v41 = vpop.eup %734 }
 0x185   : > { %v249_v32 = vsel %vm215_vm2, %v841_v41, 0.0 }
 0x186   : > { %v843_v42 = vpop.eup %736 }
 0x187   : > { %v845_v43 = vpop.eup %738  ;;  %v252_v44 = vpack.c.bf16 %v843_v42, %v839_v40  ;;  %v243_v30 = vsel %vm215_vm2, %v843_v42, 0.0 }
 0x188   : > { %v253_v46 = vpack.c.bf16 %v841_v41, %v845_v43  ;;  %v246_v33 = vsel %vm215_vm2, %v845_v43, 0.0 }
 0x189   : > { %680 = vmatprep.mubr.msk.bf16.mxu1 %vm215_vm2, %v252_v44 }
 0x18a   : > { %681 = vmatmul.mubr.msk.bf16.vlgmr.msra.gmra.mxu1 %vm215_vm2, %v253_v46 }
 0x18b   : > { %685 = vmatpush3.bf16.xpose.msra.mxu1 %v347_v45  ;;  %688 = vmatprep.mubr.msk.bf16.mxu1 %vm142_vm0, %v330_v47 }
 0x18c   : > { %703 = vmatprep.subr.msk.bf16.mxu1 %vm142_vm0, %v334_v39 }
 0x193   : > { %687 = vmatpush3.bf16.xpose.msra.mxu1 %v344_v48 }
 0x19a   : > { %689 = vmatmul.mubr.msk.bf16.vlgmr.msra.gmra.mxu1 %vm142_vm0, %v332_v49 }
 0x24a   : > { %v858_v50 = vpop.f32.mrf.mxu1 }
 0x24c   : > { %v860_v51 = vpop.f32.mrf.mxu1 }
 0x24e   : > { %v862_v52 = vpop.f32.mrf.mxu1 }
 0x250   : > { %v864_v53 = vpop.f32.mrf.mxu1 }
 0x25a   : > { %v690_v54 = vpop.f32.mrf.mxu1 }
 0x25b   : > { %v400_v55 = vmul.f32 0.125, %v690_v54 }
 0x25c   : > { %v383_v56 = vpop.f32.mrf.mxu1 }
 0x25d   : > { %v398_v57 = vmul.f32 0.125, %v383_v56  ;;  %v404_v58 = vsel %vm210_vm1, %v400_v55, -1e+30 }
 0x25e   : > { %v691_v59 = vpop.f32.mrf.mxu1  ;;  %v412_v60 = vsel %vm215_vm2, %v404_v58, -inf }
 0x25f   : > { %v401_v61 = vmul.f32 0.125, %v691_v59  ;;  %413 = vmax.xlane.f32.xlu0 %v412_v60  ;;  %v402_v62 = vsel %vm210_vm1, %v398_v57, -1e+30 }
 0x260   : > { %v386_v63 = vpop.f32.mrf.mxu1  ;;  %v406_v1 = vsel %vm215_vm2, %v402_v62, -inf }
 0x261   : > { %v399_v0 = vmul.f32 0.125, %v386_v63  ;;  %v405_v3 = vsel %vm210_vm1, %v401_v61, -1e+30 }
 0x262   : > { %v415_v5 = vsel %vm215_vm2, %v405_v3, -inf }
 0x263   : > { %407 = vmax.xlane.f32.xlu0 %v406_v1  ;;  %v403_v2 = vsel %vm210_vm1, %v399_v0, -1e+30 }
 0x264   : > { %v409_v4 = vsel %vm215_vm2, %v403_v2, -inf }
 0x265   : > { %410 = vmax.xlane.f32.xlu1 %v409_v4 }
 0x267   : > { %416 = vmax.xlane.f32.xlu0 %v415_v5 }
 0x276   : > { %444 = vrot.lane.b32.xlu1 %v828_v25, %s772_s12 }
 0x27d   : > { %446 = vrot.lane.b32.xlu0 %v825_v24, %s772_s12 }
 0x2e8   : > { %v414_v6 = vpop.xlane.xlu0 %413 }
 0x2e9   : > { %v420_v8 = vsub.f32 %v404_v58, %v414_v6 }
 0x2eb   : > { %v426_v13 = vmul.f32 1.442695, %v420_v8 }
 0x2ec   : > { %v408_v9 = vpop.xlane.xlu0 %407 }
 0x2ed   : > { %v418_v10 = vsub.f32 %v402_v62, %v408_v9 }
 0x2ee   : > { %v411_v11 = vpop.xlane.xlu1 %410 }
 0x2ef   : > { %v422_v12 = vmul.f32 1.442695, %v418_v10  ;;  %v419_v7 = vsub.f32 %v403_v2, %v411_v11 }
 0x2f0   : > { %v417_v14 = vpop.xlane.xlu0 %416 }
 0x2f1   : > { %740 = vpow2.f32 %v422_v12  ;;  %v424_v15 = vmul.f32 1.442695, %v419_v7  ;;  %v421_v16 = vsub.f32 %v405_v3, %v417_v14 }
 0x2f2   : > { %v445_v19 = vpop.permute.xlu1 %444 }
 0x2f3   : > { %742 = vpow2.f32 %v424_v15  ;;  %v428_v17 = vmul.f32 1.442695, %v421_v16 }
 0x2f4   : > { %744 = vpow2.f32 %v426_v13  ;;  %v447_v18 = vpop.permute.xlu0 %446 }
 0x2f5   : > { %746 = vpow2.f32 %v428_v17  ;;  %692 = vmatprep.subr.bf16.mxu0 %v447_v18 }
 0x2f6   : > { %693 = vmatpush3.bf16.msra.mxu0 %v447_v18 }
 0x2f7   : > { %694 = vmatprep.subr.bf16.mxu0 %v445_v19 }
 0x2fa   : > { %695 = vmatpush3.bf16.msra.mxu0 %v445_v19 }
 0x2fe   : > { %v741_v20 = vpop.eup %740 }
 0x2ff   : > { %v430_v21 = vsel %vm215_vm2, %v741_v20, 0.0 }
 0x300   : > { %v743_v22 = vpop.eup %742  ;;  %431 = vadd.xlane.f32.xlu1 %v430_v21 }
 0x301   : > { %v745_v23 = vpop.eup %744  ;;  %v433_v24 = vsel %vm215_vm2, %v743_v22, 0.0  ;;  %v442_v25 = vpack.c.bf16 %v743_v22, %v741_v20 }
 0x302   : > { %v747_v26 = vpop.eup %746  ;;  %434 = vadd.xlane.f32.xlu0 %v433_v24  ;;  %v436_v29 = vsel %vm215_vm2, %v745_v23, 0.0 }
 0x303   : > { %696 = vmatprep.mubr.msk.bf16.mxu0 %vm215_vm2, %v442_v25  ;;  %v439_v27 = vsel %vm215_vm2, %v747_v26, 0.0  ;;  %v443_v28 = vpack.c.bf16 %v747_v26, %v745_v23 }
 0x304   : > { %440 = vadd.xlane.f32.xlu1 %v439_v27 }
 0x305   : > { %697 = vmatmul.mubr.msk.bf16.vlgmr.msra.gmra.mxu0 %vm215_vm2, %v443_v28 }
 0x306   : > { %437 = vadd.xlane.f32.xlu0 %v436_v29 }
 0x308   : > { %244 = vadd.xlane.f32.xlu1 %v243_v30 }
 0x30a   : > { %241 = vadd.xlane.f32.xlu0 %v240_v31 }
 0x30c   : > { %250 = vadd.xlane.f32.xlu1 %v249_v32 }
 0x30e   : > { %247 = vadd.xlane.f32.xlu0 %v246_v33 }
 0x389   : > { %v432_v34 = vpop.xlane.xlu1 %431 }
 0x38b   : > { %v435_v35 = vpop.xlane.xlu0 %434 }
 0x38d   : > { %v441_v36 = vpop.xlane.xlu1 %440 }
 0x38e   : > { %748 = vrcp.f32 %v441_v36 }
 0x38f   : > { %v438_v37 = vpop.xlane.xlu0 %437 }
 0x390   : > { %750 = vrcp.f32 %v438_v37 }
 0x391   : > { %752 = vrcp.f32 %v432_v34  ;;  %v245_v56 = vpop.xlane.xlu1 %244 }
 0x392   : > { %754 = vrcp.f32 %v435_v35 }
 0x393   : > { %v242_v57 = vpop.xlane.xlu0 %241  ;;  %756 = vrcp.f32 %v245_v56 }
 0x395   : > { %v251_v58 = vpop.xlane.xlu1 %250 }
 0x396   : > { %758 = vrcp.f32 %v251_v58 }
 0x397   : > { %v248_v59 = vpop.xlane.xlu0 %247 }
 0x398   : > { %760 = vrcp.f32 %v248_v59 }
 0x399   : > { %762 = vrcp.f32 %v242_v57 }
 0x39b   : > { %v749_v40 = vpop.eup %748 }
 0x39d   : > { %v751_v42 = vpop.eup %750 }
 0x39e   : > { %v753_v45 = vpop.eup %752 }
 0x39f   : > { %v755_v47 = vpop.eup %754 }
 0x3a0   : > { %v757_v60 = vpop.eup %756 }
 0x3a1   : > { %v326_v8 = vmul.f32 %v757_v60, %v864_v53 }
 0x3a3   : > { %v759_v61 = vpop.eup %758 }
 0x3a4   : > { %v328_v2 = vmul.f32 %v759_v61, %v862_v52 }
 0x3a5   : > { %v761_v62 = vpop.eup %760 }
 0x3a6   : > { %v763_v63 = vpop.eup %762  ;;  %v327_v1 = vmul.f32 %v761_v62, %v858_v50 }
 0x3a7   : > { %v325_v5 = vmul.f32 %v763_v63, %v860_v51 }
 0x3c5   : > { %v698_v38 = vpop.f32.mrf.mxu0 }
 0x3c6   : > { %v511_v41 = vmul.f32 %v751_v42, %v698_v38 }
 0x3c7   : > { %v490_v39 = vpop.f32.mrf.mxu0 }
 0x3c8   : > { %v509_v43 = vmul.f32 %v753_v45, %v490_v39 }
 0x3c9   : > { %v699_v44 = vpop.f32.mrf.mxu0 }
 0x3ca   : > { %v512_v46 = vmul.f32 %v749_v40, %v699_v44 }
 0x3cb   : > { %v493_v48 = vpop.f32.mrf.mxu0 }
 0x3cc   : > { %v719_v49 = vpack.i.bf16 %v512_v46, %v511_v41  ;;  %v510_v54 = vmul.f32 %v755_v47, %v493_v48 }
 0x3ce   : > { %v714_v55 = vpack.i.bf16 %v510_v54, %v509_v43  ;;  %720 = vrot.lane.b32.xlu1 %v719_v49, %s772_s12 }
 0x3d0   : > { %715 = vrot.lane.b32.xlu0 %v714_v55, %s772_s12 }
 0x440   : > { %v721_v0 = vpop.permute.xlu1 %720 }
 0x441   : > { %v723_v3 = vunpack.i.h.bf16 %v721_v0  ;;  %v722_v4 = vunpack.i.l.bf16 %v721_v0 }
 0x442   : > { %v716_v6 = vpop.permute.xlu0 %715 }
 0x443   : > { %v532_v9 = vsel %vm142_vm0, %v328_v2, %v723_v3  ;;  %v531_v10 = vsel %vm142_vm0, %v327_v1, %v722_v4  ;;  %v718_v11 = vunpack.i.h.bf16 %v716_v6  ;;  %v717_v12 = vunpack.i.l.bf16 %v716_v6 }
 0x444   : > { %v649_v50 = vpack.c.bf16 %v532_v9, %v531_v10 }
 0x445   : > { %v529_v52 = vsel %vm142_vm0, %v325_v5, %v717_v12  ;;  %v530_v7 = vsel %vm142_vm0, %v326_v8, %v718_v11 }
 0x446   : > { %651 = vst [vmem:[%s116_s16 + $0x8] sm:$0xff] %v649_v50   ;;  %v644_v51 = vpack.c.bf16 %v530_v7, %v529_v52 }
 0x448   : > { %645 = vst [vmem:[%s116_s16] sm:$0xff] %v644_v51  }
 0x449 PF: > { %s11_s6 = sadd.s32 1, %s770_s6  }
 0x44a   : > { %p8_p4 = scmp.ge.s32.totalorder %s11_s6, 4  }
 0x44c   :  { %10 = sbr.rel (!%p8_p4) target bundleno = 1 (0x1), region = 54 }

// kernel: vit_encoder_forward.17
= control target key start
LH: loop header
LB: loop body
LE: loop exit
PB: predicated region body
PF: predicated region fallthrough
CT: control target
= control target key end

     0   :  { %s438_s1 = inlined_call_operand.vmem [shape: bf16[128,128], index: 1, kind: input, shape index: {}]   ;;  %s439_s0 = inlined_call_operand.vmem [shape: bf16[64,128], index: 0, kind: input, shape index: {}]   ;;  %s440_s2 = inlined_call_operand.vmem [shape: f32[1,128], index: 2, kind: input, shape index: {}]   ;;  %s441_s3 = inlined_call_operand.vmem [shape: f32[1,128], index: 3, kind: input, shape index: {}]   ;;  %s442_s4 = inlined_call_operand.vmem [shape: f32[64,128], index: 4, kind: input, shape index: {}]   ;;  %s443_s5 = inlined_call_operand.vmem [shape: f32[64,128], index: 5, kind: output, shape index: {}]  }
   0x1   :  { %v306_v0 = vld [vmem:[%s438_s1 + $0x38] sm:$0xff]   ;;  %v307_v1 = vld [vmem:[%s438_s1 + $0x30] sm:$0xff]   ;;  %v308_v2 = vld [vmem:[%s438_s1 + $0x28] sm:$0xff]  }
   0x2   :  { %266 = vmatprep.subr.bf16.mxu0 %v306_v0  ;;  %290 = vmatprep.subr.bf16.mxu1 %v306_v0  ;;  %v309_v3 = vld [vmem:[%s438_s1 + $0x20] sm:$0xff]   ;;  %v315_v5 = vld [vmem:[%s439_s0 + $0x10] sm:$0xff]   ;;  %v310_v6 = vld [vmem:[%s438_s1 + $0x18] sm:$0xff]  }
   0x3   :  { %267 = vmatpush3.bf16.msra.mxu0 %v306_v0  ;;  %298 = vmatpush3.bf16.msra.mxu1 %v306_v0  ;;  %v314_v4 = vld [vmem:[%s439_s0] sm:$0xff]   ;;  %v311_v7 = vld [vmem:[%s438_s1 + $0x10] sm:$0xff]   ;;  %v312_v8 = vld [vmem:[%s438_s1 + $0x8] sm:$0xff]  }
   0x4   :  { %268 = vmatprep.subr.bf16.mxu0 %v307_v1  ;;  %291 = vmatprep.subr.bf16.mxu1 %v307_v1  ;;  %v313_v9 = vld [vmem:[%s438_s1] sm:$0xff]   ;;  %v316_v10 = vld [vmem:[%s439_s0 + $0x8] sm:$0xff]   ;;  %v317_v11 = vld [vmem:[%s439_s0 + $0x18] sm:$0xff]  }
   0x5   :  { %282 = vmatprep.mubr.bf16.mxu0 %v314_v4  ;;  %286 = vmatprep.mubr.bf16.mxu1 %v315_v5  ;;  %v252_v12 = vld [vmem:[%s440_s2] ss:$0 sm:$0xff]  ;;  %v214_v18 = vld [vmem:[%s442_s4 + $0x10] sm:$0xff]  ;;  %v215_v40 = vld [vmem:[%s442_s4 + $0x18] sm:$0xff] }
   0x6   :  { %v253_v14 = vld [vmem:[%s441_s3] ss:$0 sm:$0xff]  ;;  %v218_v19 = vld [vmem:[%s442_s4 + $0x30] sm:$0xff]  ;;  %v219_v41 = vld [vmem:[%s442_s4 + $0x38] sm:$0xff] }
   0x7   :  { %269 = vmatpush3.bf16.msra.mxu0 %v307_v1  ;;  %299 = vmatpush3.bf16.msra.mxu1 %v307_v1  ;;  %v212_v26 = vld [vmem:[%s442_s4] sm:$0xff]  ;;  %v213_v46 = vld [vmem:[%s442_s4 + $0x8] sm:$0xff] }
   0x8   :  { %270 = vmatprep.subr.bf16.mxu0 %v308_v2  ;;  %292 = vmatprep.subr.bf16.mxu1 %v308_v2  ;;  %v216_v27 = vld [vmem:[%s442_s4 + $0x20] sm:$0xff]  ;;  %v217_v47 = vld [vmem:[%s442_s4 + $0x28] sm:$0xff] }
   0xb   :  { %271 = vmatpush3.bf16.msra.mxu0 %v308_v2  ;;  %300 = vmatpush3.bf16.msra.mxu1 %v308_v2 }
   0xc   :  { %272 = vmatprep.subr.bf16.mxu0 %v309_v3  ;;  %293 = vmatprep.subr.bf16.mxu1 %v309_v3 }
   0xf   :  { %273 = vmatpush3.bf16.msra.mxu0 %v309_v3  ;;  %301 = vmatpush3.bf16.msra.mxu1 %v309_v3 }
  0x10   :  { %274 = vmatprep.subr.bf16.mxu0 %v310_v6  ;;  %294 = vmatprep.subr.bf16.mxu1 %v310_v6 }
  0x13   :  { %275 = vmatpush3.bf16.msra.mxu0 %v310_v6  ;;  %302 = vmatpush3.bf16.msra.mxu1 %v310_v6 }
  0x14   :  { %276 = vmatprep.subr.bf16.mxu0 %v311_v7  ;;  %295 = vmatprep.subr.bf16.mxu1 %v311_v7 }
  0x17   :  { %277 = vmatpush3.bf16.msra.mxu0 %v311_v7  ;;  %303 = vmatpush3.bf16.msra.mxu1 %v311_v7 }
  0x18   :  { %278 = vmatprep.subr.bf16.mxu0 %v312_v8  ;;  %296 = vmatprep.subr.bf16.mxu1 %v312_v8 }
  0x1b   :  { %279 = vmatpush3.bf16.msra.mxu0 %v312_v8  ;;  %304 = vmatpush3.bf16.msra.mxu1 %v312_v8 }
  0x1c   :  { %280 = vmatprep.subr.bf16.mxu0 %v313_v9  ;;  %297 = vmatprep.subr.bf16.mxu1 %v313_v9 }
  0x1f   :  { %281 = vmatpush3.bf16.msra.mxu0 %v313_v9  ;;  %305 = vmatpush3.bf16.msra.mxu1 %v313_v9 }
  0x22   :  { %283 = vmatmul.mubr.bf16.vlgmr.msra.gmra.mxu0 %v316_v10  ;;  %287 = vmatmul.mubr.bf16.vlgmr.msra.gmra.mxu1 %v317_v11 }
  0xe2   :  { %v284_v13 = vpop.f32.mrf.mxu0  ;;  %v288_v15 = vpop.f32.mrf.mxu1 }
  0xe3   :  { %v191_v16 = vmul.f32 %v284_v13, %v252_v12  ;;  %v195_v17 = vmul.f32 %v288_v15, %v252_v12 }
  0xe4   :  { %v151_v20 = vpop.f32.mrf.mxu0  ;;  %v167_v21 = vpop.f32.mrf.mxu1 }
  0xe5   :  { %v206_v22 = vadd.f32 %v253_v14, %v191_v16  ;;  %v210_v23 = vadd.f32 %v253_v14, %v195_v17  ;;  %v189_v24 = vmul.f32 %v252_v12, %v151_v20  ;;  %v193_v25 = vmul.f32 %v252_v12, %v167_v21 }
  0xe6   :  { %v285_v28 = vpop.f32.mrf.mxu0  ;;  %v289_v29 = vpop.f32.mrf.mxu1 }
  0xe7   :  { %v222_v30 = vadd.f32 %v214_v18, %v206_v22  ;;  %v226_v31 = vadd.f32 %v218_v19, %v210_v23  ;;  %v204_v32 = vadd.f32 %v253_v14, %v189_v24  ;;  %v208_v33 = vadd.f32 %v253_v14, %v193_v25 }
  0xe8   :  { %v192_v34 = vmul.f32 %v285_v28, %v252_v12  ;;  %v196_v35 = vmul.f32 %v289_v29, %v252_v12  ;;  %v154_v36 = vpop.f32.mrf.mxu0  ;;  %v170_v37 = vpop.f32.mrf.mxu1 }
  0xe9   :  { %230 = vst [vmem:[%s443_s5 + $0x10] sm:$0xff] %v222_v30  ;;  %234 = vst [vmem:[%s443_s5 + $0x30] sm:$0xff] %v226_v31  ;;  %v220_v38 = vadd.f32 %v212_v26, %v204_v32  ;;  %v224_v39 = vadd.f32 %v216_v27, %v208_v33  ;;  %v190_v42 = vmul.f32 %v252_v12, %v154_v36 }
  0xea   :  { %v194_v43 = vmul.f32 %v252_v12, %v170_v37  ;;  %v207_v44 = vadd.f32 %v253_v14, %v192_v34  ;;  %v211_v45 = vadd.f32 %v253_v14, %v196_v35 }
  0xeb   :  { %228 = vst [vmem:[%s443_s5] sm:$0xff] %v220_v38  ;;  %232 = vst [vmem:[%s443_s5 + $0x20] sm:$0xff] %v224_v39  ;;  %v205_v48 = vadd.f32 %v253_v14, %v190_v42 }
  0xec   :  { %v209_v49 = vadd.f32 %v253_v14, %v194_v43  ;;  %v223_v50 = vadd.f32 %v215_v40, %v207_v44  ;;  %v227_v51 = vadd.f32 %v219_v41, %v211_v45 }
  0xed   :  { %v221_v52 = vadd.f32 %v213_v46, %v205_v48 }
  0xee   :  { %v225_v53 = vadd.f32 %v217_v47, %v209_v49  ;;  %231 = vst [vmem:[%s443_s5 + $0x18] sm:$0xff] %v223_v50  ;;  %235 = vst [vmem:[%s443_s5 + $0x38] sm:$0xff] %v227_v51 }
  0xef   :  { %229 = vst [vmem:[%s443_s5 + $0x8] sm:$0xff] %v221_v52 }
  0xf0   :  { %233 = vst [vmem:[%s443_s5 + $0x28] sm:$0xff] %v225_v53 }

// kernel: vit_encoder_forward.18
= control target key start
LH: loop header
LB: loop body
LE: loop exit
PB: predicated region body
PF: predicated region fallthrough
CT: control target
= control target key end

     0   :  { %s1768_s0 = inlined_call_operand.vmem [shape: f32[64,128], index: 0, kind: input, shape index: {}]   ;;  %s1769_s1 = inlined_call_operand.vmem [shape: bf16[128,512], index: 1, kind: input, shape index: {}]   ;;  %s1770_s4 = inlined_call_operand.vmem [shape: f32[1,128], index: 4, kind: input, shape index: {}]   ;;  %s1771_s5 = inlined_call_operand.vmem [shape: f32[1,128], index: 5, kind: input, shape index: {}]   ;;  %s1772_s2 = inlined_call_operand.vmem [shape: f32[1,512], index: 2, kind: input, shape index: {}]   ;;  %s1773_s3 = inlined_call_operand.vmem [shape: f32[1,512], index: 3, kind: input, shape index: {}]   ;;  %s1774_s6 = inlined_call_operand.vmem [shape: bf16[64,512], index: 6, kind: output, shape index: {}]  }
   0x1   :  { %v24_v0 = vld [vmem:[%s1768_s0] sm:$0xff]  ;;  %v26_v1 = vld [vmem:[%s1768_s0 + $0x10] sm:$0xff]  ;;  %v25_v2 = vld [vmem:[%s1768_s0 + $0x8] sm:$0xff] }
   0x2   :  { %32 = vadd.xlane.f32.xlu0 %v24_v0  ;;  %36 = vadd.xlane.f32.xlu1 %v26_v1  ;;  %v27_v3 = vld [vmem:[%s1768_s0 + $0x18] sm:$0xff]  ;;  %v28_v4 = vld [vmem:[%s1768_s0 + $0x20] sm:$0xff]  ;;  %v29_v5 = vld [vmem:[%s1768_s0 + $0x28] sm:$0xff] }
   0x3   :  { %v30_v6 = vld [vmem:[%s1768_s0 + $0x30] sm:$0xff]  ;;  %v31_v7 = vld [vmem:[%s1768_s0 + $0x38] sm:$0xff] }
   0x4   :  { %v1072_v8 = vld [vmem:[%s1769_s1 + $0xe4] ss:$16 sps:$4 sm:$0xff]   ;;  %v1074_v9 = vld [vmem:[%s1769_s1 + $0xec] ss:$16 sps:$4 sm:$0xff]   ;;  %v1076_v10 = vld [vmem:[%s1769_s1 + $0xe0] ss:$16 sps:$4 sm:$0xff]  }
   0x5   :  { %347 = vmatprep.subr.bf16.mxu0 %v1072_v8  ;;  %v1077_v11 = vld [vmem:[%s1769_s1 + $0xe8] ss:$16 sps:$4 sm:$0xff]   ;;  %420 = vmatprep.subr.bf16.mxu1 %v1074_v9  ;;  %v1078_v43 = vld [vmem:[%s1769_s1 + $0xc4] ss:$16 sps:$4 sm:$0xff]   ;;  %v1080_v44 = vld [vmem:[%s1769_s1 + $0xcc] ss:$16 sps:$4 sm:$0xff]  }
   0x6   :  { %34 = vadd.xlane.f32.xlu0 %v25_v2  ;;  %38 = vadd.xlane.f32.xlu1 %v27_v3  ;;  %v1082_v45 = vld [vmem:[%s1769_s1 + $0xc0] ss:$16 sps:$4 sm:$0xff]   ;;  %v1083_v46 = vld [vmem:[%s1769_s1 + $0xc8] ss:$16 sps:$4 sm:$0xff]   ;;  %v1084_v48 = vld [vmem:[%s1769_s1 + $0xa4] ss:$16 sps:$4 sm:$0xff]  }
   0x7   :  { %348 = vmatpush1.bf16.msra.mxu0 %v1076_v10  ;;  %421 = vmatpush1.bf16.msra.mxu1 %v1077_v11  ;;  %v1086_v49 = vld [vmem:[%s1769_s1 + $0xac] ss:$16 sps:$4 sm:$0xff]   ;;  %v1088_v50 = vld [vmem:[%s1769_s1 + $0xa0] ss:$16 sps:$4 sm:$0xff]   ;;  %v1089_v51 = vld [vmem:[%s1769_s1 + $0xa8] ss:$16 sps:$4 sm:$0xff]  }
   0x8   :  { %349 = vmatprep.subr.bf16.mxu0 %v1078_v43  ;;  %422 = vmatprep.subr.bf16.mxu1 %v1080_v44  ;;  %v1090_v52 = vld [vmem:[%s1769_s1 + $0x84] ss:$16 sps:$4 sm:$0xff]   ;;  %v1092_v53 = vld [vmem:[%s1769_s1 + $0x8c] ss:$16 sps:$4 sm:$0xff]   ;;  %v1094_v54 = vld [vmem:[%s1769_s1 + $0x80] ss:$16 sps:$4 sm:$0xff]  }
   0x9   :  { %v1095_v55 = vld [vmem:[%s1769_s1 + $0x88] ss:$16 sps:$4 sm:$0xff]   ;;  %v1096_v56 = vld [vmem:[%s1769_s1 + $0x64] ss:$16 sps:$4 sm:$0xff]   ;;  %v1098_v57 = vld [vmem:[%s1769_s1 + $0x6c] ss:$16 sps:$4 sm:$0xff]  }
   0xa   :  { %40 = vadd.xlane.f32.xlu0 %v28_v4  ;;  %42 = vadd.xlane.f32.xlu1 %v29_v5  ;;  %v1100_v58 = vld [vmem:[%s1769_s1 + $0x60] ss:$16 sps:$4 sm:$0xff]   ;;  %v1101_v59 = vld [vmem:[%s1769_s1 + $0x68] ss:$16 sps:$4 sm:$0xff]   ;;  %v1102_v60 = vld [vmem:[%s1769_s1 + $0x44] ss:$16 sps:$4 sm:$0xff]  }
   0xb   :  { %350 = vmatpush1.bf16.msra.mxu0 %v1082_v45  ;;  %423 = vmatpush1.bf16.msra.mxu1 %v1083_v46  ;;  %v1104_v61 = vld [vmem:[%s1769_s1 + $0x4c] ss:$16 sps:$4 sm:$0xff]   ;;  %v1106_v62 = vld [vmem:[%s1769_s1 + $0x40] ss:$16 sps:$4 sm:$0xff]   ;;  %v1107_v63 = vld [vmem:[%s1769_s1 + $0x48] ss:$16 sps:$4 sm:$0xff]  }
   0xc   :  { %351 = vmatprep.subr.bf16.mxu0 %v1084_v48  ;;  %424 = vmatprep.subr.bf16.mxu1 %v1086_v49  ;;  %v1119_v8 = vld [vmem:[%s1769_s1 + $0x8] ss:$16 sps:$4 sm:$0xff]   ;;  %v1006_v48 = vld [vmem:[%s1771_s5] ss:$0 sm:$0xff] }
   0xe   :  { %44 = vadd.xlane.f32.xlu0 %v30_v6  ;;  %46 = vadd.xlane.f32.xlu1 %v31_v7 }
   0xf   :  { %352 = vmatpush1.bf16.msra.mxu0 %v1088_v50  ;;  %425 = vmatpush1.bf16.msra.mxu1 %v1089_v51 }
  0x10   :  { %353 = vmatprep.subr.bf16.mxu0 %v1090_v52  ;;  %426 = vmatprep.subr.bf16.mxu1 %v1092_v53 }
  0x13   :  { %354 = vmatpush1.bf16.msra.mxu0 %v1094_v54  ;;  %427 = vmatpush1.bf16.msra.mxu1 %v1095_v55 }
  0x14   :  { %355 = vmatprep.subr.bf16.mxu0 %v1096_v56  ;;  %428 = vmatprep.subr.bf16.mxu1 %v1098_v57 }
  0x17   :  { %356 = vmatpush1.bf16.msra.mxu0 %v1100_v58  ;;  %429 = vmatpush1.bf16.msra.mxu1 %v1101_v59 }
  0x18   :  { %357 = vmatprep.subr.bf16.mxu0 %v1102_v60  ;;  %430 = vmatprep.subr.bf16.mxu1 %v1104_v61 }
  0x1b   :  { %358 = vmatpush1.bf16.msra.mxu0 %v1106_v62  ;;  %431 = vmatpush1.bf16.msra.mxu1 %v1107_v63 }
  0x8b   :  { %v33_v12 = vpop.xlane.xlu0 %32  ;;  %v37_v13 = vpop.xlane.xlu1 %36 }
  0x8c   :  { %v49_v14 = vmul.f32 0.0078125, %v33_v12  ;;  %v51_v15 = vmul.f32 0.0078125, %v37_v13 }
  0x8e   :  { %v1272_v16 = vsub.f32 %v24_v0, %v49_v14  ;;  %v1274_v17 = vsub.f32 %v26_v1, %v51_v15  ;;  %v1108_v0 = vld [vmem:[%s1769_s1 + $0x24] ss:$16 sps:$4 sm:$0xff]   ;;  %v1110_v1 = vld [vmem:[%s1769_s1 + $0x2c] ss:$16 sps:$4 sm:$0xff]  }
  0x8f   :  { %v35_v18 = vpop.xlane.xlu0 %34  ;;  %v39_v19 = vpop.xlane.xlu1 %38  ;;  %359 = vmatprep.subr.bf16.mxu0 %v1108_v0  ;;  %432 = vmatprep.subr.bf16.mxu1 %v1110_v1 }
  0x90   :  { %v50_v20 = vmul.f32 0.0078125, %v35_v18  ;;  %v65_v21 = vmul.f32 %v1272_v16, %v1272_v16  ;;  %v52_v22 = vmul.f32 0.0078125, %v39_v19  ;;  %v67_v25 = vmul.f32 %v1274_v17, %v1274_v17 }
  0x92   :  { %v1278_v23 = vsub.f32 %v25_v2, %v50_v20  ;;  %73 = vadd.xlane.f32.xlu0 %v65_v21  ;;  %v1280_v24 = vsub.f32 %v27_v3, %v52_v22  ;;  %v1112_v2 = vld [vmem:[%s1769_s1 + $0x20] ss:$16 sps:$4 sm:$0xff]   ;;  %v1113_v3 = vld [vmem:[%s1769_s1 + $0x28] ss:$16 sps:$4 sm:$0xff]  }
  0x93   :  { %v41_v26 = vpop.xlane.xlu0 %40  ;;  %v43_v27 = vpop.xlane.xlu1 %42  ;;  %360 = vmatpush1.bf16.msra.mxu0 %v1112_v2  ;;  %433 = vmatpush1.bf16.msra.mxu1 %v1113_v3 }
  0x94   :  { %v53_v28 = vmul.f32 0.0078125, %v41_v26  ;;  %v66_v29 = vmul.f32 %v1278_v23, %v1278_v23  ;;  %v54_v30 = vmul.f32 0.0078125, %v43_v27  ;;  %v68_v33 = vmul.f32 %v1280_v24, %v1280_v24 }
  0x96   :  { %v1286_v31 = vsub.f32 %v28_v4, %v53_v28  ;;  %77 = vadd.xlane.f32.xlu0 %v67_v25  ;;  %75 = vadd.xlane.f32.xlu1 %v66_v29  ;;  %v1288_v32 = vsub.f32 %v29_v5, %v54_v30  ;;  %v1114_v4 = vld [vmem:[%s1769_s1 + $0x4] ss:$16 sps:$4 sm:$0xff]   ;;  %v1116_v5 = vld [vmem:[%s1769_s1 + $0xc] ss:$16 sps:$4 sm:$0xff]  }
  0x97   :  { %v45_v34 = vpop.xlane.xlu0 %44  ;;  %v47_v35 = vpop.xlane.xlu1 %46  ;;  %361 = vmatprep.subr.bf16.mxu0 %v1114_v4  ;;  %434 = vmatprep.subr.bf16.mxu1 %v1116_v5 }
  0x98   :  { %v55_v36 = vmul.f32 0.0078125, %v45_v34  ;;  %v69_v37 = vmul.f32 %v1286_v31, %v1286_v31  ;;  %v56_v38 = vmul.f32 0.0078125, %v47_v35  ;;  %v70_v41 = vmul.f32 %v1288_v32, %v1288_v32  ;;  %435 = vmatpush1.bf16.msra.mxu1 %v1119_v8 }
  0x9a   :  { %v1294_v39 = vsub.f32 %v30_v6, %v55_v36  ;;  %79 = vadd.xlane.f32.xlu1 %v68_v33  ;;  %81 = vadd.xlane.f32.xlu0 %v69_v37  ;;  %v1296_v40 = vsub.f32 %v31_v7, %v56_v38  ;;  %v1200_v6 = vmov 0   ;;  %v1118_v7 = vld [vmem:[%s1769_s1] ss:$16 sps:$4 sm:$0xff]  }
  0x9b   :  { %379 = vmatprep.mubr.bf16.mxu0 %v1200_v6  ;;  %452 = vmatprep.mubr.bf16.mxu1 %v1200_v6 }
  0x9c   :  { %v71_v42 = vmul.f32 %v1294_v39, %v1294_v39  ;;  %v72_v47 = vmul.f32 %v1296_v40, %v1296_v40  ;;  %362 = vmatpush1.bf16.msra.mxu0 %v1118_v7 }
  0x9e   :  { %83 = vadd.xlane.f32.xlu1 %v70_v41  ;;  %85 = vadd.xlane.f32.xlu0 %v71_v42  ;;  %v1005_v41 = vld [vmem:[%s1770_s4] ss:$0 sm:$0xff] }
  0xa2   :  { %87 = vadd.xlane.f32.xlu1 %v72_v47 }
 0x11b   :  { %v74_v9 = vpop.xlane.xlu0 %73 }
 0x11c   :  { %v89_v10 = vmul.f32 0.0078125, %v74_v9 }
 0x11e   :  { %v97_v11 = vadd.f32 1e-06, %v89_v10  ;;  %v495_v10 = vlaneseq }
 0x11f   :  { %v76_v12 = vpop.xlane.xlu1 %75  ;;  %v78_v13 = vpop.xlane.xlu0 %77 }
 0x120   :  { %1120 = vrsqrt.f32 %v97_v11  ;;  %v90_v14 = vmul.f32 0.0078125, %v76_v12  ;;  %v91_v15 = vmul.f32 0.0078125, %v78_v13  ;;  %v496_v11 = vshrl.u32 %v495_v10, 7 }
 0x122   :  { %v98_v18 = vadd.f32 1e-06, %v90_v14  ;;  %v99_v19 = vadd.f32 1e-06, %v91_v15  ;;  %v505_v12 = vsub.s32 2, %v496_v11  ;;  %v501_v13 = vsub.s32 1, %v496_v11 }
 0x123   :  { %v80_v20 = vpop.xlane.xlu1 %79  ;;  %v82_v21 = vpop.xlane.xlu0 %81  ;;  %v509_v14 = vsub.s32 3, %v496_v11  ;;  %v547_v15 = vld [vmem:[%s1773_s3] sm:$0xf] }
 0x124   :  { %1122 = vrsqrt.f32 %v98_v18  ;;  %v92_v22 = vmul.f32 0.0078125, %v80_v20  ;;  %v93_v26 = vmul.f32 0.0078125, %v82_v21  ;;  %v1422_v20 = vrot.slane %v547_v15, %v505_v12 }
 0x125   :  { %1124 = vrsqrt.f32 %v99_v19 }
 0x126   :  { %v100_v25 = vadd.f32 1e-06, %v92_v22  ;;  %v101_v29 = vadd.f32 1e-06, %v93_v26 }
 0x127   :  { %v84_v27 = vpop.xlane.xlu1 %83  ;;  %v86_v33 = vpop.xlane.xlu0 %85 }
 0x128   :  { %1126 = vrsqrt.f32 %v100_v25  ;;  %v94_v28 = vmul.f32 0.0078125, %v84_v27  ;;  %v95_v37 = vmul.f32 0.0078125, %v86_v33 }
 0x12a   :  { %v102_v30 = vadd.f32 1e-06, %v94_v28  ;;  %v103_v44 = vadd.f32 1e-06, %v95_v37 }
 0x12b   :  { %v88_v34 = vpop.xlane.xlu1 %87 }
 0x12c   :  { %1128 = vrsqrt.f32 %v102_v30  ;;  %v96_v35 = vmul.f32 0.0078125, %v88_v34  ;;  %v1430_v30 = vrot.slane %v547_v15, %v501_v13  ;;  %v1432_v34 = vrot.slane %v547_v15, %v509_v14 }
 0x12d   :  { %v1121_v36 = vpop.eup %1120  ;;  %1130 = vrsqrt.f32 %v101_v29 }
 0x12e   :  { %v113_v38 = vmul.f32 %v1121_v36, %v1272_v16  ;;  %v104_v42 = vadd.f32 1e-06, %v96_v35 }
 0x130   :  { %v128_v46 = vmul.f32 %v1005_v41, %v113_v38  ;;  %1132 = vrsqrt.f32 %v104_v42 }
 0x131   :  { %v1123_v43 = vpop.eup %1122  ;;  %1134 = vrsqrt.f32 %v103_v44 }
 0x132   :  { %v114_v45 = vmul.f32 %v1123_v43, %v1278_v23  ;;  %v1125_v47 = vpop.eup %1124  ;;  %v143_v16 = vadd.f32 %v1006_v48, %v128_v46 }
 0x133   :  { %v115_v52 = vmul.f32 %v1125_v47, %v1274_v17 }
 0x134   :  { %v129_v49 = vmul.f32 %v1005_v41, %v114_v45 }
 0x135   :  { %v1127_v50 = vpop.eup %1126  ;;  %v130_v23 = vmul.f32 %v1005_v41, %v115_v52 }
 0x136   :  { %v144_v51 = vadd.f32 %v1006_v48, %v129_v49  ;;  %v116_v53 = vmul.f32 %v1127_v50, %v1280_v24 }
 0x137   :  { %v145_v60 = vadd.f32 %v1006_v48, %v130_v23 }
 0x138   :  { %v151_v54 = vpack.c.bf16 %v144_v51, %v143_v16  ;;  %v131_v55 = vmul.f32 %v1005_v41, %v116_v53 }
 0x139   :  { %v1129_v56 = vpop.eup %1128 }
 0x13a   :  { %380 = vmatmul.mubr.bf16.vlgmr.msra.gmra.mxu0 %v151_v54  ;;  %453 = vmatmul.mubr.bf16.vlgmr.msra.gmra.mxu1 %v151_v54  ;;  %v1131_v57 = vpop.eup %1130  ;;  %v146_v58 = vadd.f32 %v1006_v48, %v131_v55  ;;  %v118_v59 = vmul.f32 %v1129_v56, %v1288_v32 }
 0x13b   :  { %389 = vmatprep.mubr.bf16.mxu0 %v1200_v6  ;;  %462 = vmatprep.mubr.bf16.mxu1 %v1200_v6  ;;  %v117_v61 = vmul.f32 %v1131_v57, %v1286_v31 }
 0x13c   :  { %v152_v17 = vpack.c.bf16 %v146_v58, %v145_v60  ;;  %v133_v62 = vmul.f32 %v1005_v41, %v118_v59 }
 0x13d   :  { %v1133_v24 = vpop.eup %1132  ;;  %v132_v0 = vmul.f32 %v1005_v41, %v117_v61 }
 0x13e   :  { %v1135_v63 = vpop.eup %1134  ;;  %v148_v1 = vadd.f32 %v1006_v48, %v133_v62  ;;  %v120_v2 = vmul.f32 %v1133_v24, %v1296_v40  ;;  %v497_v40 = vsub.s32 0, %v496_v11 }
 0x13f   :  { %v147_v3 = vadd.f32 %v1006_v48, %v132_v0  ;;  %v119_v32 = vmul.f32 %v1135_v63, %v1294_v39  ;;  %v493_v39 = vld [vmem:[%s1772_s2] sm:$0xf] }
 0x140   :  { %v135_v5 = vmul.f32 %v1005_v41, %v120_v2  ;;  %v1418_v18 = vrot.slane %v493_v39, %v505_v12  ;;  %v1420_v19 = vrot.slane %v547_v15, %v497_v40  ;;  %v1424_v21 = vrot.slane %v493_v39, %v501_v13 }
 0x141   :  { %v153_v4 = vpack.c.bf16 %v148_v1, %v147_v3  ;;  %v134_v31 = vmul.f32 %v1005_v41, %v119_v32  ;;  %v1426_v22 = vrot.slane %v493_v39, %v509_v14 }
 0x142   :  { %390 = vmatmul.mubr.bf16.gmra.mxu0 %v152_v17  ;;  %463 = vmatmul.mubr.bf16.gmra.mxu1 %v152_v17  ;;  %v150_v7 = vadd.f32 %v1006_v48, %v135_v5 }
 0x143   :  { %399 = vmatprep.mubr.bf16.mxu0 %v1200_v6  ;;  %472 = vmatprep.mubr.bf16.mxu1 %v1200_v6  ;;  %v149_v8 = vadd.f32 %v1006_v48, %v134_v31 }
 0x145   :  { %v154_v9 = vpack.c.bf16 %v150_v7, %v149_v8 }
 0x14a   :  { %400 = vmatmul.mubr.bf16.gmra.mxu0 %v153_v4  ;;  %473 = vmatmul.mubr.bf16.gmra.mxu1 %v153_v4 }
 0x14b   :  { %409 = vmatprep.mubr.bf16.mxu0 %v1200_v6  ;;  %482 = vmatprep.mubr.bf16.mxu1 %v1200_v6  ;;  %v1416_v6 = vrot.slane %v493_v39, %v497_v40 }
 0x152   :  { %410 = vmatmul.mubr.bf16.gmra.mxu0 %v154_v9  ;;  %483 = vmatmul.mubr.bf16.gmra.mxu1 %v154_v9 }
 0x1fa   :  { %v381_v25 = vpop.f32.mrf.mxu0  ;;  %v454_v26 = vpop.f32.mrf.mxu1 }
 0x1fb   :  { %v515_v27 = vmul.f32 %v1416_v6, %v381_v25  ;;  %v517_v28 = vmul.f32 %v1418_v18, %v454_v26 }
 0x1fc   :  { %v383_v29 = vpop.f32.mrf.mxu0  ;;  %v456_v33 = vpop.f32.mrf.mxu1 }
 0x1fd   :  { %v1435_v35 = vadd.f32 %v1420_v19, %v515_v27  ;;  %v1438_v36 = vadd.f32 %v1422_v20, %v517_v28  ;;  %v516_v37 = vmul.f32 %v1424_v21, %v383_v29  ;;  %v518_v38 = vmul.f32 %v1426_v22, %v456_v33 }
 0x1fe   :  { %v385_v41 = vpop.f32.mrf.mxu0  ;;  %v458_v42 = vpop.f32.mrf.mxu1 }
 0x1ff   :  { %v633_v43 = vmul.f32 0.044715, %v1435_v35  ;;  %v635_v44 = vmul.f32 0.044715, %v1438_v36  ;;  %v1445_v45 = vadd.f32 %v1430_v30, %v516_v37  ;;  %v1448_v46 = vadd.f32 %v1432_v34, %v518_v38 }
 0x200   :  { %v519_v47 = vmul.f32 %v1416_v6, %v385_v41  ;;  %v521_v48 = vmul.f32 %v1418_v18, %v458_v42  ;;  %v387_v49 = vpop.f32.mrf.mxu0  ;;  %v460_v50 = vpop.f32.mrf.mxu1 }
 0x201   :  { %v665_v16 = vmul.f32 %v633_v43, %v1435_v35  ;;  %v667_v51 = vmul.f32 %v635_v44, %v1438_v36  ;;  %v520_v52 = vmul.f32 %v1424_v21, %v387_v49  ;;  %v522_v53 = vmul.f32 %v1426_v22, %v460_v50 }
 0x202   :  { %v634_v54 = vmul.f32 0.044715, %v1445_v45  ;;  %v636_v55 = vmul.f32 0.044715, %v1448_v46  ;;  %v1461_v57 = vadd.f32 %v1420_v19, %v519_v47  ;;  %v1464_v58 = vadd.f32 %v1422_v20, %v521_v48  ;;  %v391_v0 = vpop.f32.mrf.mxu0  ;;  %v464_v10 = vpop.f32.mrf.mxu1 }
 0x203   :  { %v697_v56 = vmul.f32 %v665_v16, %v1435_v35  ;;  %v699_v23 = vmul.f32 %v667_v51, %v1438_v36  ;;  %v1469_v61 = vadd.f32 %v1430_v30, %v520_v52  ;;  %v1475_v63 = vadd.f32 %v1432_v34, %v522_v53 }
 0x204   :  { %v666_v59 = vmul.f32 %v634_v54, %v1445_v45  ;;  %v668_v60 = vmul.f32 %v636_v55, %v1448_v46  ;;  %v637_v24 = vmul.f32 0.044715, %v1461_v57  ;;  %v639_v3 = vmul.f32 0.044715, %v1464_v58  ;;  %v393_v12 = vpop.f32.mrf.mxu0  ;;  %v466_v37 = vpop.f32.mrf.mxu1 }
 0x205   :  { %v729_v17 = vadd.f32 %v697_v56, %v1435_v35  ;;  %v731_v62 = vadd.f32 %v699_v23, %v1438_v36  ;;  %v638_v9 = vmul.f32 0.044715, %v1469_v61  ;;  %v640_v40 = vmul.f32 0.044715, %v1475_v63 }
 0x206   :  { %v698_v1 = vmul.f32 %v666_v59, %v1445_v45  ;;  %v700_v2 = vmul.f32 %v668_v60, %v1448_v46  ;;  %v669_v5 = vmul.f32 %v637_v24, %v1461_v57  ;;  %v671_v8 = vmul.f32 %v639_v3, %v1464_v58  ;;  %v395_v51 = vpop.f32.mrf.mxu0  ;;  %v468_v24 = vpop.f32.mrf.mxu1 }
 0x207   :  { %v761_v32 = vmul.f32 0.7978846, %v729_v17  ;;  %v763_v4 = vmul.f32 0.7978846, %v731_v62  ;;  %v670_v25 = vmul.f32 %v638_v9, %v1469_v61  ;;  %v672_v26 = vmul.f32 %v640_v40, %v1475_v63 }
 0x208   :  { %v730_v31 = vadd.f32 %v698_v1, %v1445_v45  ;;  %v732_v7 = vadd.f32 %v700_v2, %v1448_v46  ;;  %v701_v11 = vmul.f32 %v669_v5, %v1461_v57  ;;  %v703_v14 = vmul.f32 %v671_v8, %v1464_v58  ;;  %v397_v2 = vpop.f32.mrf.mxu0 }
 0x209   :  { %1136 = vtanh.f32 %v761_v32  ;;  %v523_v27 = vmul.f32 %v1416_v6, %v391_v0  ;;  %v525_v29 = vmul.f32 %v1418_v18, %v464_v10  ;;  %v524_v33 = vmul.f32 %v1424_v21, %v393_v12 }
 0x20a   :  { %1138 = vtanh.f32 %v763_v4  ;;  %v762_v39 = vmul.f32 0.7978846, %v730_v31  ;;  %v764_v13 = vmul.f32 0.7978846, %v732_v7  ;;  %v733_v15 = vadd.f32 %v701_v11, %v1461_v57 }
 0x20b   :  { %v735_v28 = vadd.f32 %v703_v14, %v1464_v58  ;;  %v702_v41 = vmul.f32 %v670_v25, %v1469_v61  ;;  %v704_v42 = vmul.f32 %v672_v26, %v1475_v63  ;;  %v1498_v44 = vadd.f32 %v1420_v19, %v523_v27 }
 0x20c   :  { %1140 = vtanh.f32 %v762_v39  ;;  %v765_v38 = vmul.f32 0.7978846, %v733_v15  ;;  %v1501_v47 = vadd.f32 %v1422_v20, %v525_v29  ;;  %v1504_v48 = vadd.f32 %v1430_v30, %v524_v33 }
 0x20d   :  { %1142 = vtanh.f32 %v764_v13  ;;  %v767_v43 = vmul.f32 0.7978846, %v735_v28  ;;  %v734_v49 = vadd.f32 %v702_v41, %v1469_v61  ;;  %v736_v50 = vadd.f32 %v704_v42, %v1475_v63 }
 0x20e   :  { %1144 = vtanh.f32 %v765_v38  ;;  %v526_v16 = vmul.f32 %v1426_v22, %v466_v37  ;;  %v601_v52 = vmul.f32 0.5, %v1435_v35  ;;  %v603_v53 = vmul.f32 0.5, %v1438_v36 }
 0x20f   :  { %1146 = vtanh.f32 %v767_v43  ;;  %v641_v54 = vmul.f32 0.044715, %v1498_v44  ;;  %v766_v55 = vmul.f32 0.7978846, %v734_v49  ;;  %v768_v56 = vmul.f32 0.7978846, %v736_v50  ;;  %v470_v49 = vpop.f32.mrf.mxu1 }
 0x210   :  { %v643_v23 = vmul.f32 0.044715, %v1501_v47  ;;  %v1514_v59 = vadd.f32 %v1432_v34, %v526_v16  ;;  %v602_v60 = vmul.f32 0.5, %v1445_v45  ;;  %v642_v62 = vmul.f32 0.044715, %v1504_v48 }
 0x211   :  { %v673_v17 = vmul.f32 %v641_v54, %v1498_v44  ;;  %v527_v35 = vmul.f32 %v1416_v6, %v395_v51  ;;  %v604_v36 = vmul.f32 0.5, %v1448_v46  ;;  %1148 = vtanh.f32 %v766_v55 }
 0x212   :  { %v675_v0 = vmul.f32 %v643_v23, %v1501_v47  ;;  %v644_v1 = vmul.f32 0.044715, %v1514_v59  ;;  %1150 = vtanh.f32 %v768_v56  ;;  %v674_v45 = vmul.f32 %v642_v62, %v1504_v48  ;;  %v401_v56 = vpop.f32.mrf.mxu0 }
 0x213   :  { %v705_v3 = vmul.f32 %v673_v17, %v1498_v44  ;;  %v1526_v32 = vadd.f32 %v1420_v19, %v527_v35  ;;  %v605_v4 = vmul.f32 0.5, %v1461_v57  ;;  %v529_v31 = vmul.f32 %v1418_v18, %v468_v24 }
 0x214   :  { %v707_v5 = vmul.f32 %v675_v0, %v1501_v47  ;;  %v676_v46 = vmul.f32 %v644_v1, %v1514_v59  ;;  %v706_v9 = vmul.f32 %v674_v45, %v1504_v48  ;;  %v528_v11 = vmul.f32 %v1424_v21, %v397_v2  ;;  %v474_v1 = vpop.f32.mrf.mxu1 }
 0x215   :  { %v737_v8 = vadd.f32 %v705_v3, %v1498_v44  ;;  %v645_v10 = vmul.f32 0.044715, %v1526_v32  ;;  %v1539_v13 = vadd.f32 %v1422_v20, %v529_v31  ;;  %v607_v29 = vmul.f32 0.5, %v1464_v58 }
 0x216   :  { %v1137_v7 = vpop.eup %1136  ;;  %v739_v39 = vadd.f32 %v707_v5, %v1501_v47  ;;  %v708_v57 = vmul.f32 %v676_v46, %v1514_v59  ;;  %v738_v25 = vadd.f32 %v706_v9, %v1504_v48  ;;  %v1548_v58 = vadd.f32 %v1430_v30, %v528_v11 }
 0x217   :  { %v1139_v40 = vpop.eup %1138  ;;  %v825_v12 = vadd.f32 1.0, %v1137_v7  ;;  %v769_v15 = vmul.f32 0.7978846, %v737_v8  ;;  %v677_v26 = vmul.f32 %v645_v10, %v1526_v32  ;;  %v606_v24 = vmul.f32 0.5, %v1469_v61  ;;  %v403_v7 = vpop.f32.mrf.mxu0 }
 0x218   :  { %v827_v14 = vadd.f32 1.0, %v1139_v40  ;;  %v771_v33 = vmul.f32 0.7978846, %v739_v39  ;;  %v740_v37 = vadd.f32 %v708_v57, %v1514_v59  ;;  %v770_v43 = vmul.f32 0.7978846, %v738_v25 }
 0x219   :  { %v1141_v27 = vpop.eup %1140  ;;  %v857_v28 = vmul.f32 %v825_v12, %v601_v52  ;;  %1152 = vtanh.f32 %v769_v15  ;;  %v709_v51 = vmul.f32 %v677_v26, %v1526_v32  ;;  %v647_v52 = vmul.f32 0.044715, %v1539_v13 }
 0x21a   :  { %v1143_v38 = vpop.eup %1142  ;;  %v859_v41 = vmul.f32 %v827_v14, %v603_v53  ;;  %v826_v42 = vadd.f32 1.0, %v1141_v27  ;;  %1154 = vtanh.f32 %v771_v33  ;;  %v772_v16 = vmul.f32 0.7978846, %v740_v37 }
 0x21b   :  { %v828_v50 = vadd.f32 1.0, %v1143_v38  ;;  %v1145_v54 = vpop.eup %1144  ;;  %1156 = vtanh.f32 %v770_v43  ;;  %v741_v62 = vadd.f32 %v709_v51, %v1526_v32  ;;  %v608_v0 = vmul.f32 0.5, %v1475_v63  ;;  %v476_v43 = vpop.f32.mrf.mxu1 }
 0x21c   :  { %v858_v55 = vmul.f32 %v826_v42, %v602_v60  ;;  %v1147_v23 = vpop.eup %1146  ;;  %v829_v17 = vadd.f32 1.0, %v1145_v54  ;;  %1158 = vtanh.f32 %v772_v16  ;;  %v679_v60 = vmul.f32 %v647_v52, %v1539_v13 }
 0x21d   :  { %v860_v53 = vmul.f32 %v828_v50, %v604_v36  ;;  %v831_v3 = vadd.f32 1.0, %v1147_v23  ;;  %v773_v45 = vmul.f32 0.7978846, %v741_v62  ;;  %v646_v5 = vmul.f32 0.044715, %v1548_v58 }
 0x21e   :  { %v1055_v35 = vpack.c.bf16 %v858_v55, %v857_v28  ;;  %v1149_v46 = vpop.eup %1148  ;;  %v861_v36 = vmul.f32 %v829_v17, %v605_v4  ;;  %v711_v31 = vmul.f32 %v679_v60, %v1539_v13  ;;  %v530_v61 = vmul.f32 %v1426_v22, %v470_v49  ;;  %v405_v49 = vpop.f32.mrf.mxu0 }
 0x21f   :  { %v1056_v2 = vpack.c.bf16 %v860_v53, %v859_v41  ;;  %v531_v63 = vmul.f32 %v1416_v6, %v401_v56  ;;  %v1151_v8 = vpop.eup %1150  ;;  %v830_v9 = vadd.f32 1.0, %v1149_v46  ;;  %1160 = vtanh.f32 %v773_v45 }
 0x220   :  { %985 = vst [vmem:[%s1774_s6] sm:$0xff] %v1055_v35  ;;  %v678_v10 = vmul.f32 %v646_v5, %v1548_v58  ;;  %v533_v11 = vmul.f32 %v1418_v18, %v474_v1  ;;  %v832_v40 = vadd.f32 1.0, %v1151_v8  ;;  %v743_v4 = vadd.f32 %v711_v31, %v1539_v13 }
 0x221   :  { %986 = vst [vmem:[%s1774_s6 + $0x8] sm:$0xff] %v1056_v2  ;;  %v1568_v12 = vadd.f32 %v1432_v34, %v530_v61  ;;  %v1571_v39 = vadd.f32 %v1420_v19, %v531_v63  ;;  %v862_v57 = vmul.f32 %v830_v9, %v606_v24  ;;  %v532_v25 = vmul.f32 %v1424_v21, %v403_v7  ;;  %v478_v61 = vpop.f32.mrf.mxu1 }
 0x222   :  { %v710_v14 = vmul.f32 %v678_v10, %v1548_v58  ;;  %v1575_v15 = vadd.f32 %v1422_v20, %v533_v11  ;;  %v863_v26 = vmul.f32 %v831_v3, %v607_v29  ;;  %v864_v27 = vmul.f32 %v832_v40, %v608_v0  ;;  %v407_v40 = vpop.f32.mrf.mxu0 }
 0x223   :  { %v775_v28 = vmul.f32 0.7978846, %v743_v4  ;;  %v648_v33 = vmul.f32 0.044715, %v1568_v12  ;;  %v1057_v37 = vpack.c.bf16 %v862_v57, %v861_v36  ;;  %v609_v38 = vmul.f32 0.5, %v1498_v44 }
 0x224   :  { %v742_v41 = vadd.f32 %v710_v14, %v1548_v58  ;;  %v649_v42 = vmul.f32 0.044715, %v1571_v39  ;;  %v1058_v50 = vpack.c.bf16 %v864_v27, %v863_v26  ;;  %v611_v16 = vmul.f32 0.5, %v1501_v47  ;;  %v480_v27 = vpop.f32.mrf.mxu1 }
 0x225   :  { %1162 = vtanh.f32 %v775_v28  ;;  %v680_v51 = vmul.f32 %v648_v33, %v1568_v12  ;;  %987 = vst [vmem:[%s1774_s6 + $0x10] sm:$0xff] %v1057_v37  ;;  %v651_v55 = vmul.f32 0.044715, %v1575_v15  ;;  %v1590_v52 = vadd.f32 %v1430_v30, %v532_v25 }
 0x226   :  { %v1153_v29 = vpop.eup %1152  ;;  %v774_v54 = vmul.f32 0.7978846, %v742_v41  ;;  %v681_v44 = vmul.f32 %v649_v42, %v1571_v39  ;;  %988 = vst [vmem:[%s1774_s6 + $0x18] sm:$0xff] %v1058_v50  ;;  %v534_v53 = vmul.f32 %v1426_v22, %v476_v43  ;;  %v535_v17 = vmul.f32 %v1416_v6, %v405_v49  ;;  %v411_v50 = vpop.f32.mrf.mxu0 }
 0x227   :  { %v1155_v56 = vpop.eup %1154  ;;  %v833_v47 = vadd.f32 1.0, %v1153_v29  ;;  %v712_v23 = vmul.f32 %v680_v51, %v1568_v12  ;;  %v683_v0 = vmul.f32 %v651_v55, %v1575_v15  ;;  %v610_v1 = vmul.f32 0.5, %v1504_v48 }
 0x228   :  { %v1157_v62 = vpop.eup %1156  ;;  %v835_v35 = vadd.f32 1.0, %v1155_v56  ;;  %1164 = vtanh.f32 %v774_v54  ;;  %v713_v24 = vmul.f32 %v681_v44, %v1571_v39  ;;  %v612_v3 = vmul.f32 0.5, %v1514_v59  ;;  %v484_v56 = vpop.f32.mrf.mxu1 }
 0x229   :  { %v1159_v60 = vpop.eup %1158  ;;  %v834_v2 = vadd.f32 1.0, %v1157_v62  ;;  %v744_v45 = vadd.f32 %v712_v23, %v1568_v12  ;;  %v865_v5 = vmul.f32 %v833_v47, %v609_v38  ;;  %v715_v31 = vmul.f32 %v683_v0, %v1575_v15 }
 0x22a   :  { %v836_v46 = vadd.f32 1.0, %v1159_v60  ;;  %v745_v36 = vadd.f32 %v713_v24, %v1571_v39  ;;  %v650_v8 = vmul.f32 0.044715, %v1590_v52  ;;  %v1607_v9 = vadd.f32 %v1432_v34, %v534_v53 }
 0x22b   :  { %v866_v63 = vmul.f32 %v834_v2, %v610_v1  ;;  %v776_v7 = vmul.f32 0.7978846, %v744_v45  ;;  %v867_v48 = vmul.f32 %v835_v35, %v611_v16  ;;  %v747_v59 = vadd.f32 %v715_v31, %v1575_v15 }
 0x22c   :  { %v868_v10 = vmul.f32 %v836_v46, %v612_v3  ;;  %v1611_v11 = vadd.f32 %v1420_v19, %v535_v17  ;;  %v1161_v4 = vpop.eup %1160  ;;  %v777_v14 = vmul.f32 0.7978846, %v745_v36  ;;  %v682_v25 = vmul.f32 %v650_v8, %v1590_v52 }
 0x22d   :  { %v1059_v57 = vpack.c.bf16 %v866_v63, %v865_v5  ;;  %1166 = vtanh.f32 %v776_v7  ;;  %v613_v28 = vmul.f32 0.5, %v1526_v32  ;;  %v652_v37 = vmul.f32 0.044715, %v1607_v9 }
 0x22e   :  { %v1060_v26 = vpack.c.bf16 %v868_v10, %v867_v48  ;;  %v714_v33 = vmul.f32 %v682_v25, %v1590_v52  ;;  %v653_v38 = vmul.f32 0.044715, %v1611_v11  ;;  %v615_v41 = vmul.f32 0.5, %v1539_v13 }
 0x22f   :  { %989 = vst [vmem:[%s1774_s6 + $0x20] sm:$0xff] %v1059_v57  ;;  %v779_v42 = vmul.f32 0.7978846, %v747_v59  ;;  %v537_v43 = vmul.f32 %v1418_v18, %v478_v61  ;;  %v536_v49 = vmul.f32 %v1424_v21, %v407_v40  ;;  %1168 = vtanh.f32 %v777_v14 }
 0x230   :  { %990 = vst [vmem:[%s1774_s6 + $0x28] sm:$0xff] %v1060_v26  ;;  %v746_v32 = vadd.f32 %v714_v33, %v1590_v52  ;;  %v684_v16 = vmul.f32 %v652_v37, %v1607_v9  ;;  %v685_v51 = vmul.f32 %v653_v38, %v1611_v11  ;;  %v837_v54 = vadd.f32 1.0, %v1161_v4  ;;  %v413_v4 = vpop.f32.mrf.mxu0  ;;  %v486_v38 = vpop.f32.mrf.mxu1 }
 0x231   :  { %v1631_v44 = vadd.f32 %v1422_v20, %v537_v43  ;;  %v1634_v13 = vadd.f32 %v1430_v30, %v536_v49  ;;  %v538_v55 = vmul.f32 %v1426_v22, %v480_v27  ;;  %v539_v17 = vmul.f32 %v1416_v6, %v411_v50 }
 0x232   :  { %v1163_v29 = vpop.eup %1162  ;;  %v778_v47 = vmul.f32 0.7978846, %v746_v32  ;;  %v716_v23 = vmul.f32 %v684_v16, %v1607_v9  ;;  %v717_v53 = vmul.f32 %v685_v51, %v1611_v11  ;;  %v614_v62 = vmul.f32 0.5, %v1548_v58 }
 0x233   :  { %1170 = vtanh.f32 %v779_v42  ;;  %v655_v35 = vmul.f32 0.044715, %v1631_v44  ;;  %v654_v24 = vmul.f32 0.044715, %v1634_v13  ;;  %v541_v2 = vmul.f32 %v1418_v18, %v484_v56  ;;  %v415_v56 = vpop.f32.mrf.mxu0 }
 0x234   :  { %1172 = vtanh.f32 %v778_v47  ;;  %v748_v60 = vadd.f32 %v716_v23, %v1607_v9  ;;  %v749_v1 = vadd.f32 %v717_v53, %v1611_v11  ;;  %v1649_v58 = vadd.f32 %v1432_v34, %v538_v55 }
 0x235   :  { %v1165_v0 = vpop.eup %1164  ;;  %v687_v45 = vmul.f32 %v655_v35, %v1631_v44  ;;  %v686_v5 = vmul.f32 %v654_v24, %v1634_v13  ;;  %v869_v46 = vmul.f32 %v837_v54, %v613_v28  ;;  %v1652_v61 = vadd.f32 %v1420_v19, %v539_v17  ;;  %v488_v17 = vpop.f32.mrf.mxu1 }
 0x236   :  { %v838_v3 = vadd.f32 1.0, %v1165_v0  ;;  %v780_v36 = vmul.f32 0.7978846, %v748_v60  ;;  %v781_v31 = vmul.f32 0.7978846, %v749_v1  ;;  %v839_v63 = vadd.f32 1.0, %v1163_v29 }
 0x237   :  { %v719_v8 = vmul.f32 %v687_v45, %v1631_v44  ;;  %v718_v48 = vmul.f32 %v686_v5, %v1634_v13  ;;  %v656_v10 = vmul.f32 0.044715, %v1649_v58  ;;  %v657_v59 = vmul.f32 0.044715, %v1652_v61 }
 0x238   :  { %v870_v7 = vmul.f32 %v838_v3, %v614_v62  ;;  %1174 = vtanh.f32 %v780_v36  ;;  %v1659_v40 = vadd.f32 %v1422_v20, %v541_v2  ;;  %v616_v27 = vmul.f32 0.5, %v1568_v12 }
 0x239   :  { %1176 = vtanh.f32 %v781_v31  ;;  %v751_v25 = vadd.f32 %v719_v8, %v1631_v44  ;;  %v750_v26 = vadd.f32 %v718_v48, %v1634_v13  ;;  %v688_v33 = vmul.f32 %v656_v10, %v1649_v58 }
 0x23a   :  { %v1167_v57 = vpop.eup %1166  ;;  %v1061_v14 = vpack.c.bf16 %v870_v7, %v869_v46  ;;  %v689_v37 = vmul.f32 %v657_v59, %v1652_v61  ;;  %v871_v42 = vmul.f32 %v839_v63, %v615_v41  ;;  %v540_v50 = vmul.f32 %v1424_v21, %v413_v4  ;;  %v417_v46 = vpop.f32.mrf.mxu0 }
 0x23b   :  { %v840_v28 = vadd.f32 1.0, %v1167_v57  ;;  %v783_v43 = vmul.f32 0.7978846, %v751_v25  ;;  %v782_v49 = vmul.f32 0.7978846, %v750_v26  ;;  %v720_v16 = vmul.f32 %v688_v33, %v1649_v58 }
 0x23c   :  { %991 = vst [vmem:[%s1774_s6 + $0x30] sm:$0xff] %v1061_v14  ;;  %v721_v12 = vmul.f32 %v689_v37, %v1652_v61  ;;  %v659_v51 = vmul.f32 0.044715, %v1659_v40  ;;  %v1169_v29 = vpop.eup %1168  ;;  %v617_v54 = vmul.f32 0.5, %v1571_v39  ;;  %v619_v41 = vmul.f32 0.5, %v1575_v15  ;;  %v490_v37 = vpop.f32.mrf.mxu1 }
 0x23d   :  { %v872_v32 = vmul.f32 %v840_v28, %v616_v27  ;;  %1178 = vtanh.f32 %v783_v43  ;;  %v1676_v55 = vadd.f32 %v1430_v30, %v540_v50  ;;  %v752_v23 = vadd.f32 %v720_v16, %v1649_v58 }
 0x23e   :  { %1180 = vtanh.f32 %v782_v49  ;;  %v753_v53 = vadd.f32 %v721_v12, %v1652_v61  ;;  %v618_v62 = vmul.f32 0.5, %v1590_v52  ;;  %v620_v35 = vmul.f32 0.5, %v1607_v9 }
 0x23f   :  { %v1062_v47 = vpack.c.bf16 %v872_v32, %v871_v42  ;;  %v691_v39 = vmul.f32 %v659_v51, %v1659_v40  ;;  %v658_v15 = vmul.f32 0.044715, %v1676_v55  ;;  %v841_v0 = vadd.f32 1.0, %v1169_v29 }
 0x240   :  { %v1171_v24 = vpop.eup %1170  ;;  %v784_v60 = vmul.f32 0.7978846, %v752_v23  ;;  %v542_v1 = vmul.f32 %v1426_v22, %v486_v38  ;;  %v543_v2 = vmul.f32 %v1416_v6, %v415_v56  ;;  %v785_v45 = vmul.f32 0.7978846, %v753_v53 }
 0x241   :  { %992 = vst [vmem:[%s1774_s6 + $0x38] sm:$0xff] %v1062_v47  ;;  %v1173_v3 = vpop.eup %1172  ;;  %v723_v52 = vmul.f32 %v691_v39, %v1659_v40  ;;  %v690_v9 = vmul.f32 %v658_v15, %v1676_v55  ;;  %v545_v5 = vmul.f32 %v1418_v18, %v488_v17  ;;  %v843_v7 = vadd.f32 1.0, %v1171_v24 }
 0x242   :  { %v842_v36 = vadd.f32 1.0, %v1173_v3  ;;  %1182 = vtanh.f32 %v784_v60  ;;  %v1693_v31 = vadd.f32 %v1432_v34, %v542_v1  ;;  %v1696_v63 = vadd.f32 %v1420_v19, %v543_v2 }
 0x243   :  { %v755_v6 = vadd.f32 %v723_v52, %v1659_v40  ;;  %v722_v8 = vmul.f32 %v690_v9, %v1676_v55  ;;  %v1701_v48 = vadd.f32 %v1422_v20, %v545_v5  ;;  %v873_v10 = vmul.f32 %v841_v0, %v617_v54 }
 0x244   :  { %v874_v59 = vmul.f32 %v842_v36, %v618_v62  ;;  %v660_v18 = vmul.f32 0.044715, %v1693_v31  ;;  %v544_v4 = vmul.f32 %v1424_v21, %v417_v46  ;;  %1184 = vtanh.f32 %v785_v45 }
 0x245   :  { %v1175_v57 = vpop.eup %1174  ;;  %v787_v14 = vmul.f32 0.7978846, %v755_v6  ;;  %v754_v19 = vadd.f32 %v722_v8, %v1676_v55  ;;  %v661_v25 = vmul.f32 0.044715, %v1696_v63  ;;  %v663_v20 = vmul.f32 0.044715, %v1701_v48 }
 0x246   :  { %v1177_v26 = vpop.eup %1176  ;;  %v1063_v27 = vpack.c.bf16 %v874_v59, %v873_v10  ;;  %v844_v28 = vadd.f32 1.0, %v1175_v57  ;;  %v692_v33 = vmul.f32 %v660_v18, %v1693_v31  ;;  %v875_v38 = vmul.f32 %v843_v7, %v619_v41 }
 0x247   :  { %v786_v42 = vmul.f32 0.7978846, %v754_v19  ;;  %v693_v43 = vmul.f32 %v661_v25, %v1696_v63  ;;  %v695_v50 = vmul.f32 %v663_v20, %v1701_v48  ;;  %v1716_v32 = vadd.f32 %v1430_v30, %v544_v4 }
 0x248   :  { %993 = vst [vmem:[%s1774_s6 + $0x40] sm:$0xff] %v1063_v27  ;;  %v876_v21 = vmul.f32 %v844_v28, %v620_v35  ;;  %v724_v49 = vmul.f32 %v692_v33, %v1693_v31  ;;  %v845_v16 = vadd.f32 1.0, %v1177_v26  ;;  %v546_v51 = vmul.f32 %v1426_v22, %v490_v37 }
 0x249   :  { %1186 = vtanh.f32 %v786_v42  ;;  %v725_v12 = vmul.f32 %v693_v43, %v1696_v63  ;;  %v727_v56 = vmul.f32 %v695_v50, %v1701_v48  ;;  %v621_v23 = vmul.f32 0.5, %v1611_v11 }
 0x24a   :  { %v1179_v29 = vpop.eup %1178  ;;  %v1064_v54 = vpack.c.bf16 %v876_v21, %v875_v38  ;;  %1188 = vtanh.f32 %v787_v14  ;;  %v756_v41 = vadd.f32 %v724_v49, %v1693_v31  ;;  %v662_v30 = vmul.f32 0.044715, %v1716_v32 }
 0x24b   :  { %v1181_v47 = vpop.eup %1180  ;;  %v757_v53 = vadd.f32 %v725_v12, %v1696_v63  ;;  %v1726_v17 = vadd.f32 %v1432_v34, %v546_v51  ;;  %v622_v22 = vmul.f32 0.5, %v1634_v13  ;;  %v759_v39 = vadd.f32 %v727_v56, %v1701_v48 }
 0x24c   :  { %994 = vst [vmem:[%s1774_s6 + $0x48] sm:$0xff] %v1064_v54  ;;  %v846_v62 = vadd.f32 1.0, %v1181_v47  ;;  %v788_v35 = vmul.f32 0.7978846, %v756_v41  ;;  %v877_v15 = vmul.f32 %v845_v16, %v621_v23  ;;  %v694_v11 = vmul.f32 %v662_v30, %v1716_v32 }
 0x24d   :  { %v789_v24 = vmul.f32 0.7978846, %v757_v53  ;;  %v847_v0 = vadd.f32 1.0, %v1179_v29  ;;  %v664_v34 = vmul.f32 0.044715, %v1726_v17  ;;  %v623_v2 = vmul.f32 0.5, %v1631_v44 }
 0x24e   :  { %v878_v60 = vmul.f32 %v846_v62, %v622_v22  ;;  %1190 = vtanh.f32 %v788_v35  ;;  %v624_v3 = vmul.f32 0.5, %v1649_v58  ;;  %v726_v13 = vmul.f32 %v694_v11, %v1716_v32 }
 0x24f   :  { %v1183_v1 = vpop.eup %1182  ;;  %v791_v9 = vmul.f32 0.7978846, %v759_v39  ;;  %v696_v5 = vmul.f32 %v664_v34, %v1726_v17  ;;  %1192 = vtanh.f32 %v789_v24  ;;  %v879_v7 = vmul.f32 %v847_v0, %v623_v2 }
 0x250   :  { %v1065_v45 = vpack.c.bf16 %v878_v60, %v877_v15  ;;  %v848_v52 = vadd.f32 1.0, %v1183_v1  ;;  %v758_v46 = vadd.f32 %v726_v13, %v1716_v32  ;;  %v625_v14 = vmul.f32 0.5, %v1652_v61 }
 0x251   :  { %v1185_v36 = vpop.eup %1184  ;;  %v728_v44 = vmul.f32 %v696_v5, %v1726_v17  ;;  %1194 = vtanh.f32 %v791_v9  ;;  %v626_v19 = vmul.f32 0.5, %v1676_v55  ;;  %v627_v37 = vmul.f32 0.5, %v1659_v40 }
 0x252   :  { %995 = vst [vmem:[%s1774_s6 + $0x50] sm:$0xff] %v1065_v45  ;;  %v880_v6 = vmul.f32 %v848_v52, %v624_v3  ;;  %v790_v58 = vmul.f32 0.7978846, %v758_v46  ;;  %v849_v59 = vadd.f32 1.0, %v1185_v36  ;;  %v628_v38 = vmul.f32 0.5, %v1693_v31 }
 0x253   :  { %v760_v10 = vadd.f32 %v728_v44, %v1726_v17  ;;  %v629_v40 = vmul.f32 0.5, %v1696_v63  ;;  %v630_v31 = vmul.f32 0.5, %v1716_v32  ;;  %v631_v56 = vmul.f32 0.5, %v1701_v48 }
 0x254   :  { %v1066_v8 = vpack.c.bf16 %v880_v6, %v879_v7  ;;  %1196 = vtanh.f32 %v790_v58  ;;  %v881_v26 = vmul.f32 %v849_v59, %v625_v14  ;;  %v632_v47 = vmul.f32 0.5, %v1726_v17 }
 0x255   :  { %v792_v4 = vmul.f32 0.7978846, %v760_v10 }
 0x256   :  { %v1187_v18 = vpop.eup %1186  ;;  %996 = vst [vmem:[%s1774_s6 + $0x58] sm:$0xff] %v1066_v8 }
 0x257   :  { %v1189_v57 = vpop.eup %1188  ;;  %v850_v25 = vadd.f32 1.0, %v1187_v18  ;;  %1198 = vtanh.f32 %v792_v4 }
 0x258   :  { %v851_v28 = vadd.f32 1.0, %v1189_v57 }
 0x259   :  { %v882_v27 = vmul.f32 %v850_v25, %v626_v19 }
 0x25a   :  { %v883_v61 = vmul.f32 %v851_v28, %v627_v37 }
 0x25b   :  { %v1191_v33 = vpop.eup %1190  ;;  %v1067_v20 = vpack.c.bf16 %v882_v27, %v881_v26 }
 0x25c   :  { %v852_v42 = vadd.f32 1.0, %v1191_v33  ;;  %v1193_v43 = vpop.eup %1192 }
 0x25d   :  { %997 = vst [vmem:[%s1774_s6 + $0x60] sm:$0xff] %v1067_v20  ;;  %v853_v50 = vadd.f32 1.0, %v1193_v43 }
 0x25e   :  { %v884_v21 = vmul.f32 %v852_v42, %v628_v38  ;;  %v1195_v49 = vpop.eup %1194 }
 0x25f   :  { %v855_v51 = vadd.f32 1.0, %v1195_v49  ;;  %v885_v54 = vmul.f32 %v853_v50, %v629_v40 }
 0x260   :  { %v1068_v55 = vpack.c.bf16 %v884_v21, %v883_v61 }
 0x261   :  { %v1197_v16 = vpop.eup %1196  ;;  %v887_v30 = vmul.f32 %v855_v51, %v631_v56 }
 0x262   :  { %998 = vst [vmem:[%s1774_s6 + $0x68] sm:$0xff] %v1068_v55  ;;  %v854_v12 = vadd.f32 1.0, %v1197_v16 }
 0x264   :  { %v1199_v29 = vpop.eup %1198  ;;  %v886_v41 = vmul.f32 %v854_v12, %v630_v31 }
 0x265   :  { %v856_v23 = vadd.f32 1.0, %v1199_v29 }
 0x266   :  { %v1069_v53 = vpack.c.bf16 %v886_v41, %v885_v54 }
 0x267   :  { %v888_v22 = vmul.f32 %v856_v23, %v632_v47 }
 0x268   :  { %999 = vst [vmem:[%s1774_s6 + $0x70] sm:$0xff] %v1069_v53 }
 0x269   :  { %v1070_v63 = vpack.c.bf16 %v888_v22, %v887_v30 }
 0x26b   :  { %1000 = vst [vmem:[%s1774_s6 + $0x78] sm:$0xff] %v1070_v63 }

// kernel: vit_encoder_forward.25
= control target key start
LH: loop header
LB: loop body
LE: loop exit
PB: predicated region body
PF: predicated region fallthrough
CT: control target
= control target key end

     0   :  { %s285_s0 = inlined_call_operand.vmem [shape: f32[64,128], index: 0, kind: input, shape index: {}]   ;;  %s286_s1 = inlined_call_operand.vmem [shape: f32[1,128], index: 1, kind: input, shape index: {}]   ;;  %s287_s2 = inlined_call_operand.vmem [shape: f32[1,128], index: 2, kind: input, shape index: {}]   ;;  %s288_s3 = inlined_call_operand.vmem [shape: f32[64,128], index: 3, kind: output, shape index: {}]  }
   0x1   :  { %v14_v0 = vld [vmem:[%s285_s0] sm:$0xff]  ;;  %v16_v1 = vld [vmem:[%s285_s0 + $0x10] sm:$0xff]  ;;  %v15_v2 = vld [vmem:[%s285_s0 + $0x8] sm:$0xff] }
   0x2   :  { %22 = vadd.xlane.f32.xlu0 %v14_v0  ;;  %26 = vadd.xlane.f32.xlu1 %v16_v1  ;;  %v17_v3 = vld [vmem:[%s285_s0 + $0x18] sm:$0xff]  ;;  %v18_v4 = vld [vmem:[%s285_s0 + $0x20] sm:$0xff]  ;;  %v19_v5 = vld [vmem:[%s285_s0 + $0x28] sm:$0xff] }
   0x3   :  { %v20_v6 = vld [vmem:[%s285_s0 + $0x30] sm:$0xff]  ;;  %v21_v7 = vld [vmem:[%s285_s0 + $0x38] sm:$0xff] }
   0x6   :  { %24 = vadd.xlane.f32.xlu0 %v15_v2  ;;  %28 = vadd.xlane.f32.xlu1 %v17_v3 }
   0xa   :  { %30 = vadd.xlane.f32.xlu0 %v18_v4  ;;  %32 = vadd.xlane.f32.xlu1 %v19_v5 }
   0xe   :  { %34 = vadd.xlane.f32.xlu0 %v20_v6  ;;  %36 = vadd.xlane.f32.xlu1 %v21_v7 }
  0x8b   :  { %v23_v8 = vpop.xlane.xlu0 %22  ;;  %v27_v9 = vpop.xlane.xlu1 %26 }
  0x8c   :  { %v39_v10 = vmul.f32 0.0078125, %v23_v8  ;;  %v41_v11 = vmul.f32 0.0078125, %v27_v9 }
  0x8e   :  { %v215_v12 = vsub.f32 %v14_v0, %v39_v10  ;;  %v217_v13 = vsub.f32 %v16_v1, %v41_v11  ;;  %v153_v0 = vld [vmem:[%s286_s1] ss:$0 sm:$0xff] }
  0x8f   :  { %v25_v14 = vpop.xlane.xlu0 %24  ;;  %v29_v15 = vpop.xlane.xlu1 %28 }
  0x90   :  { %v40_v16 = vmul.f32 0.0078125, %v25_v14  ;;  %v55_v17 = vmul.f32 %v215_v12, %v215_v12  ;;  %v42_v18 = vmul.f32 0.0078125, %v29_v15  ;;  %v57_v21 = vmul.f32 %v217_v13, %v217_v13 }
  0x92   :  { %v221_v19 = vsub.f32 %v15_v2, %v40_v16  ;;  %63 = vadd.xlane.f32.xlu0 %v55_v17  ;;  %v223_v20 = vsub.f32 %v17_v3, %v42_v18  ;;  %v154_v3 = vld [vmem:[%s287_s2] ss:$0 sm:$0xff] }
  0x93   :  { %v31_v22 = vpop.xlane.xlu0 %30  ;;  %v33_v23 = vpop.xlane.xlu1 %32 }
  0x94   :  { %v43_v24 = vmul.f32 0.0078125, %v31_v22  ;;  %v56_v25 = vmul.f32 %v221_v19, %v221_v19  ;;  %v44_v26 = vmul.f32 0.0078125, %v33_v23  ;;  %v58_v29 = vmul.f32 %v223_v20, %v223_v20 }
  0x96   :  { %v229_v27 = vsub.f32 %v18_v4, %v43_v24  ;;  %67 = vadd.xlane.f32.xlu0 %v57_v21  ;;  %65 = vadd.xlane.f32.xlu1 %v56_v25  ;;  %v231_v28 = vsub.f32 %v19_v5, %v44_v26 }
  0x97   :  { %v35_v30 = vpop.xlane.xlu0 %34  ;;  %v37_v31 = vpop.xlane.xlu1 %36 }
  0x98   :  { %v45_v32 = vmul.f32 0.0078125, %v35_v30  ;;  %v59_v33 = vmul.f32 %v229_v27, %v229_v27  ;;  %v46_v34 = vmul.f32 0.0078125, %v37_v31  ;;  %v60_v37 = vmul.f32 %v231_v28, %v231_v28 }
  0x9a   :  { %v237_v35 = vsub.f32 %v20_v6, %v45_v32  ;;  %69 = vadd.xlane.f32.xlu1 %v58_v29  ;;  %71 = vadd.xlane.f32.xlu0 %v59_v33  ;;  %v239_v36 = vsub.f32 %v21_v7, %v46_v34 }
  0x9c   :  { %v61_v38 = vmul.f32 %v237_v35, %v237_v35  ;;  %v62_v39 = vmul.f32 %v239_v36, %v239_v36 }
  0x9e   :  { %73 = vadd.xlane.f32.xlu1 %v60_v37  ;;  %75 = vadd.xlane.f32.xlu0 %v61_v38 }
  0xa2   :  { %77 = vadd.xlane.f32.xlu1 %v62_v39 }
 0x11b   :  { %v64_v40 = vpop.xlane.xlu0 %63 }
 0x11c   :  { %v79_v41 = vmul.f32 0.0078125, %v64_v40 }
 0x11e   :  { %v87_v42 = vadd.f32 1e-06, %v79_v41 }
 0x11f   :  { %v66_v43 = vpop.xlane.xlu1 %65  ;;  %v68_v44 = vpop.xlane.xlu0 %67 }
 0x120   :  { %155 = vrsqrt.f32 %v87_v42  ;;  %v80_v45 = vmul.f32 0.0078125, %v66_v43  ;;  %v81_v46 = vmul.f32 0.0078125, %v68_v44 }
 0x122   :  { %v88_v47 = vadd.f32 1e-06, %v80_v45  ;;  %v89_v48 = vadd.f32 1e-06, %v81_v46 }
 0x123   :  { %v70_v49 = vpop.xlane.xlu1 %69  ;;  %v72_v50 = vpop.xlane.xlu0 %71 }
 0x124   :  { %157 = vrsqrt.f32 %v88_v47  ;;  %v82_v51 = vmul.f32 0.0078125, %v70_v49  ;;  %v83_v52 = vmul.f32 0.0078125, %v72_v50 }
 0x125   :  { %159 = vrsqrt.f32 %v89_v48 }
 0x126   :  { %v90_v53 = vadd.f32 1e-06, %v82_v51  ;;  %v91_v54 = vadd.f32 1e-06, %v83_v52 }
 0x127   :  { %v74_v55 = vpop.xlane.xlu1 %73  ;;  %v76_v56 = vpop.xlane.xlu0 %75 }
 0x128   :  { %161 = vrsqrt.f32 %v90_v53  ;;  %v84_v57 = vmul.f32 0.0078125, %v74_v55  ;;  %v85_v58 = vmul.f32 0.0078125, %v76_v56 }
 0x129   :  { %163 = vrsqrt.f32 %v91_v54 }
 0x12a   :  { %v92_v59 = vadd.f32 1e-06, %v84_v57  ;;  %v93_v60 = vadd.f32 1e-06, %v85_v58 }
 0x12b   :  { %v78_v61 = vpop.xlane.xlu1 %77 }
 0x12c   :  { %165 = vrsqrt.f32 %v92_v59  ;;  %v86_v62 = vmul.f32 0.0078125, %v78_v61 }
 0x12d   :  { %v156_v63 = vpop.eup %155  ;;  %167 = vrsqrt.f32 %v93_v60 }
 0x12e   :  { %v103_v1 = vmul.f32 %v156_v63, %v215_v12  ;;  %v94_v2 = vadd.f32 1e-06, %v86_v62 }
 0x130   :  { %v118_v4 = vmul.f32 %v153_v0, %v103_v1  ;;  %169 = vrsqrt.f32 %v94_v2 }
 0x131   :  { %v158_v5 = vpop.eup %157 }
 0x132   :  { %v160_v6 = vpop.eup %159  ;;  %v133_v7 = vadd.f32 %v154_v3, %v118_v4  ;;  %v104_v8 = vmul.f32 %v158_v5, %v221_v19 }
 0x133   :  { %v105_v9 = vmul.f32 %v160_v6, %v217_v13 }
 0x134   :  { %141 = vst [vmem:[%s288_s3] sm:$0xff] %v133_v7  ;;  %v119_v10 = vmul.f32 %v153_v0, %v104_v8 }
 0x135   :  { %v162_v11 = vpop.eup %161  ;;  %v120_v12 = vmul.f32 %v153_v0, %v105_v9 }
 0x136   :  { %v164_v14 = vpop.eup %163  ;;  %v134_v15 = vadd.f32 %v154_v3, %v119_v10  ;;  %v106_v16 = vmul.f32 %v162_v11, %v223_v20 }
 0x137   :  { %v135_v17 = vadd.f32 %v154_v3, %v120_v12  ;;  %v107_v18 = vmul.f32 %v164_v14, %v229_v27 }
 0x138   :  { %142 = vst [vmem:[%s288_s3 + $0x8] sm:$0xff] %v134_v15  ;;  %v121_v19 = vmul.f32 %v153_v0, %v106_v16 }
 0x139   :  { %v166_v13 = vpop.eup %165  ;;  %143 = vst [vmem:[%s288_s3 + $0x10] sm:$0xff] %v135_v17  ;;  %v122_v21 = vmul.f32 %v153_v0, %v107_v18 }
 0x13a   :  { %v168_v22 = vpop.eup %167  ;;  %v136_v23 = vadd.f32 %v154_v3, %v121_v19  ;;  %v108_v24 = vmul.f32 %v166_v13, %v231_v28 }
 0x13b   :  { %v137_v25 = vadd.f32 %v154_v3, %v122_v21  ;;  %v109_v20 = vmul.f32 %v168_v22, %v237_v35 }
 0x13c   :  { %144 = vst [vmem:[%s288_s3 + $0x18] sm:$0xff] %v136_v23  ;;  %v123_v26 = vmul.f32 %v153_v0, %v108_v24 }
 0x13d   :  { %v170_v27 = vpop.eup %169  ;;  %145 = vst [vmem:[%s288_s3 + $0x20] sm:$0xff] %v137_v25  ;;  %v124_v29 = vmul.f32 %v153_v0, %v109_v20 }
 0x13e   :  { %v138_v30 = vadd.f32 %v154_v3, %v123_v26  ;;  %v110_v31 = vmul.f32 %v170_v27, %v239_v36 }
 0x13f   :  { %v139_v32 = vadd.f32 %v154_v3, %v124_v29 }
 0x140   :  { %146 = vst [vmem:[%s288_s3 + $0x28] sm:$0xff] %v138_v30  ;;  %v125_v28 = vmul.f32 %v153_v0, %v110_v31 }
 0x141   :  { %147 = vst [vmem:[%s288_s3 + $0x30] sm:$0xff] %v139_v32 }
 0x142   :  { %v140_v33 = vadd.f32 %v154_v3, %v125_v28 }
 0x144   :  { %148 = vst [vmem:[%s288_s3 + $0x38] sm:$0xff] %v140_v33 }

// kernel: vit_encoder_forward.19
= control target key start
LH: loop header
LB: loop body
LE: loop exit
PB: predicated region body
PF: predicated region fallthrough
CT: control target
= control target key end

     0   :  { %s995_s1 = inlined_call_operand.vmem [shape: bf16[512,128], index: 1, kind: input, shape index: {}]   ;;  %s996_s0 = inlined_call_operand.vmem [shape: bf16[64,512], index: 0, kind: input, shape index: {}]   ;;  %s997_s2 = inlined_call_operand.vmem [shape: f32[1,128], index: 2, kind: input, shape index: {}]   ;;  %s998_s3 = inlined_call_operand.vmem [shape: f32[1,128], index: 3, kind: input, shape index: {}]   ;;  %s999_s4 = inlined_call_operand.vmem [shape: f32[64,128], index: 4, kind: input, shape index: {}]   ;;  %s1000_s5 = inlined_call_operand.vmem [shape: f32[64,128], index: 5, kind: output, shape index: {}]  }
   0x1   :  { %v691_v0 = vld [vmem:[%s995_s1 + $0x78] sm:$0xff]   ;;  %v695_v4 = vld [vmem:[%s995_s1 + $0x70] sm:$0xff]   ;;  %v699_v8 = vld [vmem:[%s995_s1 + $0x68] sm:$0xff]  }
   0x2   :  { %v692_v1 = vld [vmem:[%s995_s1 + $0xf8] sm:$0xff]   ;;  %611 = vmatprep.subr.bf16.mxu0 %v691_v0  ;;  %v696_v5 = vld [vmem:[%s995_s1 + $0xf0] sm:$0xff]   ;;  %v700_v9 = vld [vmem:[%s995_s1 + $0xe8] sm:$0xff]  }
   0x3   :  { %v693_v2 = vld [vmem:[%s995_s1 + $0x38] sm:$0xff]   ;;  %651 = vmatprep.subr.bf16.mxu1 %v692_v1  ;;  %v697_v6 = vld [vmem:[%s995_s1 + $0x30] sm:$0xff]   ;;  %v701_v10 = vld [vmem:[%s995_s1 + $0x28] sm:$0xff]  }
   0x4   :  { %v694_v3 = vld [vmem:[%s995_s1 + $0xb8] sm:$0xff]   ;;  %612 = vmatpush3.bf16.msra.mxu0 %v693_v2  ;;  %v698_v7 = vld [vmem:[%s995_s1 + $0xb0] sm:$0xff]   ;;  %v702_v11 = vld [vmem:[%s995_s1 + $0xa8] sm:$0xff]  }
   0x5   :  { %652 = vmatpush3.bf16.msra.mxu1 %v694_v3  ;;  %613 = vmatprep.subr.bf16.mxu0 %v695_v4  ;;  %v703_v12 = vld [vmem:[%s995_s1 + $0x60] sm:$0xff]   ;;  %v707_v16 = vld [vmem:[%s995_s1 + $0x58] sm:$0xff]   ;;  %v711_v20 = vld [vmem:[%s995_s1 + $0x50] sm:$0xff]  }
   0x6   :  { %653 = vmatprep.subr.bf16.mxu1 %v696_v5  ;;  %v704_v13 = vld [vmem:[%s995_s1 + $0xe0] sm:$0xff]   ;;  %v708_v17 = vld [vmem:[%s995_s1 + $0xd8] sm:$0xff]   ;;  %v712_v21 = vld [vmem:[%s995_s1 + $0xd0] sm:$0xff]  }
   0x7   :  { %v705_v14 = vld [vmem:[%s995_s1 + $0x20] sm:$0xff]   ;;  %v709_v18 = vld [vmem:[%s995_s1 + $0x18] sm:$0xff]   ;;  %v713_v22 = vld [vmem:[%s995_s1 + $0x10] sm:$0xff]  }
   0x8   :  { %614 = vmatpush3.bf16.msra.mxu0 %v697_v6  ;;  %v706_v15 = vld [vmem:[%s995_s1 + $0xa0] sm:$0xff]   ;;  %v710_v19 = vld [vmem:[%s995_s1 + $0x98] sm:$0xff]   ;;  %v714_v23 = vld [vmem:[%s995_s1 + $0x90] sm:$0xff]  }
   0x9   :  { %654 = vmatpush3.bf16.msra.mxu1 %v698_v7  ;;  %615 = vmatprep.subr.bf16.mxu0 %v699_v8  ;;  %v715_v24 = vld [vmem:[%s995_s1 + $0x48] sm:$0xff]   ;;  %v719_v28 = vld [vmem:[%s995_s1 + $0x40] sm:$0xff]  }
   0xa   :  { %655 = vmatprep.subr.bf16.mxu1 %v700_v9  ;;  %v716_v25 = vld [vmem:[%s995_s1 + $0xc8] sm:$0xff]   ;;  %v720_v29 = vld [vmem:[%s995_s1 + $0xc0] sm:$0xff]  }
   0xb   :  { %v717_v26 = vld [vmem:[%s995_s1 + $0x8] sm:$0xff]   ;;  %v721_v30 = vld [vmem:[%s995_s1] sm:$0xff]  }
   0xc   :  { %616 = vmatpush3.bf16.msra.mxu0 %v701_v10  ;;  %v718_v27 = vld [vmem:[%s995_s1 + $0x88] sm:$0xff]   ;;  %v722_v31 = vld [vmem:[%s995_s1 + $0x80] sm:$0xff]  }
   0xd   :  { %656 = vmatpush3.bf16.msra.mxu1 %v702_v11  ;;  %617 = vmatprep.subr.bf16.mxu0 %v703_v12  ;;  %v723_v32 = vld [vmem:[%s996_s0] ss:$16 sps:$4 sm:$0xff]   ;;  %v725_v33 = vld [vmem:[%s996_s0 + $0x4] ss:$16 sps:$4 sm:$0xff]   ;;  %v726_v34 = vld [vmem:[%s996_s0 + $0x8] ss:$16 sps:$4 sm:$0xff]  }
   0xe   :  { %657 = vmatprep.subr.bf16.mxu1 %v704_v13  ;;  %v728_v35 = vld [vmem:[%s996_s0 + $0xc] ss:$16 sps:$4 sm:$0xff]   ;;  %405 = vmatprep.mubr.bf16.mxu0 %v725_v33  ;;  %v729_v36 = vld [vmem:[%s996_s0 + $0x24] ss:$16 sps:$4 sm:$0xff]   ;;  %v733_v38 = vld [vmem:[%s996_s0 + $0x20] ss:$16 sps:$4 sm:$0xff]  }
   0xf   :  { %470 = vmatprep.mubr.bf16.mxu1 %v728_v35  ;;  %v731_v37 = vld [vmem:[%s996_s0 + $0x2c] ss:$16 sps:$4 sm:$0xff]   ;;  %v734_v39 = vld [vmem:[%s996_s0 + $0x28] ss:$16 sps:$4 sm:$0xff]   ;;  %v735_v40 = vld [vmem:[%s996_s0 + $0x44] ss:$16 sps:$4 sm:$0xff]  }
  0x10   :  { %618 = vmatpush3.bf16.msra.mxu0 %v705_v14  ;;  %v737_v41 = vld [vmem:[%s996_s0 + $0x4c] ss:$16 sps:$4 sm:$0xff]   ;;  %v739_v42 = vld [vmem:[%s996_s0 + $0x40] ss:$16 sps:$4 sm:$0xff]   ;;  %v740_v43 = vld [vmem:[%s996_s0 + $0x48] ss:$16 sps:$4 sm:$0xff]  }
  0x11   :  { %658 = vmatpush3.bf16.msra.mxu1 %v706_v15  ;;  %619 = vmatprep.subr.bf16.mxu0 %v707_v16  ;;  %v741_v44 = vld [vmem:[%s996_s0 + $0x64] ss:$16 sps:$4 sm:$0xff]   ;;  %v743_v45 = vld [vmem:[%s996_s0 + $0x6c] ss:$16 sps:$4 sm:$0xff]   ;;  %v745_v46 = vld [vmem:[%s996_s0 + $0x60] ss:$16 sps:$4 sm:$0xff]  }
  0x12   :  { %659 = vmatprep.subr.bf16.mxu1 %v708_v17  ;;  %v746_v47 = vld [vmem:[%s996_s0 + $0x68] ss:$16 sps:$4 sm:$0xff]   ;;  %v924_v55 = vld [vmem:[%s997_s2] ss:$0 sm:$0xff] }
  0x13   :  { %v929_v59 = vld [vmem:[%s998_s3] ss:$0 sm:$0xff]  ;;  %v534_v12 = vld [vmem:[%s999_s4 + $0x8] sm:$0xff] }
  0x14   :  { %620 = vmatpush3.bf16.msra.mxu0 %v709_v18  ;;  %v533_v1 = vld [vmem:[%s999_s4] sm:$0xff] }
  0x15   :  { %660 = vmatpush3.bf16.msra.mxu1 %v710_v19  ;;  %621 = vmatprep.subr.bf16.mxu0 %v711_v20 }
  0x16   :  { %661 = vmatprep.subr.bf16.mxu1 %v712_v21 }
  0x18   :  { %622 = vmatpush3.bf16.msra.mxu0 %v713_v22 }
  0x19   :  { %662 = vmatpush3.bf16.msra.mxu1 %v714_v23  ;;  %623 = vmatprep.subr.bf16.mxu0 %v715_v24  ;;  %v535_v23 = vld [vmem:[%s999_s4 + $0x10] sm:$0xff] }
  0x1a   :  { %663 = vmatprep.subr.bf16.mxu1 %v716_v25 }
  0x1c   :  { %624 = vmatpush3.bf16.msra.mxu0 %v717_v26 }
  0x1d   :  { %664 = vmatpush3.bf16.msra.mxu1 %v718_v27  ;;  %625 = vmatprep.subr.bf16.mxu0 %v719_v28 }
  0x1e   :  { %665 = vmatprep.subr.bf16.mxu1 %v720_v29 }
  0x20   :  { %626 = vmatpush3.bf16.msra.mxu0 %v721_v30 }
  0x21   :  { %666 = vmatpush3.bf16.msra.mxu1 %v722_v31 }
  0x23   :  { %406 = vmatmul.mubr.bf16.vlgmr.msra.gmra.mxu0 %v723_v32 }
  0x24   :  { %471 = vmatmul.mubr.bf16.vlgmr.msra.gmra.mxu1 %v726_v34  ;;  %413 = vmatprep.mubr.bf16.mxu0 %v729_v36  ;;  %v536_v34 = vld [vmem:[%s999_s4 + $0x18] sm:$0xff] }
  0x25   :  { %478 = vmatprep.mubr.bf16.mxu1 %v731_v37 }
  0x2b   :  { %414 = vmatmul.mubr.bf16.gmra.mxu0 %v733_v38 }
  0x2c   :  { %479 = vmatmul.mubr.bf16.gmra.mxu1 %v734_v39  ;;  %421 = vmatprep.mubr.bf16.mxu0 %v735_v40 }
  0x2d   :  { %486 = vmatprep.mubr.bf16.mxu1 %v737_v41 }
  0x33   :  { %422 = vmatmul.mubr.bf16.gmra.mxu0 %v739_v42 }
  0x34   :  { %487 = vmatmul.mubr.bf16.gmra.mxu1 %v740_v43  ;;  %429 = vmatprep.mubr.bf16.mxu0 %v741_v44 }
  0x35   :  { %494 = vmatprep.mubr.bf16.mxu1 %v743_v45  ;;  %v537_v45 = vld [vmem:[%s999_s4 + $0x20] sm:$0xff] }
  0x3b   :  { %430 = vmatmul.mubr.bf16.gmra.mxu0 %v745_v46 }
  0x3c   :  { %495 = vmatmul.mubr.bf16.gmra.mxu1 %v746_v47 }
  0xe3   :  { %v627_v48 = vpop.f32.mrf.mxu0 }
  0xe4   :  { %v667_v49 = vpop.f32.mrf.mxu1 }
  0xe5   :  { %v628_v50 = vpop.f32.mrf.mxu0 }
  0xe6   :  { %v629_v51 = vadd.f32 %v628_v50, %v627_v48  ;;  %v668_v52 = vpop.f32.mrf.mxu1 }
  0xe7   :  { %v669_v53 = vadd.f32 %v668_v52, %v667_v49  ;;  %v630_v54 = vpop.f32.mrf.mxu0 }
  0xe8   :  { %v670_v56 = vpop.f32.mrf.mxu1 }
  0xe9   :  { %v473_v57 = vadd.f32 %v669_v53, %v629_v51  ;;  %v631_v58 = vpop.f32.mrf.mxu0 }
  0xea   :  { %v632_v60 = vadd.f32 %v631_v58, %v630_v54  ;;  %v671_v61 = vpop.f32.mrf.mxu1 }
  0xeb   :  { %v510_v62 = vmul.f32 %v924_v55, %v473_v57  ;;  %v672_v63 = vadd.f32 %v671_v61, %v670_v56  ;;  %v633_v0 = vpop.f32.mrf.mxu0  ;;  %v538_v57 = vld [vmem:[%s999_s4 + $0x28] sm:$0xff] }
  0xec   :  { %v673_v2 = vpop.f32.mrf.mxu1 }
  0xed   :  { %v525_v3 = vadd.f32 %v929_v59, %v510_v62  ;;  %v476_v4 = vadd.f32 %v672_v63, %v632_v60  ;;  %v634_v5 = vpop.f32.mrf.mxu0 }
  0xee   :  { %v635_v6 = vadd.f32 %v634_v5, %v633_v0  ;;  %v674_v7 = vpop.f32.mrf.mxu1 }
  0xef   :  { %v541_v8 = vadd.f32 %v533_v1, %v525_v3  ;;  %v511_v9 = vmul.f32 %v924_v55, %v476_v4  ;;  %v675_v10 = vadd.f32 %v674_v7, %v673_v2  ;;  %v636_v11 = vpop.f32.mrf.mxu0  ;;  %v539_v4 = vld [vmem:[%s999_s4 + $0x30] sm:$0xff] }
  0xf0   :  { %v676_v13 = vpop.f32.mrf.mxu1 }
  0xf1   :  { %549 = vst [vmem:[%s1000_s5] sm:$0xff] %v541_v8  ;;  %v526_v14 = vadd.f32 %v929_v59, %v511_v9  ;;  %v481_v15 = vadd.f32 %v675_v10, %v635_v6  ;;  %v637_v16 = vpop.f32.mrf.mxu0  ;;  %v540_v9 = vld [vmem:[%s999_s4 + $0x38] sm:$0xff] }
  0xf2   :  { %v638_v17 = vadd.f32 %v637_v16, %v636_v11  ;;  %v677_v18 = vpop.f32.mrf.mxu1 }
  0xf3   :  { %v542_v19 = vadd.f32 %v534_v12, %v526_v14  ;;  %v512_v20 = vmul.f32 %v924_v55, %v481_v15  ;;  %v678_v21 = vadd.f32 %v677_v18, %v676_v13  ;;  %v639_v22 = vpop.f32.mrf.mxu0 }
  0xf4   :  { %v679_v24 = vpop.f32.mrf.mxu1 }
  0xf5   :  { %550 = vst [vmem:[%s1000_s5 + $0x8] sm:$0xff] %v542_v19  ;;  %v527_v25 = vadd.f32 %v929_v59, %v512_v20  ;;  %v484_v26 = vadd.f32 %v678_v21, %v638_v17  ;;  %v640_v27 = vpop.f32.mrf.mxu0 }
  0xf6   :  { %v641_v28 = vadd.f32 %v640_v27, %v639_v22  ;;  %v680_v29 = vpop.f32.mrf.mxu1 }
  0xf7   :  { %v543_v30 = vadd.f32 %v535_v23, %v527_v25  ;;  %v513_v31 = vmul.f32 %v924_v55, %v484_v26  ;;  %v681_v32 = vadd.f32 %v680_v29, %v679_v24  ;;  %v642_v33 = vpop.f32.mrf.mxu0 }
  0xf8   :  { %v682_v35 = vpop.f32.mrf.mxu1 }
  0xf9   :  { %551 = vst [vmem:[%s1000_s5 + $0x10] sm:$0xff] %v543_v30  ;;  %v528_v36 = vadd.f32 %v929_v59, %v513_v31  ;;  %v489_v37 = vadd.f32 %v681_v32, %v641_v28  ;;  %v643_v38 = vpop.f32.mrf.mxu0 }
  0xfa   :  { %v644_v39 = vadd.f32 %v643_v38, %v642_v33  ;;  %v683_v40 = vpop.f32.mrf.mxu1 }
  0xfb   :  { %v544_v41 = vadd.f32 %v536_v34, %v528_v36  ;;  %v514_v42 = vmul.f32 %v924_v55, %v489_v37  ;;  %v684_v43 = vadd.f32 %v683_v40, %v682_v35  ;;  %v645_v44 = vpop.f32.mrf.mxu0 }
  0xfc   :  { %v685_v46 = vpop.f32.mrf.mxu1 }
  0xfd   :  { %552 = vst [vmem:[%s1000_s5 + $0x18] sm:$0xff] %v544_v41  ;;  %v529_v47 = vadd.f32 %v929_v59, %v514_v42  ;;  %v492_v48 = vadd.f32 %v684_v43, %v644_v39  ;;  %v646_v49 = vpop.f32.mrf.mxu0 }
  0xfe   :  { %v647_v50 = vadd.f32 %v646_v49, %v645_v44  ;;  %v686_v51 = vpop.f32.mrf.mxu1 }
  0xff   :  { %v545_v52 = vadd.f32 %v537_v45, %v529_v47  ;;  %v515_v53 = vmul.f32 %v924_v55, %v492_v48  ;;  %v687_v54 = vadd.f32 %v686_v51, %v685_v46  ;;  %v648_v56 = vpop.f32.mrf.mxu0 }
 0x100   :  { %v688_v58 = vpop.f32.mrf.mxu1 }
 0x101   :  { %553 = vst [vmem:[%s1000_s5 + $0x20] sm:$0xff] %v545_v52  ;;  %v530_v60 = vadd.f32 %v929_v59, %v515_v53  ;;  %v497_v61 = vadd.f32 %v687_v54, %v647_v50  ;;  %v649_v62 = vpop.f32.mrf.mxu0 }
 0x102   :  { %v650_v63 = vadd.f32 %v649_v62, %v648_v56  ;;  %v689_v0 = vpop.f32.mrf.mxu1 }
 0x103   :  { %v546_v1 = vadd.f32 %v538_v57, %v530_v60  ;;  %v516_v2 = vmul.f32 %v924_v55, %v497_v61  ;;  %v690_v3 = vadd.f32 %v689_v0, %v688_v58 }
 0x105   :  { %554 = vst [vmem:[%s1000_s5 + $0x28] sm:$0xff] %v546_v1  ;;  %v531_v5 = vadd.f32 %v929_v59, %v516_v2  ;;  %v500_v6 = vadd.f32 %v690_v3, %v650_v63 }
 0x107   :  { %v547_v7 = vadd.f32 %v539_v4, %v531_v5  ;;  %v517_v8 = vmul.f32 %v924_v55, %v500_v6 }
 0x109   :  { %555 = vst [vmem:[%s1000_s5 + $0x30] sm:$0xff] %v547_v7  ;;  %v532_v10 = vadd.f32 %v929_v59, %v517_v8 }
 0x10b   :  { %v548_v11 = vadd.f32 %v540_v9, %v532_v10 }
 0x10d   :  { %556 = vst [vmem:[%s1000_s5 + $0x38] sm:$0xff] %v548_v11 }

// kernel: vit_encoder_forward.26
= control target key start
LH: loop header
LB: loop body
LE: loop exit
PB: predicated region body
PF: predicated region fallthrough
CT: control target
= control target key end

     0   :  { %v260_v38 = vlaneseq  ;;  %s573_s1 = inlined_call_operand.vmem [shape: bf16[256,256], index: 1, kind: input, shape index: {}]   ;;  %s574_s0 = inlined_call_operand.vmem [shape: f32[16,256], index: 0, kind: input, shape index: {}]   ;;  %s575_s2 = inlined_call_operand.vmem [shape: f32[1,256], index: 2, kind: input, shape index: {}]   ;;  %s576_s3 = inlined_call_operand.vmem [shape: f32[1,256], index: 3, kind: input, shape index: {}]   ;;  %s577_s4 = inlined_call_operand.vmem [shape: bf16[16,256], index: 4, kind: output, shape index: {}]  }
   0x1   :  { %v372_v0 = vld [vmem:[%s573_s1 + $0x74] ss:$8 sps:$4 sm:$0xff]   ;;  %v374_v1 = vld [vmem:[%s573_s1 + $0x70] ss:$8 sps:$4 sm:$0xff]   ;;  %v375_v2 = vld [vmem:[%s573_s1 + $0x64] ss:$8 sps:$4 sm:$0xff]  }
   0x2   :  { %215 = vmatprep.subr.bf16.mxu0 %v372_v0  ;;  %v377_v3 = vld [vmem:[%s573_s1 + $0x60] ss:$8 sps:$4 sm:$0xff]   ;;  %v378_v4 = vld [vmem:[%s573_s1 + $0x54] ss:$8 sps:$4 sm:$0xff]   ;;  %v380_v5 = vld [vmem:[%s573_s1 + $0x50] ss:$8 sps:$4 sm:$0xff]  }
   0x3   :  { %216 = vmatpush1.bf16.msra.mxu0 %v374_v1  ;;  %v381_v6 = vld [vmem:[%s573_s1 + $0x44] ss:$8 sps:$4 sm:$0xff]   ;;  %v383_v7 = vld [vmem:[%s573_s1 + $0x40] ss:$8 sps:$4 sm:$0xff]   ;;  %v384_v8 = vld [vmem:[%s573_s1 + $0x34] ss:$8 sps:$4 sm:$0xff]  }
   0x4   :  { %217 = vmatprep.subr.bf16.mxu0 %v375_v2  ;;  %v386_v9 = vld [vmem:[%s573_s1 + $0x30] ss:$8 sps:$4 sm:$0xff]   ;;  %v387_v10 = vld [vmem:[%s573_s1 + $0x24] ss:$8 sps:$4 sm:$0xff]   ;;  %v389_v11 = vld [vmem:[%s573_s1 + $0x20] ss:$8 sps:$4 sm:$0xff]  }
   0x5   :  { %v390_v12 = vld [vmem:[%s573_s1 + $0x14] ss:$8 sps:$4 sm:$0xff]   ;;  %v18_v13 = vld [vmem:[%s574_s0 + $0x8] sm:$0xff]  ;;  %v392_v16 = vld [vmem:[%s573_s1 + $0x10] ss:$8 sps:$4 sm:$0xff]   ;;  %v261_v39 = vshrl.u32 %v260_v38, 7 }
   0x6   :  { %v20_v14 = vld [vmem:[%s574_s0 + $0x18] sm:$0xff]  ;;  %v393_v17 = vld [vmem:[%s573_s1 + $0x4] ss:$8 sps:$4 sm:$0xff]   ;;  %v395_v18 = vld [vmem:[%s573_s1] ss:$8 sps:$4 sm:$0xff]  }
   0x7   :  { %218 = vmatpush1.bf16.msra.mxu0 %v377_v3  ;;  %v22_v15 = vpack.c.bf16 %v20_v14, %v18_v13  ;;  %v396_v19 = vld [vmem:[%s573_s1 + $0xf4] ss:$8 sps:$4 sm:$0xff]   ;;  %v398_v20 = vld [vmem:[%s573_s1 + $0xf0] ss:$8 sps:$4 sm:$0xff]   ;;  %v399_v21 = vld [vmem:[%s573_s1 + $0xe4] ss:$8 sps:$4 sm:$0xff]  }
   0x8   :  { %219 = vmatprep.subr.bf16.mxu0 %v378_v4  ;;  %v401_v22 = vld [vmem:[%s573_s1 + $0xe0] ss:$8 sps:$4 sm:$0xff]   ;;  %v402_v23 = vld [vmem:[%s573_s1 + $0xd4] ss:$8 sps:$4 sm:$0xff]   ;;  %v404_v24 = vld [vmem:[%s573_s1 + $0xd0] ss:$8 sps:$4 sm:$0xff]  }
   0x9   :  { %247 = vmatprep.mubr.bf16.mxu0 %v22_v15  ;;  %v405_v25 = vld [vmem:[%s573_s1 + $0xc4] ss:$8 sps:$4 sm:$0xff]   ;;  %v407_v26 = vld [vmem:[%s573_s1 + $0xc0] ss:$8 sps:$4 sm:$0xff]   ;;  %v408_v27 = vld [vmem:[%s573_s1 + $0xb4] ss:$8 sps:$4 sm:$0xff]  }
   0xa   :  { %v410_v28 = vld [vmem:[%s573_s1 + $0xb0] ss:$8 sps:$4 sm:$0xff]   ;;  %v411_v29 = vld [vmem:[%s573_s1 + $0xa4] ss:$8 sps:$4 sm:$0xff]   ;;  %v413_v30 = vld [vmem:[%s573_s1 + $0xa0] ss:$8 sps:$4 sm:$0xff]  }
   0xb   :  { %220 = vmatpush1.bf16.msra.mxu0 %v380_v5  ;;  %v414_v31 = vld [vmem:[%s573_s1 + $0x94] ss:$8 sps:$4 sm:$0xff]   ;;  %v416_v32 = vld [vmem:[%s573_s1 + $0x90] ss:$8 sps:$4 sm:$0xff]   ;;  %v417_v33 = vld [vmem:[%s573_s1 + $0x84] ss:$8 sps:$4 sm:$0xff]  }
   0xc   :  { %221 = vmatprep.subr.bf16.mxu0 %v381_v6  ;;  %v419_v34 = vld [vmem:[%s573_s1 + $0x80] ss:$8 sps:$4 sm:$0xff]   ;;  %v19_v36 = vld [vmem:[%s574_s0 + $0x10] sm:$0xff]  ;;  %v262_v40 = vsub.s32 0, %v261_v39  ;;  %v266_v42 = vsub.s32 1, %v261_v39 }
   0xd   :  { %v17_v35 = vld [vmem:[%s574_s0] sm:$0xff] }
   0xe   :  { %v21_v37 = vpack.c.bf16 %v19_v36, %v17_v35  ;;  %v258_v41 = vld [vmem:[%s575_s2] sm:$0x3] }
   0xf   :  { %222 = vmatpush1.bf16.msra.mxu0 %v383_v7  ;;  %v274_v43 = vld [vmem:[%s576_s3] sm:$0x3]  ;;  %v263_v44 = vrot.slane %v258_v41, %v262_v40  ;;  %v267_v46 = vrot.slane %v258_v41, %v266_v42 }
  0x10   :  { %223 = vmatprep.subr.bf16.mxu0 %v384_v8  ;;  %v279_v45 = vrot.slane %v274_v43, %v262_v40  ;;  %v283_v49 = vrot.slane %v274_v43, %v266_v42 }
  0x13   :  { %224 = vmatpush1.bf16.msra.mxu0 %v386_v9 }
  0x14   :  { %225 = vmatprep.subr.bf16.mxu0 %v387_v10 }
  0x17   :  { %226 = vmatpush1.bf16.msra.mxu0 %v389_v11 }
  0x18   :  { %227 = vmatprep.subr.bf16.mxu0 %v390_v12 }
  0x1b   :  { %228 = vmatpush1.bf16.msra.mxu0 %v392_v16 }
  0x1c   :  { %229 = vmatprep.subr.bf16.mxu0 %v393_v17 }
  0x1f   :  { %230 = vmatpush1.bf16.msra.mxu0 %v395_v18 }
  0x20   :  { %231 = vmatprep.subr.bf16.mxu0 %v396_v19 }
  0x23   :  { %232 = vmatpush2.bf16.msra.mxu0 %v398_v20 }
  0x24   :  { %233 = vmatprep.subr.bf16.mxu0 %v399_v21 }
  0x27   :  { %234 = vmatpush2.bf16.msra.mxu0 %v401_v22 }
  0x28   :  { %235 = vmatprep.subr.bf16.mxu0 %v402_v23 }
  0x2b   :  { %236 = vmatpush2.bf16.msra.mxu0 %v404_v24 }
  0x2c   :  { %237 = vmatprep.subr.bf16.mxu0 %v405_v25 }
  0x2f   :  { %238 = vmatpush2.bf16.msra.mxu0 %v407_v26 }
  0x30   :  { %239 = vmatprep.subr.bf16.mxu0 %v408_v27 }
  0x33   :  { %240 = vmatpush2.bf16.msra.mxu0 %v410_v28 }
  0x34   :  { %241 = vmatprep.subr.bf16.mxu0 %v411_v29 }
  0x37   :  { %242 = vmatpush2.bf16.msra.mxu0 %v413_v30 }
  0x38   :  { %243 = vmatprep.subr.bf16.mxu0 %v414_v31 }
  0x3b   :  { %244 = vmatpush2.bf16.msra.mxu0 %v416_v32 }
  0x3c   :  { %245 = vmatprep.subr.bf16.mxu0 %v417_v33 }
  0x3f   :  { %246 = vmatpush2.bf16.msra.mxu0 %v419_v34 }
  0x42   :  { %248 = vmatmul.mubr.bf16.vlgmr.msra.gmra.mxu0 %v21_v37 }
 0x102   :  { %v249_v47 = vpop.f32.mrf.mxu0 }
 0x103   :  { %v270_v48 = vmul.f32 %v263_v44, %v249_v47 }
 0x104   :  { %v251_v50 = vpop.f32.mrf.mxu0 }
 0x105   :  { %v286_v51 = vadd.f32 %v279_v45, %v270_v48  ;;  %v271_v52 = vmul.f32 %v267_v46, %v251_v50 }
 0x106   :  { %v253_v53 = vpop.f32.mrf.mxu0 }
 0x107   :  { %v294_v54 = vmin.f32 %v286_v51, 0.0  ;;  %v287_v55 = vadd.f32 %v283_v49, %v271_v52  ;;  %v272_v56 = vmul.f32 %v263_v44, %v253_v53  ;;  %vm290_vm0 = vcmp.gt.f32.partialorder %v286_v51, 0.0 }
 0x108   :  { %v255_v57 = vpop.f32.mrf.mxu0 }
 0x109   :  { %v298_v58 = vmul.f32 1.442695, %v294_v54  ;;  %v295_v59 = vmin.f32 %v287_v55, 0.0  ;;  %v288_v60 = vadd.f32 %v279_v45, %v272_v56  ;;  %v273_v61 = vmul.f32 %v267_v46, %v255_v57 }
 0x10a   :  { %vm291_vm1 = vcmp.gt.f32.partialorder %v287_v55, 0.0 }
 0x10b   :  { %420 = vpow2.f32 %v298_v58  ;;  %v300_v62 = vmul.f32 1.442695, %v295_v59  ;;  %v296_v63 = vmin.f32 %v288_v60, 0.0  ;;  %v289_v0 = vadd.f32 %v283_v49, %v273_v61 }
 0x10c   :  { %vm292_vm2 = vcmp.gt.f32.partialorder %v288_v60, 0.0 }
 0x10d   :  { %422 = vpow2.f32 %v300_v62  ;;  %v302_v1 = vmul.f32 1.442695, %v296_v63  ;;  %v297_v2 = vmin.f32 %v289_v0, 0.0  ;;  %vm293_vm3 = vcmp.gt.f32.partialorder %v289_v0, 0.0 }
 0x10f   :  { %424 = vpow2.f32 %v302_v1  ;;  %v304_v3 = vmul.f32 1.442695, %v297_v2 }
 0x111   :  { %426 = vpow2.f32 %v304_v3 }
 0x118   :  { %v421_v4 = vpop.eup %420 }
 0x119   :  { %v364_v5 = vadd.f32 -1.0, %v421_v4 }
 0x11a   :  { %v423_v6 = vpop.eup %422 }
 0x11b   :  { %v365_v7 = vadd.f32 -1.0, %v423_v6  ;;  %v310_v9 = vsel %vm290_vm0, %v286_v51, %v364_v5 }
 0x11c   :  { %v425_v8 = vpop.eup %424 }
 0x11d   :  { %v311_v10 = vsel %vm291_vm1, %v287_v55, %v365_v7  ;;  %v366_v12 = vadd.f32 -1.0, %v425_v8 }
 0x11e   :  { %v370_v11 = vpack.c.bf16 %v311_v10, %v310_v9  ;;  %v427_v13 = vpop.eup %426 }
 0x11f   :  { %v367_v14 = vadd.f32 -1.0, %v427_v13  ;;  %v312_v15 = vsel %vm292_vm2, %v288_v60, %v366_v12 }
 0x120   :  { %326 = vst [vmem:[%s577_s4] sm:$0xff] %v370_v11 }
 0x121   :  { %v313_v16 = vsel %vm293_vm3, %v289_v0, %v367_v14 }
 0x122   :  { %v371_v17 = vpack.c.bf16 %v313_v16, %v312_v15 }
 0x124   :  { %327 = vst [vmem:[%s577_s4 + $0x8] sm:$0xff] %v371_v17 }

// kernel: vit_encoder_forward.27
= control target key start
LH: loop header
LB: loop body
LE: loop exit
PB: predicated region body
PF: predicated region fallthrough
CT: control target
= control target key end

     0   :  { %s375_s1 = inlined_call_operand.vmem [shape: bf16[256,128], index: 1, kind: input, shape index: {}]   ;;  %s376_s0 = inlined_call_operand.vmem [shape: bf16[16,256], index: 0, kind: input, shape index: {}]   ;;  %s377_s2 = inlined_call_operand.vmem [shape: f32[1,128], index: 2, kind: input, shape index: {}]   ;;  %s378_s3 = inlined_call_operand.vmem [shape: f32[1,128], index: 3, kind: input, shape index: {}]   ;;  %s379_s4 = inlined_call_operand.vmem [shape: f32[16,128], index: 4, kind: output, shape index: {}]  }
   0x1   :  { %v265_v0 = vld [vmem:[%s375_s1 + $0x78] sm:$0xff]   ;;  %v267_v2 = vld [vmem:[%s375_s1 + $0x70] sm:$0xff]   ;;  %v269_v4 = vld [vmem:[%s375_s1 + $0x68] sm:$0xff]  }
   0x2   :  { %v266_v1 = vld [vmem:[%s375_s1 + $0x38] sm:$0xff]   ;;  %243 = vmatprep.subr.bf16.mxu0 %v265_v0  ;;  %v268_v3 = vld [vmem:[%s375_s1 + $0x30] sm:$0xff]   ;;  %v270_v5 = vld [vmem:[%s375_s1 + $0x28] sm:$0xff]  }
   0x3   :  { %244 = vmatpush3.bf16.msra.mxu0 %v266_v1  ;;  %v271_v6 = vld [vmem:[%s375_s1 + $0x60] sm:$0xff]   ;;  %v273_v8 = vld [vmem:[%s375_s1 + $0x58] sm:$0xff]   ;;  %v275_v10 = vld [vmem:[%s375_s1 + $0x50] sm:$0xff]  }
   0x4   :  { %245 = vmatprep.subr.bf16.mxu0 %v267_v2  ;;  %v272_v7 = vld [vmem:[%s375_s1 + $0x20] sm:$0xff]   ;;  %v274_v9 = vld [vmem:[%s375_s1 + $0x18] sm:$0xff]   ;;  %v276_v12 = vld [vmem:[%s375_s1 + $0x10] sm:$0xff]  }
   0x5   :  { %v283_v11 = vld [vmem:[%s376_s0 + $0x4] ss:$8 sps:$4 sm:$0xff]   ;;  %v281_v17 = vld [vmem:[%s376_s0] ss:$8 sps:$4 sm:$0xff]  }
   0x6   :  { %190 = vmatprep.mubr.bf16.mxu0 %v283_v11  ;;  %v277_v13 = vld [vmem:[%s375_s1 + $0x48] sm:$0xff]   ;;  %v279_v15 = vld [vmem:[%s375_s1 + $0x40] sm:$0xff]  }
   0x7   :  { %246 = vmatpush3.bf16.msra.mxu0 %v268_v3  ;;  %v278_v14 = vld [vmem:[%s375_s1 + $0x8] sm:$0xff]   ;;  %v280_v16 = vld [vmem:[%s375_s1] sm:$0xff]  }
   0x8   :  { %247 = vmatprep.subr.bf16.mxu0 %v269_v4  ;;  %v241_v20 = vld [vmem:[%s377_s2] ss:$0 sm:$0xff] }
   0x9   :  { %v242_v22 = vld [vmem:[%s378_s3] ss:$0 sm:$0xff] }
   0xb   :  { %248 = vmatpush3.bf16.msra.mxu0 %v270_v5 }
   0xc   :  { %249 = vmatprep.subr.bf16.mxu0 %v271_v6 }
   0xf   :  { %250 = vmatpush3.bf16.msra.mxu0 %v272_v7 }
  0x10   :  { %251 = vmatprep.subr.bf16.mxu0 %v273_v8 }
  0x13   :  { %252 = vmatpush3.bf16.msra.mxu0 %v274_v9 }
  0x14   :  { %253 = vmatprep.subr.bf16.mxu0 %v275_v10 }
  0x17   :  { %254 = vmatpush3.bf16.msra.mxu0 %v276_v12 }
  0x18   :  { %255 = vmatprep.subr.bf16.mxu0 %v277_v13 }
  0x1b   :  { %256 = vmatpush3.bf16.msra.mxu0 %v278_v14 }
  0x1c   :  { %257 = vmatprep.subr.bf16.mxu0 %v279_v15 }
  0x1f   :  { %258 = vmatpush3.bf16.msra.mxu0 %v280_v16 }
  0x22   :  { %191 = vmatmul.mubr.bf16.vlgmr.msra.gmra.mxu0 %v281_v17 }
  0xe2   :  { %v259_v18 = vpop.f32.mrf.mxu0 }
  0xe4   :  { %v260_v19 = vpop.f32.mrf.mxu0 }
  0xe5   :  { %v261_v21 = vadd.f32 %v260_v19, %v259_v18 }
  0xe6   :  { %v262_v23 = vpop.f32.mrf.mxu0 }
  0xe7   :  { %v206_v24 = vmul.f32 %v261_v21, %v241_v20 }
  0xe8   :  { %v263_v25 = vpop.f32.mrf.mxu0 }
  0xe9   :  { %v215_v26 = vadd.f32 %v242_v22, %v206_v24  ;;  %v264_v27 = vadd.f32 %v263_v25, %v262_v23 }
  0xeb   :  { %217 = vst [vmem:[%s379_s4] sm:$0xff] %v215_v26  ;;  %v207_v28 = vmul.f32 %v264_v27, %v241_v20 }
  0xed   :  { %v216_v29 = vadd.f32 %v242_v22, %v207_v28 }
  0xef   :  { %218 = vst [vmem:[%s379_s4 + $0x8] sm:$0xff] %v216_v29 }

</bundles_post_ra>
